<compile_context>
chip_gen: v7x
topology: tpu7x:2x2x1
jax: 0.10.0
libtpu: 0.0.40
codegen_flags: <defaults>
</compile_context>

<pallas_src>
import functools

import jax
import jax.numpy as jnp
from jax import lax
from jax.experimental import pallas as pl
from jax.experimental.pallas import tpu as pltpu

NEG_SLOPE = 0.01      # nn.LeakyReLU default
IN_EPS = 1e-5         # nn.InstanceNorm2d default eps
LANES = 128

_TAPS = ((0, 0), (0, 1), (1, 0), (1, 1))   # (a, b) taps of the 2x2 conv over space-to-depth


def _round_up(n, m):
    return ((n + m - 1) // m) * m


# ---------------------------------------------------------------------------
# Down block: Conv2d(4x4, stride 2, pad 1, no bias) + InstanceNorm2d + LeakyReLU
# ---------------------------------------------------------------------------
def _down_kernel(s_ref, w_ref, o_ref, col_ref, *, hout, wout):
    # s_ref:   [Hout+1, Wout+1, 4*Cin]  space-to-depth input of ONE sample (bf16)
    # w_ref:   [16*Cin, Cp]             conv weights, lane-padded (bf16, VMEM-resident)
    # o_ref:   [Hout*Wout, Cp]          normalized + activated output (bf16)
    # col_ref: [Hout*Wout, 16*Cin]      VMEM scratch: per-sample im2col panel (bf16)

    # Build the per-sample im2col panel in VMEM (HBM only ever sees the 1x input).
    for i in range(hout):
        row = jnp.concatenate(
            [s_ref[i + a, b:b + wout, :] for (a, b) in _TAPS], axis=-1)   # [wout, 16*Cin]
        col_ref[i * wout:(i + 1) * wout, :] = row

    # One MXU matmul per sample: [Hout*Wout, 16*Cin] x [16*Cin, Cp] -> f32.
    y = jnp.dot(col_ref[...], w_ref[...], preferred_element_type=jnp.float32)

    # InstanceNorm2d (affine=False): biased variance over the H*W spatial positions, f32.
    inv_m = 1.0 / y.shape[0]
    mean = jnp.sum(y, axis=0, keepdims=True) * inv_m
    diff = y - mean
    var = jnp.sum(diff * diff, axis=0, keepdims=True) * inv_m
    z = diff * lax.rsqrt(var + IN_EPS)          # EUP rsqrt; zero-padded channels stay 0

    # LeakyReLU(0.01)
    z = jnp.where(z >= 0, z, NEG_SLOPE * z)
    o_ref[...] = z.astype(o_ref.dtype)


def conv_in_lrelu_down(x_nhwc, weight):
    """One Encoder down block. x_nhwc: [N, H, W, Cin]; weight: [Cout, Cin, 4, 4] (OIHW).
    Returns [N, H//2, W//2, Cout] in bf16."""
    N, H, W, Cin = x_nhwc.shape
    Cout = weight.shape[0]
    Hout, Wout = H // 2, W // 2
    Hp, Wp = Hout + 1, Wout + 1
    C4 = 4 * Cin                 # space-to-depth channels
    K = 4 * C4                   # contraction dim of the fused matmul (= 16*Cin)
    Cp = _round_up(Cout, LANES)  # lane-dense output channels
    HWo = Hout * Wout

    # pad by 1 + space-to-depth: [N, H+2, W+2, Cin] -> [N, Hout+1, Wout+1, 4*Cin].
    # Memory-neutral (no 16x im2col blow-up in HBM); matmul operands cast to bf16.
    xp = jnp.pad(x_nhwc, ((0, 0), (1, 1), (1, 1), (0, 0)))
    s = xp.reshape(N, Hp, 2, Wp, 2, Cin).transpose(0, 1, 3, 2, 4, 5)
    s = s.reshape(N, Hp, Wp, C4).astype(jnp.bfloat16)

    # weight [Cout, Cin, 4, 4] -> rows ordered (a, b, sh, sw, cin) with kh=2a+sh, kw=2b+sw,
    # matching the space-to-depth channel order (sh, sw, cin); lanes zero-padded to Cp.
    w = jnp.transpose(weight, (2, 3, 1, 0)).reshape(2, 2, 2, 2, Cin, Cout)  # [a,sh,b,sw,ci,co]
    w = jnp.transpose(w, (0, 2, 1, 3, 4, 5)).reshape(K, Cout)               # [(a,b,sh,sw,ci),co]
    w = jnp.pad(w, ((0, 0), (0, Cp - Cout))).astype(jnp.bfloat16)

    kernel = functools.partial(_down_kernel, hout=Hout, wout=Wout)
    cost = pl.CostEstimate(
        flops=2 * N * HWo * K * Cp,
        transcendentals=N * Cp,
        bytes_accessed=s.size * 2 + w.size * 2 + N * HWo * Cp * 2,
    )
    out = pl.pallas_call(
        kernel,
        out_shape=jax.ShapeDtypeStruct((N, HWo, Cp), jnp.bfloat16),
        grid=(N,),
        in_specs=[
            pl.BlockSpec((None, Hp, Wp, C4), lambda n: (n, 0, 0, 0)),  # one sample / grid step
            pl.BlockSpec((K, Cp), lambda n: (0, 0)),                   # weights: VMEM-resident
        ],
        out_specs=pl.BlockSpec((None, HWo, Cp), lambda n: (n, 0, 0)),
        scratch_shapes=[pltpu.VMEM((HWo, K), jnp.bfloat16)],
        compiler_params=pltpu.CompilerParams(
            dimension_semantics=("parallel",)),   # shard batch across TensorCores (v7x)
        cost_estimate=cost,
    )(s, w)

    return out[:, :, :Cout].reshape(N, Hout, Wout, Cout)


# ---------------------------------------------------------------------------
# End block: Conv2d(kernel = full spatial, stride 1, pad 0, no bias) == one GEMM
# ---------------------------------------------------------------------------
def _end_kernel(x_ref, w_ref, o_ref):
    o_ref[...] = jnp.dot(x_ref[...], w_ref[...], preferred_element_type=jnp.float32)


def conv_end(x_nhwc, weight):
    """Final ConvModule (to_1x1): returns [N, z_dim] in f32."""
    N, H, W, Cin = x_nhwc.shape
    Z = weight.shape[0]
    K = H * W * Cin
    Zp = _round_up(Z, LANES)

    x2 = x_nhwc.reshape(N, K).astype(jnp.bfloat16)            # rows ordered (h, w, cin)
    w2 = jnp.transpose(weight, (2, 3, 1, 0)).reshape(K, Z)    # same (kh, kw, cin) order
    w2 = jnp.pad(w2, ((0, 0), (0, Zp - Z))).astype(jnp.bfloat16)

    # Tiny GEMM ([N, K] x [K, Zp]); all operands fit VMEM trivially at encoder-bottleneck
    # sizes, so a single un-gridded call is the right shape here.  (A large N / z_dim would
    # get the standard tiled-matmul grid instead.)
    out = pl.pallas_call(
        _end_kernel,
        out_shape=jax.ShapeDtypeStruct((N, Zp), jnp.float32),
        in_specs=[pl.BlockSpec(memory_space=pltpu.MemorySpace.VMEM),
                  pl.BlockSpec(memory_space=pltpu.MemorySpace.VMEM)],
        out_specs=pl.BlockSpec(memory_space=pltpu.MemorySpace.VMEM),
        cost_estimate=pl.CostEstimate(
            flops=2 * N * K * Zp, transcendentals=0,
            bytes_accessed=N * K * 2 + K * Zp * 2 + N * Zp * 4),
    )(x2, w2)
    return out[:, :Z]


# ---------------------------------------------------------------------------
# Encoder forward
# ---------------------------------------------------------------------------
def encoder_forward(x_nchw, down_weights, end_weight):
    """Pallas Encoder forward. x_nchw: [N, C, H, W] -> [N, z_dim, 1, 1] (f32)."""
    x = jnp.transpose(x_nchw, (0, 2, 3, 1))       # NCHW -> NHWC once
    for w in down_weights:
        x = conv_in_lrelu_down(x, w)
    z = conv_end(x, end_weight)
    return z.reshape(z.shape[0], z.shape[1], 1, 1)


# ---------------------------------------------------------------------------
# Plain-JAX reference
# ---------------------------------------------------------------------------
def _reference(x_nchw, down_weights, end_weight, *, match_kernel_bf16):
    """XLA reference. With match_kernel_bf16=True the conv operands are rounded to bf16
    exactly like the Pallas path (isolates implementation errors from the intentional
    bf16 MXU operand cast)."""
    def q(a):
        return a.astype(jnp.bfloat16).astype(jnp.float32) if match_kernel_bf16 else a

    dn = ("NCHW", "OIHW", "NCHW")
    act = x_nchw.astype(jnp.float32)
    for w in down_weights:
        y = lax.conv_general_dilated(q(act), q(w.astype(jnp.float32)), (2, 2),
                                     [(1, 1), (1, 1)], dimension_numbers=dn,
                                     precision=lax.Precision.HIGHEST)
        mean = jnp.mean(y, axis=(2, 3), keepdims=True)
        var = jnp.mean((y - mean) ** 2, axis=(2, 3), keepdims=True)
        y = (y - mean) * lax.rsqrt(var + IN_EPS)
        act = jnp.where(y >= 0, y, NEG_SLOPE * y)
    return lax.conv_general_dilated(q(act), q(end_weight.astype(jnp.float32)), (1, 1),
                                    "VALID", dimension_numbers=dn,
                                    precision=lax.Precision.HIGHEST)


if __name__ == "__main__":
    key = jax.random.PRNGKey(0)
    N = 2
    image_size = (4, 16, 16)        # (channels, H, W)  ->  Encoder(image_size=image_size)
    h_size = (64, 128, 256)         # Encoder default
    z_dim = 256                     # Encoder default

    ks = jax.random.split(key, 5)
    x = jax.random.normal(ks[0], (N, image_size[0], image_size[1], image_size[2]), jnp.float32)

    # Conv weights in PyTorch OIHW layout; every Encoder conv has bias=False.
    chans = (image_size[0],) + tuple(h_size)
    down_weights = []
    for i in range(len(h_size)):
        fan_in = chans[i] * 4 * 4
        down_weights.append(
            jax.random.normal(ks[i + 1], (chans[i + 1], chans[i], 4, 4), jnp.float32)
            / jnp.sqrt(fan_in))

    final_spatial = image_size[1] // (2 ** len(h_size))   # 16 -> 8 -> 4 -> 2
    fan_in = h_size[-1] * final_spatial * final_spatial
    end_weight = (jax.random.normal(ks[4], (z_dim, h_size[-1], final_spatial, final_spatial),
                                    jnp.float32) / jnp.sqrt(fan_in))

    fwd = jax.jit(encoder_forward)
    out = jax.block_until_ready(fwd(x, down_weights, end_weight))
    assert out.shape == (N, z_dim, 1, 1), out.shape

    # Tight check against an operand-precision-matched reference (validates the kernel math).
    ref_bf16 = _reference(x, down_weights, end_weight, match_kernel_bf16=True)
    err_m = float(jnp.max(jnp.abs(out - ref_bf16)))
    assert jnp.allclose(out, ref_bf16, atol=1e-2, rtol=1e-2), f"max|diff| vs matched ref = {err_m}"

    # Sanity check against the pure-f32 reference (bounded bf16 quantization drift).
    ref_f32 = _reference(x, down_weights, end_weight, match_kernel_bf16=False)
    err_f = float(jnp.max(jnp.abs(out - ref_f32)))
    assert jnp.allclose(out, ref_f32, atol=1e-1, rtol=1e-1), f"max|diff| vs f32 ref = {err_f}"

    print("KERNEL_OK")
</pallas_src>

<mosaic_0001>
module attributes {stable_mosaic.version = 11 : i64} {
  func.func @_down_kernel(%arg0: i32, %arg1: memref<1x9x9x16xbf16, #tpu.memory_space<vmem>>, %arg2: memref<64x128xbf16, #tpu.memory_space<vmem>>, %arg3: memref<1x64x128xbf16, #tpu.memory_space<vmem>>, %arg4: memref<64x64xbf16, #tpu.memory_space<vmem>>) attributes {dimension_semantics = [#tpu.dimension_semantics<parallel>], iteration_bounds = array<i64: 2>, scalar_prefetch = 0 : i64, scratch_operands = 1 : i64, tpu.core_type = #tpu.core_type<tc>, window_params = [{transform_indices = @transform_0, window_bounds = array<i64: 1, 9, 9, 16>}, {pipeline_mode = #tpu.pipeline_mode<synchronous>, transform_indices = @transform_1, window_bounds = array<i64: 64, 128>}, {transform_indices = @transform_2, window_bounds = array<i64: 1, 64, 128>}]} {
    %c0 = arith.constant 0 : index
    %c0_0 = arith.constant 0 : index
    %c0_1 = arith.constant 0 : index
    %c0_2 = arith.constant 0 : index
    %0 = vector.load %arg1[%c0, %c0_0, %c0_1, %c0_2] : memref<1x9x9x16xbf16, #tpu.memory_space<vmem>>, vector<1x1x8x16xbf16>
    %1 = vector.shape_cast %0 : vector<1x1x8x16xbf16> to vector<8x16xbf16>
    %c0_3 = arith.constant 0 : index
    %c0_4 = arith.constant 0 : index
    %c1 = arith.constant 1 : index
    %c0_5 = arith.constant 0 : index
    %2 = vector.load %arg1[%c0_3, %c0_4, %c1, %c0_5] : memref<1x9x9x16xbf16, #tpu.memory_space<vmem>>, vector<1x1x8x16xbf16>
    %3 = vector.shape_cast %2 : vector<1x1x8x16xbf16> to vector<8x16xbf16>
    %c0_6 = arith.constant 0 : index
    %c1_7 = arith.constant 1 : index
    %c0_8 = arith.constant 0 : index
    %c0_9 = arith.constant 0 : index
    %4 = vector.load %arg1[%c0_6, %c1_7, %c0_8, %c0_9] : memref<1x9x9x16xbf16, #tpu.memory_space<vmem>>, vector<1x1x8x16xbf16>
    %5 = vector.shape_cast %4 : vector<1x1x8x16xbf16> to vector<8x16xbf16>
    %c0_10 = arith.constant 0 : index
    %c1_11 = arith.constant 1 : index
    %c1_12 = arith.constant 1 : index
    %c0_13 = arith.constant 0 : index
    %6 = vector.load %arg1[%c0_10, %c1_11, %c1_12, %c0_13] : memref<1x9x9x16xbf16, #tpu.memory_space<vmem>>, vector<1x1x8x16xbf16>
    %7 = vector.shape_cast %6 : vector<1x1x8x16xbf16> to vector<8x16xbf16>
    %8 = tpu.concatenate %1, %3, %5, %7 in 1 : vector<8x16xbf16>, vector<8x16xbf16>, vector<8x16xbf16>, vector<8x16xbf16> -> vector<8x64xbf16>
    %c0_14 = arith.constant 0 : index
    %c0_15 = arith.constant 0 : index
    %9 = vector.load %arg4[%c0_14, %c0_15] : memref<64x64xbf16, #tpu.memory_space<vmem>>, vector<8x64xbf16>
    tpu.vector_store %arg4[%c0_14, %c0_15], %8 {strides = array<i32>} : memref<64x64xbf16, #tpu.memory_space<vmem>>, vector<8x64xbf16>,
    %c0_16 = arith.constant 0 : index
    %c1_17 = arith.constant 1 : index
    %c0_18 = arith.constant 0 : index
    %c0_19 = arith.constant 0 : index
    %10 = vector.load %arg1[%c0_16, %c1_17, %c0_18, %c0_19] : memref<1x9x9x16xbf16, #tpu.memory_space<vmem>>, vector<1x1x8x16xbf16>
    %11 = vector.shape_cast %10 : vector<1x1x8x16xbf16> to vector<8x16xbf16>
    %c0_20 = arith.constant 0 : index
    %c1_21 = arith.constant 1 : index
    %c1_22 = arith.constant 1 : index
    %c0_23 = arith.constant 0 : index
    %12 = vector.load %arg1[%c0_20, %c1_21, %c1_22, %c0_23] : memref<1x9x9x16xbf16, #tpu.memory_space<vmem>>, vector<1x1x8x16xbf16>
    %13 = vector.shape_cast %12 : vector<1x1x8x16xbf16> to vector<8x16xbf16>
    %c0_24 = arith.constant 0 : index
    %c2 = arith.constant 2 : index
    %c0_25 = arith.constant 0 : index
    %c0_26 = arith.constant 0 : index
    %14 = vector.load %arg1[%c0_24, %c2, %c0_25, %c0_26] : memref<1x9x9x16xbf16, #tpu.memory_space<vmem>>, vector<1x1x8x16xbf16>
    %15 = vector.shape_cast %14 : vector<1x1x8x16xbf16> to vector<8x16xbf16>
    %c0_27 = arith.constant 0 : index
    %c2_28 = arith.constant 2 : index
    %c1_29 = arith.constant 1 : index
    %c0_30 = arith.constant 0 : index
    %16 = vector.load %arg1[%c0_27, %c2_28, %c1_29, %c0_30] : memref<1x9x9x16xbf16, #tpu.memory_space<vmem>>, vector<1x1x8x16xbf16>
    %17 = vector.shape_cast %16 : vector<1x1x8x16xbf16> to vector<8x16xbf16>
    %18 = tpu.concatenate %11, %13, %15, %17 in 1 : vector<8x16xbf16>, vector<8x16xbf16>, vector<8x16xbf16>, vector<8x16xbf16> -> vector<8x64xbf16>
    %c8 = arith.constant 8 : index
    %c0_31 = arith.constant 0 : index
    %19 = vector.load %arg4[%c8, %c0_31] : memref<64x64xbf16, #tpu.memory_space<vmem>>, vector<8x64xbf16>
    tpu.vector_store %arg4[%c8, %c0_31], %18 {strides = array<i32>} : memref<64x64xbf16, #tpu.memory_space<vmem>>, vector<8x64xbf16>,
    %c0_32 = arith.constant 0 : index
    %c2_33 = arith.constant 2 : index
    %c0_34 = arith.constant 0 : index
    %c0_35 = arith.constant 0 : index
    %20 = vector.load %arg1[%c0_32, %c2_33, %c0_34, %c0_35] : memref<1x9x9x16xbf16, #tpu.memory_space<vmem>>, vector<1x1x8x16xbf16>
    %21 = vector.shape_cast %20 : vector<1x1x8x16xbf16> to vector<8x16xbf16>
    %c0_36 = arith.constant 0 : index
    %c2_37 = arith.constant 2 : index
    %c1_38 = arith.constant 1 : index
    %c0_39 = arith.constant 0 : index
    %22 = vector.load %arg1[%c0_36, %c2_37, %c1_38, %c0_39] : memref<1x9x9x16xbf16, #tpu.memory_space<vmem>>, vector<1x1x8x16xbf16>
    %23 = vector.shape_cast %22 : vector<1x1x8x16xbf16> to vector<8x16xbf16>
    %c0_40 = arith.constant 0 : index
    %c3 = arith.constant 3 : index
    %c0_41 = arith.constant 0 : index
    %c0_42 = arith.constant 0 : index
    %24 = vector.load %arg1[%c0_40, %c3, %c0_41, %c0_42] : memref<1x9x9x16xbf16, #tpu.memory_space<vmem>>, vector<1x1x8x16xbf16>
    %25 = vector.shape_cast %24 : vector<1x1x8x16xbf16> to vector<8x16xbf16>
    %c0_43 = arith.constant 0 : index
    %c3_44 = arith.constant 3 : index
    %c1_45 = arith.constant 1 : index
    %c0_46 = arith.constant 0 : index
    %26 = vector.load %arg1[%c0_43, %c3_44, %c1_45, %c0_46] : memref<1x9x9x16xbf16, #tpu.memory_space<vmem>>, vector<1x1x8x16xbf16>
    %27 = vector.shape_cast %26 : vector<1x1x8x16xbf16> to vector<8x16xbf16>
    %28 = tpu.concatenate %21, %23, %25, %27 in 1 : vector<8x16xbf16>, vector<8x16xbf16>, vector<8x16xbf16>, vector<8x16xbf16> -> vector<8x64xbf16>
    %c16 = arith.constant 16 : index
    %c0_47 = arith.constant 0 : index
    %29 = vector.load %arg4[%c16, %c0_47] : memref<64x64xbf16, #tpu.memory_space<vmem>>, vector<8x64xbf16>
    tpu.vector_store %arg4[%c16, %c0_47], %28 {strides = array<i32>} : memref<64x64xbf16, #tpu.memory_space<vmem>>, vector<8x64xbf16>,
    %c0_48 = arith.constant 0 : index
    %c3_49 = arith.constant 3 : index
    %c0_50 = arith.constant 0 : index
    %c0_51 = arith.constant 0 : index
    %30 = vector.load %arg1[%c0_48, %c3_49, %c0_50, %c0_51] : memref<1x9x9x16xbf16, #tpu.memory_space<vmem>>, vector<1x1x8x16xbf16>
    %31 = vector.shape_cast %30 : vector<1x1x8x16xbf16> to vector<8x16xbf16>
    %c0_52 = arith.constant 0 : index
    %c3_53 = arith.constant 3 : index
    %c1_54 = arith.constant 1 : index
    %c0_55 = arith.constant 0 : index
    %32 = vector.load %arg1[%c0_52, %c3_53, %c1_54, %c0_55] : memref<1x9x9x16xbf16, #tpu.memory_space<vmem>>, vector<1x1x8x16xbf16>
    %33 = vector.shape_cast %32 : vector<1x1x8x16xbf16> to vector<8x16xbf16>
    %c0_56 = arith.constant 0 : index
    %c4 = arith.constant 4 : index
    %c0_57 = arith.constant 0 : index
    %c0_58 = arith.constant 0 : index
    %34 = vector.load %arg1[%c0_56, %c4, %c0_57, %c0_58] : memref<1x9x9x16xbf16, #tpu.memory_space<vmem>>, vector<1x1x8x16xbf16>
    %35 = vector.shape_cast %34 : vector<1x1x8x16xbf16> to vector<8x16xbf16>
    %c0_59 = arith.constant 0 : index
    %c4_60 = arith.constant 4 : index
    %c1_61 = arith.constant 1 : index
    %c0_62 = arith.constant 0 : index
    %36 = vector.load %arg1[%c0_59, %c4_60, %c1_61, %c0_62] : memref<1x9x9x16xbf16, #tpu.memory_space<vmem>>, vector<1x1x8x16xbf16>
    %37 = vector.shape_cast %36 : vector<1x1x8x16xbf16> to vector<8x16xbf16>
    %38 = tpu.concatenate %31, %33, %35, %37 in 1 : vector<8x16xbf16>, vector<8x16xbf16>, vector<8x16xbf16>, vector<8x16xbf16> -> vector<8x64xbf16>
    %c24 = arith.constant 24 : index
    %c0_63 = arith.constant 0 : index
    %39 = vector.load %arg4[%c24, %c0_63] : memref<64x64xbf16, #tpu.memory_space<vmem>>, vector<8x64xbf16>
    tpu.vector_store %arg4[%c24, %c0_63], %38 {strides = array<i32>} : memref<64x64xbf16, #tpu.memory_space<vmem>>, vector<8x64xbf16>,
    %c0_64 = arith.constant 0 : index
    %c4_65 = arith.constant 4 : index
    %c0_66 = arith.constant 0 : index
    %c0_67 = arith.constant 0 : index
    %40 = vector.load %arg1[%c0_64, %c4_65, %c0_66, %c0_67] : memref<1x9x9x16xbf16, #tpu.memory_space<vmem>>, vector<1x1x8x16xbf16>
    %41 = vector.shape_cast %40 : vector<1x1x8x16xbf16> to vector<8x16xbf16>
    %c0_68 = arith.constant 0 : index
    %c4_69 = arith.constant 4 : index
    %c1_70 = arith.constant 1 : index
    %c0_71 = arith.constant 0 : index
    %42 = vector.load %arg1[%c0_68, %c4_69, %c1_70, %c0_71] : memref<1x9x9x16xbf16, #tpu.memory_space<vmem>>, vector<1x1x8x16xbf16>
    %43 = vector.shape_cast %42 : vector<1x1x8x16xbf16> to vector<8x16xbf16>
    %c0_72 = arith.constant 0 : index
    %c5 = arith.constant 5 : index
    %c0_73 = arith.constant 0 : index
    %c0_74 = arith.constant 0 : index
    %44 = vector.load %arg1[%c0_72, %c5, %c0_73, %c0_74] : memref<1x9x9x16xbf16, #tpu.memory_space<vmem>>, vector<1x1x8x16xbf16>
    %45 = vector.shape_cast %44 : vector<1x1x8x16xbf16> to vector<8x16xbf16>
    %c0_75 = arith.constant 0 : index
    %c5_76 = arith.constant 5 : index
    %c1_77 = arith.constant 1 : index
    %c0_78 = arith.constant 0 : index
    %46 = vector.load %arg1[%c0_75, %c5_76, %c1_77, %c0_78] : memref<1x9x9x16xbf16, #tpu.memory_space<vmem>>, vector<1x1x8x16xbf16>
    %47 = vector.shape_cast %46 : vector<1x1x8x16xbf16> to vector<8x16xbf16>
    %48 = tpu.concatenate %41, %43, %45, %47 in 1 : vector<8x16xbf16>, vector<8x16xbf16>, vector<8x16xbf16>, vector<8x16xbf16> -> vector<8x64xbf16>
    %c32 = arith.constant 32 : index
    %c0_79 = arith.constant 0 : index
    %49 = vector.load %arg4[%c32, %c0_79] : memref<64x64xbf16, #tpu.memory_space<vmem>>, vector<8x64xbf16>
    tpu.vector_store %arg4[%c32, %c0_79], %48 {strides = array<i32>} : memref<64x64xbf16, #tpu.memory_space<vmem>>, vector<8x64xbf16>,
    %c0_80 = arith.constant 0 : index
    %c5_81 = arith.constant 5 : index
    %c0_82 = arith.constant 0 : index
    %c0_83 = arith.constant 0 : index
    %50 = vector.load %arg1[%c0_80, %c5_81, %c0_82, %c0_83] : memref<1x9x9x16xbf16, #tpu.memory_space<vmem>>, vector<1x1x8x16xbf16>
    %51 = vector.shape_cast %50 : vector<1x1x8x16xbf16> to vector<8x16xbf16>
    %c0_84 = arith.constant 0 : index
    %c5_85 = arith.constant 5 : index
    %c1_86 = arith.constant 1 : index
    %c0_87 = arith.constant 0 : index
    %52 = vector.load %arg1[%c0_84, %c5_85, %c1_86, %c0_87] : memref<1x9x9x16xbf16, #tpu.memory_space<vmem>>, vector<1x1x8x16xbf16>
    %53 = vector.shape_cast %52 : vector<1x1x8x16xbf16> to vector<8x16xbf16>
    %c0_88 = arith.constant 0 : index
    %c6 = arith.constant 6 : index
    %c0_89 = arith.constant 0 : index
    %c0_90 = arith.constant 0 : index
    %54 = vector.load %arg1[%c0_88, %c6, %c0_89, %c0_90] : memref<1x9x9x16xbf16, #tpu.memory_space<vmem>>, vector<1x1x8x16xbf16>
    %55 = vector.shape_cast %54 : vector<1x1x8x16xbf16> to vector<8x16xbf16>
    %c0_91 = arith.constant 0 : index
    %c6_92 = arith.constant 6 : index
    %c1_93 = arith.constant 1 : index
    %c0_94 = arith.constant 0 : index
    %56 = vector.load %arg1[%c0_91, %c6_92, %c1_93, %c0_94] : memref<1x9x9x16xbf16, #tpu.memory_space<vmem>>, vector<1x1x8x16xbf16>
    %57 = vector.shape_cast %56 : vector<1x1x8x16xbf16> to vector<8x16xbf16>
    %58 = tpu.concatenate %51, %53, %55, %57 in 1 : vector<8x16xbf16>, vector<8x16xbf16>, vector<8x16xbf16>, vector<8x16xbf16> -> vector<8x64xbf16>
    %c40 = arith.constant 40 : index
    %c0_95 = arith.constant 0 : index
    %59 = vector.load %arg4[%c40, %c0_95] : memref<64x64xbf16, #tpu.memory_space<vmem>>, vector<8x64xbf16>
    tpu.vector_store %arg4[%c40, %c0_95], %58 {strides = array<i32>} : memref<64x64xbf16, #tpu.memory_space<vmem>>, vector<8x64xbf16>,
    %c0_96 = arith.constant 0 : index
    %c6_97 = arith.constant 6 : index
    %c0_98 = arith.constant 0 : index
    %c0_99 = arith.constant 0 : index
    %60 = vector.load %arg1[%c0_96, %c6_97, %c0_98, %c0_99] : memref<1x9x9x16xbf16, #tpu.memory_space<vmem>>, vector<1x1x8x16xbf16>
    %61 = vector.shape_cast %60 : vector<1x1x8x16xbf16> to vector<8x16xbf16>
    %c0_100 = arith.constant 0 : index
    %c6_101 = arith.constant 6 : index
    %c1_102 = arith.constant 1 : index
    %c0_103 = arith.constant 0 : index
    %62 = vector.load %arg1[%c0_100, %c6_101, %c1_102, %c0_103] : memref<1x9x9x16xbf16, #tpu.memory_space<vmem>>, vector<1x1x8x16xbf16>
    %63 = vector.shape_cast %62 : vector<1x1x8x16xbf16> to vector<8x16xbf16>
    %c0_104 = arith.constant 0 : index
    %c7 = arith.constant 7 : index
    %c0_105 = arith.constant 0 : index
    %c0_106 = arith.constant 0 : index
    %64 = vector.load %arg1[%c0_104, %c7, %c0_105, %c0_106] : memref<1x9x9x16xbf16, #tpu.memory_space<vmem>>, vector<1x1x8x16xbf16>
    %65 = vector.shape_cast %64 : vector<1x1x8x16xbf16> to vector<8x16xbf16>
    %c0_107 = arith.constant 0 : index
    %c7_108 = arith.constant 7 : index
    %c1_109 = arith.constant 1 : index
    %c0_110 = arith.constant 0 : index
    %66 = vector.load %arg1[%c0_107, %c7_108, %c1_109, %c0_110] : memref<1x9x9x16xbf16, #tpu.memory_space<vmem>>, vector<1x1x8x16xbf16>
    %67 = vector.shape_cast %66 : vector<1x1x8x16xbf16> to vector<8x16xbf16>
    %68 = tpu.concatenate %61, %63, %65, %67 in 1 : vector<8x16xbf16>, vector<8x16xbf16>, vector<8x16xbf16>, vector<8x16xbf16> -> vector<8x64xbf16>
    %c48 = arith.constant 48 : index
    %c0_111 = arith.constant 0 : index
    %69 = vector.load %arg4[%c48, %c0_111] : memref<64x64xbf16, #tpu.memory_space<vmem>>, vector<8x64xbf16>
    tpu.vector_store %arg4[%c48, %c0_111], %68 {strides = array<i32>} : memref<64x64xbf16, #tpu.memory_space<vmem>>, vector<8x64xbf16>,
    %c0_112 = arith.constant 0 : index
    %c7_113 = arith.constant 7 : index
    %c0_114 = arith.constant 0 : index
    %c0_115 = arith.constant 0 : index
    %70 = vector.load %arg1[%c0_112, %c7_113, %c0_114, %c0_115] : memref<1x9x9x16xbf16, #tpu.memory_space<vmem>>, vector<1x1x8x16xbf16>
    %71 = vector.shape_cast %70 : vector<1x1x8x16xbf16> to vector<8x16xbf16>
    %c0_116 = arith.constant 0 : index
    %c7_117 = arith.constant 7 : index
    %c1_118 = arith.constant 1 : index
    %c0_119 = arith.constant 0 : index
    %72 = vector.load %arg1[%c0_116, %c7_117, %c1_118, %c0_119] : memref<1x9x9x16xbf16, #tpu.memory_space<vmem>>, vector<1x1x8x16xbf16>
    %73 = vector.shape_cast %72 : vector<1x1x8x16xbf16> to vector<8x16xbf16>
    %c0_120 = arith.constant 0 : index
    %c8_121 = arith.constant 8 : index
    %c0_122 = arith.constant 0 : index
    %c0_123 = arith.constant 0 : index
    %74 = vector.load %arg1[%c0_120, %c8_121, %c0_122, %c0_123] : memref<1x9x9x16xbf16, #tpu.memory_space<vmem>>, vector<1x1x8x16xbf16>
    %75 = vector.shape_cast %74 : vector<1x1x8x16xbf16> to vector<8x16xbf16>
    %c0_124 = arith.constant 0 : index
    %c8_125 = arith.constant 8 : index
    %c1_126 = arith.constant 1 : index
    %c0_127 = arith.constant 0 : index
    %76 = vector.load %arg1[%c0_124, %c8_125, %c1_126, %c0_127] : memref<1x9x9x16xbf16, #tpu.memory_space<vmem>>, vector<1x1x8x16xbf16>
    %77 = vector.shape_cast %76 : vector<1x1x8x16xbf16> to vector<8x16xbf16>
    %78 = tpu.concatenate %71, %73, %75, %77 in 1 : vector<8x16xbf16>, vector<8x16xbf16>, vector<8x16xbf16>, vector<8x16xbf16> -> vector<8x64xbf16>
    %c56 = arith.constant 56 : index
    %c0_128 = arith.constant 0 : index
    %79 = vector.load %arg4[%c56, %c0_128] : memref<64x64xbf16, #tpu.memory_space<vmem>>, vector<8x64xbf16>
    tpu.vector_store %arg4[%c56, %c0_128], %78 {strides = array<i32>} : memref<64x64xbf16, #tpu.memory_space<vmem>>, vector<8x64xbf16>,
    %c0_129 = arith.constant 0 : index
    %c0_130 = arith.constant 0 : index
    %80 = vector.load %arg4[%c0_129, %c0_130] : memref<64x64xbf16, #tpu.memory_space<vmem>>, vector<64x64xbf16>
    %c0_131 = arith.constant 0 : index
    %c0_132 = arith.constant 0 : index
    %81 = vector.load %arg2[%c0_131, %c0_132] : memref<64x128xbf16, #tpu.memory_space<vmem>>, vector<64x128xbf16>
    %cst = arith.constant dense<0.000000e+00> : vector<64x128xf32>
    %82 = tpu.matmul %80, %81, %cst {dimension_numbers = #tpu.dot_dimension_numbers<[1], [0], [0], [1], [0, 0, 1, 1], [], []>} : vector<64x64xbf16>, vector<64x128xbf16>, vector<64x128xf32> -> vector<64x128xf32>
    %cst_133 = arith.constant dense<0.000000e+00> : vector<128xf32>
    %83 = vector.multi_reduction <add>, %82, %cst_133 [0] : vector<64x128xf32> to vector<128xf32>
    %84 = vector.shape_cast %83 : vector<128xf32> to vector<1x128xf32>
    %cst_134 = arith.constant 1.562500e-02 : f32
    %85 = vector.broadcast %cst_134 : f32 to vector<1x128xf32>
    %86 = arith.mulf %84, %85 : vector<1x128xf32>
    %87 = vector.broadcast %86 : vector<1x128xf32> to vector<64x128xf32>
    %88 = arith.subf %82, %87 : vector<64x128xf32>
    %89 = arith.mulf %88, %88 : vector<64x128xf32>
    %cst_135 = arith.constant dense<0.000000e+00> : vector<128xf32>
    %90 = vector.multi_reduction <add>, %89, %cst_135 [0] : vector<64x128xf32> to vector<128xf32>
    %91 = vector.shape_cast %90 : vector<128xf32> to vector<1x128xf32>
    %cst_136 = arith.constant 1.562500e-02 : f32
    %92 = vector.broadcast %cst_136 : f32 to vector<1x128xf32>
    %93 = arith.mulf %91, %92 : vector<1x128xf32>
    %cst_137 = arith.constant 9.99999974E-6 : f32
    %94 = vector.broadcast %cst_137 : f32 to vector<1x128xf32>
    %95 = arith.addf %93, %94 : vector<1x128xf32>
    %96 = math.rsqrt %95 : vector<1x128xf32>
    %97 = vector.broadcast %96 : vector<1x128xf32> to vector<64x128xf32>
    %98 = arith.mulf %88, %97 : vector<64x128xf32>
    %cst_138 = arith.constant 0.000000e+00 : f32
    %99 = vector.broadcast %cst_138 : f32 to vector<64x128xf32>
    %100 = arith.cmpf oge, %98, %99 : vector<64x128xf32>
    %cst_139 = arith.constant 0.00999999977 : f32
    %101 = vector.broadcast %cst_139 : f32 to vector<64x128xf32>
    %102 = arith.mulf %101, %98 : vector<64x128xf32>
    %103 = arith.select %100, %98, %102 : vector<64x128xi1>, vector<64x128xf32>
    %104 = arith.truncf %103 : vector<64x128xf32> to vector<64x128xbf16>
    %c0_140 = arith.constant 0 : index
    %c0_141 = arith.constant 0 : index
    %c0_142 = arith.constant 0 : index
    %105 = vector.load %arg3[%c0_140, %c0_141, %c0_142] : memref<1x64x128xbf16, #tpu.memory_space<vmem>>, vector<1x64x128xbf16>
    %106 = vector.shape_cast %105 : vector<1x64x128xbf16> to vector<64x128xbf16>
    %107 = vector.shape_cast %104 : vector<64x128xbf16> to vector<1x64x128xbf16>
    tpu.vector_store %arg3[%c0_140, %c0_141, %c0_142], %107 {strides = array<i32>} : memref<1x64x128xbf16, #tpu.memory_space<vmem>>, vector<1x64x128xbf16>,
    return
  }
  func.func @transform_0(%arg0: i32) -> (i32, i32, i32, i32) {
    %c0_i32 = arith.constant 0 : i32
    %c0_i32_0 = arith.constant 0 : i32
    %c0_i32_1 = arith.constant 0 : i32
    %c0_i32_2 = arith.constant 0 : i32
    return %arg0, %c0_i32, %c0_i32_0, %c0_i32_1 : i32, i32, i32, i32
  }
  func.func @transform_1(%arg0: i32) -> (i32, i32) {
    %c0_i32 = arith.constant 0 : i32
    %c0_i32_0 = arith.constant 0 : i32
    %c0_i32_1 = arith.constant 0 : i32
    return %c0_i32, %c0_i32_0 : i32, i32
  }
  func.func @transform_2(%arg0: i32) -> (i32, i32, i32) {
    %c0_i32 = arith.constant 0 : i32
    %c0_i32_0 = arith.constant 0 : i32
    %c0_i32_1 = arith.constant 0 : i32
    return %arg0, %c0_i32, %c0_i32_0 : i32, i32, i32
  }
}

module attributes {stable_mosaic.version = 11 : i64} {
  func.func @_down_kernel(%arg0: i32, %arg1: memref<1x5x5x256xbf16, #tpu.memory_space<vmem>>, %arg2: memref<1024x128xbf16, #tpu.memory_space<vmem>>, %arg3: memref<1x16x128xbf16, #tpu.memory_space<vmem>>, %arg4: memref<16x1024xbf16, #tpu.memory_space<vmem>>) attributes {dimension_semantics = [#tpu.dimension_semantics<parallel>], iteration_bounds = array<i64: 2>, scalar_prefetch = 0 : i64, scratch_operands = 1 : i64, tpu.core_type = #tpu.core_type<tc>, window_params = [{transform_indices = @transform_0, window_bounds = array<i64: 1, 5, 5, 256>}, {pipeline_mode = #tpu.pipeline_mode<synchronous>, transform_indices = @transform_1, window_bounds = array<i64: 1024, 128>}, {transform_indices = @transform_2, window_bounds = array<i64: 1, 16, 128>}]} {
    %c0 = arith.constant 0 : index
    %c0_0 = arith.constant 0 : index
    %c0_1 = arith.constant 0 : index
    %c0_2 = arith.constant 0 : index
    %0 = vector.load %arg1[%c0, %c0_0, %c0_1, %c0_2] : memref<1x5x5x256xbf16, #tpu.memory_space<vmem>>, vector<1x1x4x256xbf16>
    %1 = vector.shape_cast %0 : vector<1x1x4x256xbf16> to vector<4x256xbf16>
    %c0_3 = arith.constant 0 : index
    %c0_4 = arith.constant 0 : index
    %c1 = arith.constant 1 : index
    %c0_5 = arith.constant 0 : index
    %2 = vector.load %arg1[%c0_3, %c0_4, %c1, %c0_5] : memref<1x5x5x256xbf16, #tpu.memory_space<vmem>>, vector<1x1x4x256xbf16>
    %3 = vector.shape_cast %2 : vector<1x1x4x256xbf16> to vector<4x256xbf16>
    %c0_6 = arith.constant 0 : index
    %c1_7 = arith.constant 1 : index
    %c0_8 = arith.constant 0 : index
    %c0_9 = arith.constant 0 : index
    %4 = vector.load %arg1[%c0_6, %c1_7, %c0_8, %c0_9] : memref<1x5x5x256xbf16, #tpu.memory_space<vmem>>, vector<1x1x4x256xbf16>
    %5 = vector.shape_cast %4 : vector<1x1x4x256xbf16> to vector<4x256xbf16>
    %c0_10 = arith.constant 0 : index
    %c1_11 = arith.constant 1 : index
    %c1_12 = arith.constant 1 : index
    %c0_13 = arith.constant 0 : index
    %6 = vector.load %arg1[%c0_10, %c1_11, %c1_12, %c0_13] : memref<1x5x5x256xbf16, #tpu.memory_space<vmem>>, vector<1x1x4x256xbf16>
    %7 = vector.shape_cast %6 : vector<1x1x4x256xbf16> to vector<4x256xbf16>
    %8 = tpu.concatenate %1, %3, %5, %7 in 1 : vector<4x256xbf16>, vector<4x256xbf16>, vector<4x256xbf16>, vector<4x256xbf16> -> vector<4x1024xbf16>
    %c0_14 = arith.constant 0 : index
    %c0_15 = arith.constant 0 : index
    %9 = vector.load %arg4[%c0_14, %c0_15] : memref<16x1024xbf16, #tpu.memory_space<vmem>>, vector<4x1024xbf16>
    tpu.vector_store %arg4[%c0_14, %c0_15], %8 {strides = array<i32>} : memref<16x1024xbf16, #tpu.memory_space<vmem>>, vector<4x1024xbf16>,
    %c0_16 = arith.constant 0 : index
    %c1_17 = arith.constant 1 : index
    %c0_18 = arith.constant 0 : index
    %c0_19 = arith.constant 0 : index
    %10 = vector.load %arg1[%c0_16, %c1_17, %c0_18, %c0_19] : memref<1x5x5x256xbf16, #tpu.memory_space<vmem>>, vector<1x1x4x256xbf16>
    %11 = vector.shape_cast %10 : vector<1x1x4x256xbf16> to vector<4x256xbf16>
    %c0_20 = arith.constant 0 : index
    %c1_21 = arith.constant 1 : index
    %c1_22 = arith.constant 1 : index
    %c0_23 = arith.constant 0 : index
    %12 = vector.load %arg1[%c0_20, %c1_21, %c1_22, %c0_23] : memref<1x5x5x256xbf16, #tpu.memory_space<vmem>>, vector<1x1x4x256xbf16>
    %13 = vector.shape_cast %12 : vector<1x1x4x256xbf16> to vector<4x256xbf16>
    %c0_24 = arith.constant 0 : index
    %c2 = arith.constant 2 : index
    %c0_25 = arith.constant 0 : index
    %c0_26 = arith.constant 0 : index
    %14 = vector.load %arg1[%c0_24, %c2, %c0_25, %c0_26] : memref<1x5x5x256xbf16, #tpu.memory_space<vmem>>, vector<1x1x4x256xbf16>
    %15 = vector.shape_cast %14 : vector<1x1x4x256xbf16> to vector<4x256xbf16>
    %c0_27 = arith.constant 0 : index
    %c2_28 = arith.constant 2 : index
    %c1_29 = arith.constant 1 : index
    %c0_30 = arith.constant 0 : index
    %16 = vector.load %arg1[%c0_27, %c2_28, %c1_29, %c0_30] : memref<1x5x5x256xbf16, #tpu.memory_space<vmem>>, vector<1x1x4x256xbf16>
    %17 = vector.shape_cast %16 : vector<1x1x4x256xbf16> to vector<4x256xbf16>
    %18 = tpu.concatenate %11, %13, %15, %17 in 1 : vector<4x256xbf16>, vector<4x256xbf16>, vector<4x256xbf16>, vector<4x256xbf16> -> vector<4x1024xbf16>
    %c4 = arith.constant 4 : index
    %c0_31 = arith.constant 0 : index
    %19 = vector.load %arg4[%c4, %c0_31] : memref<16x1024xbf16, #tpu.memory_space<vmem>>, vector<4x1024xbf16>
    tpu.vector_store %arg4[%c4, %c0_31], %18 {strides = array<i32>} : memref<16x1024xbf16, #tpu.memory_space<vmem>>, vector<4x1024xbf16>,
    %c0_32 = arith.constant 0 : index
    %c2_33 = arith.constant 2 : index
    %c0_34 = arith.constant 0 : index
    %c0_35 = arith.constant 0 : index
    %20 = vector.load %arg1[%c0_32, %c2_33, %c0_34, %c0_35] : memref<1x5x5x256xbf16, #tpu.memory_space<vmem>>, vector<1x1x4x256xbf16>
    %21 = vector.shape_cast %20 : vector<1x1x4x256xbf16> to vector<4x256xbf16>
    %c0_36 = arith.constant 0 : index
    %c2_37 = arith.constant 2 : index
    %c1_38 = arith.constant 1 : index
    %c0_39 = arith.constant 0 : index
    %22 = vector.load %arg1[%c0_36, %c2_37, %c1_38, %c0_39] : memref<1x5x5x256xbf16, #tpu.memory_space<vmem>>, vector<1x1x4x256xbf16>
    %23 = vector.shape_cast %22 : vector<1x1x4x256xbf16> to vector<4x256xbf16>
    %c0_40 = arith.constant 0 : index
    %c3 = arith.constant 3 : index
    %c0_41 = arith.constant 0 : index
    %c0_42 = arith.constant 0 : index
    %24 = vector.load %arg1[%c0_40, %c3, %c0_41, %c0_42] : memref<1x5x5x256xbf16, #tpu.memory_space<vmem>>, vector<1x1x4x256xbf16>
    %25 = vector.shape_cast %24 : vector<1x1x4x256xbf16> to vector<4x256xbf16>
    %c0_43 = arith.constant 0 : index
    %c3_44 = arith.constant 3 : index
    %c1_45 = arith.constant 1 : index
    %c0_46 = arith.constant 0 : index
    %26 = vector.load %arg1[%c0_43, %c3_44, %c1_45, %c0_46] : memref<1x5x5x256xbf16, #tpu.memory_space<vmem>>, vector<1x1x4x256xbf16>
    %27 = vector.shape_cast %26 : vector<1x1x4x256xbf16> to vector<4x256xbf16>
    %28 = tpu.concatenate %21, %23, %25, %27 in 1 : vector<4x256xbf16>, vector<4x256xbf16>, vector<4x256xbf16>, vector<4x256xbf16> -> vector<4x1024xbf16>
    %c8 = arith.constant 8 : index
    %c0_47 = arith.constant 0 : index
    %29 = vector.load %arg4[%c8, %c0_47] : memref<16x1024xbf16, #tpu.memory_space<vmem>>, vector<4x1024xbf16>
    tpu.vector_store %arg4[%c8, %c0_47], %28 {strides = array<i32>} : memref<16x1024xbf16, #tpu.memory_space<vmem>>, vector<4x1024xbf16>,
    %c0_48 = arith.constant 0 : index
    %c3_49 = arith.constant 3 : index
    %c0_50 = arith.constant 0 : index
    %c0_51 = arith.constant 0 : index
    %30 = vector.load %arg1[%c0_48, %c3_49, %c0_50, %c0_51] : memref<1x5x5x256xbf16, #tpu.memory_space<vmem>>, vector<1x1x4x256xbf16>
    %31 = vector.shape_cast %30 : vector<1x1x4x256xbf16> to vector<4x256xbf16>
    %c0_52 = arith.constant 0 : index
    %c3_53 = arith.constant 3 : index
    %c1_54 = arith.constant 1 : index
    %c0_55 = arith.constant 0 : index
    %32 = vector.load %arg1[%c0_52, %c3_53, %c1_54, %c0_55] : memref<1x5x5x256xbf16, #tpu.memory_space<vmem>>, vector<1x1x4x256xbf16>
    %33 = vector.shape_cast %32 : vector<1x1x4x256xbf16> to vector<4x256xbf16>
    %c0_56 = arith.constant 0 : index
    %c4_57 = arith.constant 4 : index
    %c0_58 = arith.constant 0 : index
    %c0_59 = arith.constant 0 : index
    %34 = vector.load %arg1[%c0_56, %c4_57, %c0_58, %c0_59] : memref<1x5x5x256xbf16, #tpu.memory_space<vmem>>, vector<1x1x4x256xbf16>
    %35 = vector.shape_cast %34 : vector<1x1x4x256xbf16> to vector<4x256xbf16>
    %c0_60 = arith.constant 0 : index
    %c4_61 = arith.constant 4 : index
    %c1_62 = arith.constant 1 : index
    %c0_63 = arith.constant 0 : index
    %36 = vector.load %arg1[%c0_60, %c4_61, %c1_62, %c0_63] : memref<1x5x5x256xbf16, #tpu.memory_space<vmem>>, vector<1x1x4x256xbf16>
    %37 = vector.shape_cast %36 : vector<1x1x4x256xbf16> to vector<4x256xbf16>
    %38 = tpu.concatenate %31, %33, %35, %37 in 1 : vector<4x256xbf16>, vector<4x256xbf16>, vector<4x256xbf16>, vector<4x256xbf16> -> vector<4x1024xbf16>
    %c12 = arith.constant 12 : index
    %c0_64 = arith.constant 0 : index
    %39 = vector.load %arg4[%c12, %c0_64] : memref<16x1024xbf16, #tpu.memory_space<vmem>>, vector<4x1024xbf16>
    tpu.vector_store %arg4[%c12, %c0_64], %38 {strides = array<i32>} : memref<16x1024xbf16, #tpu.memory_space<vmem>>, vector<4x1024xbf16>,
    %c0_65 = arith.constant 0 : index
    %c0_66 = arith.constant 0 : index
    %40 = vector.load %arg4[%c0_65, %c0_66] : memref<16x1024xbf16, #tpu.memory_space<vmem>>, vector<16x1024xbf16>
    %c0_67 = arith.constant 0 : index
    %c0_68 = arith.constant 0 : index
    %41 = vector.load %arg2[%c0_67, %c0_68] : memref<1024x128xbf16, #tpu.memory_space<vmem>>, vector<1024x128xbf16>
    %cst = arith.constant dense<0.000000e+00> : vector<16x128xf32>
    %42 = tpu.matmul %40, %41, %cst {dimension_numbers = #tpu.dot_dimension_numbers<[1], [0], [0], [1], [0, 0, 1, 1], [], []>} : vector<16x1024xbf16>, vector<1024x128xbf16>, vector<16x128xf32> -> vector<16x128xf32>
    %cst_69 = arith.constant dense<0.000000e+00> : vector<128xf32>
    %43 = vector.multi_reduction <add>, %42, %cst_69 [0] : vector<16x128xf32> to vector<128xf32>
    %44 = vector.shape_cast %43 : vector<128xf32> to vector<1x128xf32>
    %cst_70 = arith.constant 6.250000e-02 : f32
    %45 = vector.broadcast %cst_70 : f32 to vector<1x128xf32>
    %46 = arith.mulf %44, %45 : vector<1x128xf32>
    %47 = vector.broadcast %46 : vector<1x128xf32> to vector<16x128xf32>
    %48 = arith.subf %42, %47 : vector<16x128xf32>
    %49 = arith.mulf %48, %48 : vector<16x128xf32>
    %cst_71 = arith.constant dense<0.000000e+00> : vector<128xf32>
    %50 = vector.multi_reduction <add>, %49, %cst_71 [0] : vector<16x128xf32> to vector<128xf32>
    %51 = vector.shape_cast %50 : vector<128xf32> to vector<1x128xf32>
    %cst_72 = arith.constant 6.250000e-02 : f32
    %52 = vector.broadcast %cst_72 : f32 to vector<1x128xf32>
    %53 = arith.mulf %51, %52 : vector<1x128xf32>
    %cst_73 = arith.constant 9.99999974E-6 : f32
    %54 = vector.broadcast %cst_73 : f32 to vector<1x128xf32>
    %55 = arith.addf %53, %54 : vector<1x128xf32>
    %56 = math.rsqrt %55 : vector<1x128xf32>
    %57 = vector.broadcast %56 : vector<1x128xf32> to vector<16x128xf32>
    %58 = arith.mulf %48, %57 : vector<16x128xf32>
    %cst_74 = arith.constant 0.000000e+00 : f32
    %59 = vector.broadcast %cst_74 : f32 to vector<16x128xf32>
    %60 = arith.cmpf oge, %58, %59 : vector<16x128xf32>
    %cst_75 = arith.constant 0.00999999977 : f32
    %61 = vector.broadcast %cst_75 : f32 to vector<16x128xf32>
    %62 = arith.mulf %61, %58 : vector<16x128xf32>
    %63 = arith.select %60, %58, %62 : vector<16x128xi1>, vector<16x128xf32>
    %64 = arith.truncf %63 : vector<16x128xf32> to vector<16x128xbf16>
    %c0_76 = arith.constant 0 : index
    %c0_77 = arith.constant 0 : index
    %c0_78 = arith.constant 0 : index
    %65 = vector.load %arg3[%c0_76, %c0_77, %c0_78] : memref<1x16x128xbf16, #tpu.memory_space<vmem>>, vector<1x16x128xbf16>
    %66 = vector.shape_cast %65 : vector<1x16x128xbf16> to vector<16x128xbf16>
    %67 = vector.shape_cast %64 : vector<16x128xbf16> to vector<1x16x128xbf16>
    tpu.vector_store %arg3[%c0_76, %c0_77, %c0_78], %67 {strides = array<i32>} : memref<1x16x128xbf16, #tpu.memory_space<vmem>>, vector<1x16x128xbf16>,
    return
  }
  func.func @transform_0(%arg0: i32) -> (i32, i32, i32, i32) {
    %c0_i32 = arith.constant 0 : i32
    %c0_i32_0 = arith.constant 0 : i32
    %c0_i32_1 = arith.constant 0 : i32
    %c0_i32_2 = arith.constant 0 : i32
    return %arg0, %c0_i32, %c0_i32_0, %c0_i32_1 : i32, i32, i32, i32
  }
  func.func @transform_1(%arg0: i32) -> (i32, i32) {
    %c0_i32 = arith.constant 0 : i32
    %c0_i32_0 = arith.constant 0 : i32
    %c0_i32_1 = arith.constant 0 : i32
    return %c0_i32, %c0_i32_0 : i32, i32
  }
  func.func @transform_2(%arg0: i32) -> (i32, i32, i32) {
    %c0_i32 = arith.constant 0 : i32
    %c0_i32_0 = arith.constant 0 : i32
    %c0_i32_1 = arith.constant 0 : i32
    return %arg0, %c0_i32, %c0_i32_0 : i32, i32, i32
  }
}

module attributes {stable_mosaic.version = 11 : i64} {
  func.func @_down_kernel(%arg0: i32, %arg1: memref<1x3x3x512xbf16, #tpu.memory_space<vmem>>, %arg2: memref<2048x256xbf16, #tpu.memory_space<vmem>>, %arg3: memref<1x4x256xbf16, #tpu.memory_space<vmem>>, %arg4: memref<4x2048xbf16, #tpu.memory_space<vmem>>) attributes {dimension_semantics = [#tpu.dimension_semantics<parallel>], iteration_bounds = array<i64: 2>, scalar_prefetch = 0 : i64, scratch_operands = 1 : i64, tpu.core_type = #tpu.core_type<tc>, window_params = [{transform_indices = @transform_0, window_bounds = array<i64: 1, 3, 3, 512>}, {pipeline_mode = #tpu.pipeline_mode<synchronous>, transform_indices = @transform_1, window_bounds = array<i64: 2048, 256>}, {transform_indices = @transform_2, window_bounds = array<i64: 1, 4, 256>}]} {
    %c0 = arith.constant 0 : index
    %c0_0 = arith.constant 0 : index
    %c0_1 = arith.constant 0 : index
    %c0_2 = arith.constant 0 : index
    %0 = vector.load %arg1[%c0, %c0_0, %c0_1, %c0_2] : memref<1x3x3x512xbf16, #tpu.memory_space<vmem>>, vector<1x1x2x512xbf16>
    %1 = vector.shape_cast %0 : vector<1x1x2x512xbf16> to vector<2x512xbf16>
    %c0_3 = arith.constant 0 : index
    %c0_4 = arith.constant 0 : index
    %c1 = arith.constant 1 : index
    %c0_5 = arith.constant 0 : index
    %2 = vector.load %arg1[%c0_3, %c0_4, %c1, %c0_5] : memref<1x3x3x512xbf16, #tpu.memory_space<vmem>>, vector<1x1x2x512xbf16>
    %3 = vector.shape_cast %2 : vector<1x1x2x512xbf16> to vector<2x512xbf16>
    %c0_6 = arith.constant 0 : index
    %c1_7 = arith.constant 1 : index
    %c0_8 = arith.constant 0 : index
    %c0_9 = arith.constant 0 : index
    %4 = vector.load %arg1[%c0_6, %c1_7, %c0_8, %c0_9] : memref<1x3x3x512xbf16, #tpu.memory_space<vmem>>, vector<1x1x2x512xbf16>
    %5 = vector.shape_cast %4 : vector<1x1x2x512xbf16> to vector<2x512xbf16>
    %c0_10 = arith.constant 0 : index
    %c1_11 = arith.constant 1 : index
    %c1_12 = arith.constant 1 : index
    %c0_13 = arith.constant 0 : index
    %6 = vector.load %arg1[%c0_10, %c1_11, %c1_12, %c0_13] : memref<1x3x3x512xbf16, #tpu.memory_space<vmem>>, vector<1x1x2x512xbf16>
    %7 = vector.shape_cast %6 : vector<1x1x2x512xbf16> to vector<2x512xbf16>
    %8 = tpu.concatenate %1, %3, %5, %7 in 1 : vector<2x512xbf16>, vector<2x512xbf16>, vector<2x512xbf16>, vector<2x512xbf16> -> vector<2x2048xbf16>
    %c0_14 = arith.constant 0 : index
    %c0_15 = arith.constant 0 : index
    %9 = vector.load %arg4[%c0_14, %c0_15] : memref<4x2048xbf16, #tpu.memory_space<vmem>>, vector<2x2048xbf16>
    tpu.vector_store %arg4[%c0_14, %c0_15], %8 {strides = array<i32>} : memref<4x2048xbf16, #tpu.memory_space<vmem>>, vector<2x2048xbf16>,
    %c0_16 = arith.constant 0 : index
    %c1_17 = arith.constant 1 : index
    %c0_18 = arith.constant 0 : index
    %c0_19 = arith.constant 0 : index
    %10 = vector.load %arg1[%c0_16, %c1_17, %c0_18, %c0_19] : memref<1x3x3x512xbf16, #tpu.memory_space<vmem>>, vector<1x1x2x512xbf16>
    %11 = vector.shape_cast %10 : vector<1x1x2x512xbf16> to vector<2x512xbf16>
    %c0_20 = arith.constant 0 : index
    %c1_21 = arith.constant 1 : index
    %c1_22 = arith.constant 1 : index
    %c0_23 = arith.constant 0 : index
    %12 = vector.load %arg1[%c0_20, %c1_21, %c1_22, %c0_23] : memref<1x3x3x512xbf16, #tpu.memory_space<vmem>>, vector<1x1x2x512xbf16>
    %13 = vector.shape_cast %12 : vector<1x1x2x512xbf16> to vector<2x512xbf16>
    %c0_24 = arith.constant 0 : index
    %c2 = arith.constant 2 : index
    %c0_25 = arith.constant 0 : index
    %c0_26 = arith.constant 0 : index
    %14 = vector.load %arg1[%c0_24, %c2, %c0_25, %c0_26] : memref<1x3x3x512xbf16, #tpu.memory_space<vmem>>, vector<1x1x2x512xbf16>
    %15 = vector.shape_cast %14 : vector<1x1x2x512xbf16> to vector<2x512xbf16>
    %c0_27 = arith.constant 0 : index
    %c2_28 = arith.constant 2 : index
    %c1_29 = arith.constant 1 : index
    %c0_30 = arith.constant 0 : index
    %16 = vector.load %arg1[%c0_27, %c2_28, %c1_29, %c0_30] : memref<1x3x3x512xbf16, #tpu.memory_space<vmem>>, vector<1x1x2x512xbf16>
    %17 = vector.shape_cast %16 : vector<1x1x2x512xbf16> to vector<2x512xbf16>
    %18 = tpu.concatenate %11, %13, %15, %17 in 1 : vector<2x512xbf16>, vector<2x512xbf16>, vector<2x512xbf16>, vector<2x512xbf16> -> vector<2x2048xbf16>
    %c2_31 = arith.constant 2 : index
    %c0_32 = arith.constant 0 : index
    %19 = vector.load %arg4[%c2_31, %c0_32] : memref<4x2048xbf16, #tpu.memory_space<vmem>>, vector<2x2048xbf16>
    tpu.vector_store %arg4[%c2_31, %c0_32], %18 {strides = array<i32>} : memref<4x2048xbf16, #tpu.memory_space<vmem>>, vector<2x2048xbf16>,
    %c0_33 = arith.constant 0 : index
    %c0_34 = arith.constant 0 : index
    %20 = vector.load %arg4[%c0_33, %c0_34] : memref<4x2048xbf16, #tpu.memory_space<vmem>>, vector<4x2048xbf16>
    %c0_35 = arith.constant 0 : index
    %c0_36 = arith.constant 0 : index
    %21 = vector.load %arg2[%c0_35, %c0_36] : memref<2048x256xbf16, #tpu.memory_space<vmem>>, vector<2048x256xbf16>
    %cst = arith.constant dense<0.000000e+00> : vector<4x256xf32>
    %22 = tpu.matmul %20, %21, %cst {dimension_numbers = #tpu.dot_dimension_numbers<[1], [0], [0], [1], [0, 0, 1, 1], [], []>} : vector<4x2048xbf16>, vector<2048x256xbf16>, vector<4x256xf32> -> vector<4x256xf32>
    %cst_37 = arith.constant dense<0.000000e+00> : vector<256xf32>
    %23 = vector.multi_reduction <add>, %22, %cst_37 [0] : vector<4x256xf32> to vector<256xf32>
    %24 = vector.shape_cast %23 : vector<256xf32> to vector<1x256xf32>
    %cst_38 = arith.constant 2.500000e-01 : f32
    %25 = vector.broadcast %cst_38 : f32 to vector<1x256xf32>
    %26 = arith.mulf %24, %25 : vector<1x256xf32>
    %27 = vector.broadcast %26 : vector<1x256xf32> to vector<4x256xf32>
    %28 = arith.subf %22, %27 : vector<4x256xf32>
    %29 = arith.mulf %28, %28 : vector<4x256xf32>
    %cst_39 = arith.constant dense<0.000000e+00> : vector<256xf32>
    %30 = vector.multi_reduction <add>, %29, %cst_39 [0] : vector<4x256xf32> to vector<256xf32>
    %31 = vector.shape_cast %30 : vector<256xf32> to vector<1x256xf32>
    %cst_40 = arith.constant 2.500000e-01 : f32
    %32 = vector.broadcast %cst_40 : f32 to vector<1x256xf32>
    %33 = arith.mulf %31, %32 : vector<1x256xf32>
    %cst_41 = arith.constant 9.99999974E-6 : f32
    %34 = vector.broadcast %cst_41 : f32 to vector<1x256xf32>
    %35 = arith.addf %33, %34 : vector<1x256xf32>
    %36 = math.rsqrt %35 : vector<1x256xf32>
    %37 = vector.broadcast %36 : vector<1x256xf32> to vector<4x256xf32>
    %38 = arith.mulf %28, %37 : vector<4x256xf32>
    %cst_42 = arith.constant 0.000000e+00 : f32
    %39 = vector.broadcast %cst_42 : f32 to vector<4x256xf32>
    %40 = arith.cmpf oge, %38, %39 : vector<4x256xf32>
    %cst_43 = arith.constant 0.00999999977 : f32
    %41 = vector.broadcast %cst_43 : f32 to vector<4x256xf32>
    %42 = arith.mulf %41, %38 : vector<4x256xf32>
    %43 = arith.select %40, %38, %42 : vector<4x256xi1>, vector<4x256xf32>
    %44 = arith.truncf %43 : vector<4x256xf32> to vector<4x256xbf16>
    %c0_44 = arith.constant 0 : index
    %c0_45 = arith.constant 0 : index
    %c0_46 = arith.constant 0 : index
    %45 = vector.load %arg3[%c0_44, %c0_45, %c0_46] : memref<1x4x256xbf16, #tpu.memory_space<vmem>>, vector<1x4x256xbf16>
    %46 = vector.shape_cast %45 : vector<1x4x256xbf16> to vector<4x256xbf16>
    %47 = vector.shape_cast %44 : vector<4x256xbf16> to vector<1x4x256xbf16>
    tpu.vector_store %arg3[%c0_44, %c0_45, %c0_46], %47 {strides = array<i32>} : memref<1x4x256xbf16, #tpu.memory_space<vmem>>, vector<1x4x256xbf16>,
    return
  }
  func.func @transform_0(%arg0: i32) -> (i32, i32, i32, i32) {
    %c0_i32 = arith.constant 0 : i32
    %c0_i32_0 = arith.constant 0 : i32
    %c0_i32_1 = arith.constant 0 : i32
    %c0_i32_2 = arith.constant 0 : i32
    return %arg0, %c0_i32, %c0_i32_0, %c0_i32_1 : i32, i32, i32, i32
  }
  func.func @transform_1(%arg0: i32) -> (i32, i32) {
    %c0_i32 = arith.constant 0 : i32
    %c0_i32_0 = arith.constant 0 : i32
    %c0_i32_1 = arith.constant 0 : i32
    return %c0_i32, %c0_i32_0 : i32, i32
  }
  func.func @transform_2(%arg0: i32) -> (i32, i32, i32) {
    %c0_i32 = arith.constant 0 : i32
    %c0_i32_0 = arith.constant 0 : i32
    %c0_i32_1 = arith.constant 0 : i32
    return %arg0, %c0_i32, %c0_i32_0 : i32, i32, i32
  }
}

module attributes {stable_mosaic.version = 11 : i64} {
  func.func @_end_kernel(%arg0: memref<2x1024xbf16, #tpu.memory_space<vmem>>, %arg1: memref<1024x256xbf16, #tpu.memory_space<vmem>>, %arg2: memref<2x256xf32, #tpu.memory_space<vmem>>) attributes {dimension_semantics = [], scalar_prefetch = 0 : i64, scratch_operands = 0 : i64, tpu.core_type = #tpu.core_type<tc>} {
    %c0 = arith.constant 0 : index
    %c0_0 = arith.constant 0 : index
    %0 = vector.load %arg0[%c0, %c0_0] : memref<2x1024xbf16, #tpu.memory_space<vmem>>, vector<2x1024xbf16>
    %c0_1 = arith.constant 0 : index
    %c0_2 = arith.constant 0 : index
    %1 = vector.load %arg1[%c0_1, %c0_2] : memref<1024x256xbf16, #tpu.memory_space<vmem>>, vector<1024x256xbf16>
    %cst = arith.constant dense<0.000000e+00> : vector<2x256xf32>
    %2 = tpu.matmul %0, %1, %cst {dimension_numbers = #tpu.dot_dimension_numbers<[1], [0], [0], [1], [0, 0, 1, 1], [], []>} : vector<2x1024xbf16>, vector<1024x256xbf16>, vector<2x256xf32> -> vector<2x256xf32>
    %c0_3 = arith.constant 0 : index
    %c0_4 = arith.constant 0 : index
    %3 = vector.load %arg2[%c0_3, %c0_4] : memref<2x256xf32, #tpu.memory_space<vmem>>, vector<2x256xf32>
    tpu.vector_store %arg2[%c0_3, %c0_4], %2 {strides = array<i32>} : memref<2x256xf32, #tpu.memory_space<vmem>>, vector<2x256xf32>,
    return
  }
}

</mosaic_0001>

<bundles_post_ra>
// kernel: encoder_forward.4
= control target key start
LH: loop header
LB: loop body
LE: loop exit
PB: predicated region body
PF: predicated region fallthrough
CT: control target
= control target key end

     0   :  { %s1017_s9 = smov 0   ;;  %s1197_s0 = inlined_call_operand.vmem [shape: bf16[2,9,9,16], index: 0, kind: input, shape index: {}]   ;;  %s1198_s1 = inlined_call_operand.vmem [shape: bf16[64,128], index: 1, kind: input, shape index: {}]   ;;  %s1199_s2 = inlined_call_operand.vmem [shape: bf16[2,64,128], index: 2, kind: output, shape index: {}]  }
   0x1 LB: > { %s805_s10 = sadd.s32 4294967295, %s997_s9   ;;  %p809_p0 = scmp.ge.s32.totalorder %s997_s9, 1  ;;  %s997_s9 = sphi %s1017_s9, %s12_s9  }
   0x2   : > { %p112_p1 = scmp.lt.s32.totalorder %s997_s9, 3 }
   0x4   : > { %p113_p2 = pnand %p809_p0, %p112_p1 }
   0x5   : > { %p134_p3 = scmp.lt.s32.totalorder (!%p113_p2), %s805_s10, 1  ;;  %s999_s15 = smov (!%p113_p2), 32   ;;  %v985_v27 = vld [vmem:[%s1198_s1] sm:$0xff] (!%p113_p2)   ;;  %v986_v44 = vld [vmem:[%s1198_s1 + $0x8] sm:$0xff] (!%p113_p2)   ;;  %v987_v58 = vld [vmem:[%s1198_s1 + $0x10] sm:$0xff] (!%p113_p2)   ;;  %vm181_vm0 = vcmask (!%p113_p2), 130048  }
   0x6   : > { %116 = sbr.rel (%p113_p2) target bundleno = 484 (0x1e4), region = 28  ;;  %925 = vmatprep.subr.bf16.mxu0 (!%p113_p2), %v985_v27  ;;  %941 = vmatprep.subr.bf16.mxu1 (!%p113_p2), %v985_v27  ;;  %s1000_s20 = smov (!%p113_p2), 16   ;;  %vm188_vm1 = vcmask (!%p113_p2), 392192   ;;  %vm185_vm2 = vcmask (!%p113_p2), 261120   ;;  %vm240_vm3 = vcmask (!%p113_p2), 523268   ;;  %vm192_vm4 = vcmask (!%p113_p2), 519168  }
   0x7   : > { %926 = vmatpush3.bf16.msra.mxu0 (!%p113_p2), %v985_v27  ;;  %945 = vmatpush3.bf16.msra.mxu1 (!%p113_p2), %v985_v27  ;;  %s1001_s23 = smov (!%p113_p2), 48   ;;  %vm554_vm5 = vcmask (!%p113_p2), 523264  }
   0x8   : > { %927 = vmatprep.subr.bf16.mxu0 (!%p113_p2), %v986_v44  ;;  %942 = vmatprep.subr.bf16.mxu1 (!%p113_p2), %v986_v44 }
   0xb   : > { %928 = vmatpush3.bf16.msra.mxu0 (!%p113_p2), %v986_v44  ;;  %946 = vmatpush3.bf16.msra.mxu1 (!%p113_p2), %v986_v44 }
   0xc   : > { %929 = vmatprep.subr.bf16.mxu0 (!%p113_p2), %v987_v58  ;;  %943 = vmatprep.subr.bf16.mxu1 (!%p113_p2), %v987_v58 }
   0xd   : > { %s1201_s10 = smov (!%p134_p3, %s805_s10), 1 }
   0xe   : > { %s949_s11 = smul.u32 72, %s1201_s10  ;;  %s885_s26 = sshll.u32 %s1201_s10, 5 }
   0xf   : > { %930 = vmatpush3.bf16.msra.mxu0 %v987_v58  ;;  %947 = vmatpush3.bf16.msra.mxu1 %v987_v58  ;;  %s143_s29 = scalar_lea.vmem %s1199_s2, %s885_s26 }
  0x10   : > { %s1031_s14 = scalar_lea.vmem %s1197_s0, %s949_s11 }
  0x11   : > { %v820_v0 = vld [vmem:[%s1031_s14 + $0x10] sm:$0xf]  ;;  %v821_v1 = vld [vmem:[%s1031_s14 + $0x14] sm:$0x1]  ;;  %v834_v2 = vld [vmem:[%s1031_s14 + $0x20] sm:$0xf] }
  0x12   : > { %v823_v3 = vcombine.low %v820_v0, %v820_v0  ;;  %v824_v4 = vcombine.low %v820_v0, %v821_v1  ;;  %v835_v5 = vld [vmem:[%s1031_s14 + $0x24] sm:$0x1]  ;;  %v837_v6 = vcombine.low %v834_v2, %v834_v2  ;;  %v813_v7 = vld [vmem:[%s1031_s14 + $0x8] sm:$0xf]  ;;  %v814_v8 = vld [vmem:[%s1031_s14 + $0xc] sm:$0x1] }
  0x13   : > { %v1039_v9 = vcombine.low %v834_v2, %v835_v5  ;;  %v1042_v10 = vld [vmem:[%s1031_s14 + $0x18] sm:$0xf]  ;;  %v833_v11 = vld [vmem:[%s1031_s14 + $0x1c] sm:$0x1]  ;;  %v1046_v12 = vld [vmem:[%s1031_s14 + $0x8] sm:$0xf]  ;;  %v816_v14 = vcombine.low %v813_v7, %v813_v7  ;;  %v1055_v18 = vcombine.low %v813_v7, %v814_v8 }
  0x14   : > { %v224_v13 = vshll.u32 %v824_v4, 16  ;;  %216 = vrot.lane.b32.xlu0 %v823_v3, %s999_s15  ;;  %309 = vrot.lane.b32.xlu1 %v837_v6, %s999_s15  ;;  %v836_v15 = vcombine.low %v1042_v10, %v833_v11  ;;  %v819_v16 = vld [vmem:[%s1031_s14 + $0xc] sm:$0x1]  ;;  %v1053_v17 = vld [vmem:[%s1031_s14] sm:$0xf]  ;;  %v222_v22 = vshrl.u32 %v824_v4, 16 }
  0x15   : > { %v822_v19 = vcombine.low %v1046_v12, %v819_v16  ;;  %v146_v20 = vld [vmem:[%s1031_s14 + $0x4] sm:$0x1]  ;;  %v1060_v21 = vld [vmem:[%s1031_s14 + $0x10] sm:$0xf]  ;;  %v826_v26 = vld [vmem:[%s1031_s14 + $0x14] sm:$0x1] }
  0x16   : > { %v298_v23 = vshrl.u32 %v836_v15, 16  ;;  %v300_v24 = vshll.u32 %v836_v15, 16  ;;  %v815_v25 = vcombine.low %v1053_v17, %v146_v20  ;;  %v317_v28 = vshll.u32 %v1039_v9, 16  ;;  %v1071_v38 = vld [vmem:[%s1031_s14 + $0x18] sm:$0xf] }
  0x17   : > { %v205_v29 = vshrl.u32 %v822_v19, 16  ;;  %v207_v30 = vshll.u32 %v822_v19, 16  ;;  %v829_v31 = vcombine.low %v1060_v21, %v826_v26  ;;  %v226_v35 = vrot.slane %v224_v13, 1  ;;  %v828_v39 = vld [vmem:[%s1031_s14 + $0x1c] sm:$0x1] }
  0x18   : > { %167 = vrot.lane.b32.xlu0 %v816_v14, %s999_s15  ;;  %v302_v32 = vrot.slane %v300_v24, 1  ;;  %v156_v33 = vshrl.u32 %v815_v25, 16  ;;  %v158_v34 = vshll.u32 %v815_v25, 16  ;;  %v1075_v42 = vld [vmem:[%s1031_s14 + $0x28] sm:$0xf]  ;;  %v175_v49 = vshll.u32 %v1055_v18, 16 }
  0x19   : > { %v209_v36 = vrot.slane %v207_v30, 1  ;;  %v255_v37 = vshll.u32 %v829_v31, 16  ;;  %v847_v43 = vld [vmem:[%s1031_s14 + $0x2c] sm:$0x1]  ;;  %v253_v46 = vshrl.u32 %v829_v31, 16  ;;  %v831_v50 = vcombine.low %v1071_v38, %v828_v39  ;;  %v988_v5 = vld [vmem:[%s1198_s1 + $0x18] sm:$0xff]  }
  0x1a   : > { %v303_v40 = vor.u32 %v302_v32, %v298_v23  ;;  %v160_v41 = vrot.slane %v158_v34, 1  ;;  %v315_v51 = vshrl.u32 %v1039_v9, 16  ;;  %v227_v52 = vor.u32 %v226_v35, %v222_v22  ;;  %v1088_v55 = vld [vmem:[%s1031_s14 + $0x38] sm:$0xf]  ;;  %v861_v56 = vld [vmem:[%s1031_s14 + $0x3c] sm:$0x1]  ;;  %931 = vmatprep.subr.bf16.mxu0 %v988_v5  ;;  %944 = vmatprep.subr.bf16.mxu1 %v988_v5 }
  0x1b   : > { %v210_v45 = vor.u32 %v209_v36, %v205_v29  ;;  %v257_v48 = vrot.slane %v255_v37, 1  ;;  %v319_v53 = vrot.slane %v317_v28, 1  ;;  %v850_v54 = vcombine.low %v1075_v42, %v847_v43  ;;  %v848_v62 = vld [vmem:[%s1031_s14 + $0x30] sm:$0xf]  ;;  %v849_v63 = vld [vmem:[%s1031_s14 + $0x34] sm:$0x1]  ;;  %932 = vmatpush3.bf16.msra.mxu0 %v988_v5  ;;  %948 = vmatpush3.bf16.msra.mxu1 %v988_v5 }
  0x1c   : > { %304 = vrot.lane.b32.xlu1 %v303_v40, %s1000_s20  ;;  %v161_v47 = vor.u32 %v160_v41, %v156_v33  ;;  %v173_v57 = vshrl.u32 %v1055_v18, 16  ;;  %v177_v60 = vrot.slane %v175_v49, 1  ;;  %v272_v61 = vshll.u32 %v831_v50, 16  ;;  %v1101_v3 = vld [vmem:[%s1031_s14 + $0x20] sm:$0xf] }
  0x1d   : > { %211 = vrot.lane.b32.xlu0 %v210_v45, %s1000_s20  ;;  %v258_v59 = vor.u32 %v257_v48, %v253_v46  ;;  %v320_v0 = vor.u32 %v319_v53, %v315_v51  ;;  %v392_v1 = vshll.u32 %v850_v54, 16  ;;  %v864_v2 = vcombine.low %v1088_v55, %v861_v56  ;;  %v840_v4 = vld [vmem:[%s1031_s14 + $0x24] sm:$0x1]  ;;  %v1115_v25 = vld [vmem:[%s1031_s14 + $0x30] sm:$0xf] }
  0x1e   : > { %v270_v6 = vshrl.u32 %v831_v50, 16  ;;  %v178_v7 = vor.u32 %v177_v60, %v173_v57  ;;  %v274_v8 = vrot.slane %v272_v61, 1  ;;  %v852_v9 = vcombine.low %v848_v62, %v849_v63  ;;  %v854_v26 = vld [vmem:[%s1031_s14 + $0x34] sm:$0x1]  ;;  %v862_v27 = vld [vmem:[%s1031_s14 + $0x40] sm:$0xf] }
  0x1f   : > { %v843_v11 = vcombine.low %v1101_v3, %v840_v4  ;;  %v830_v13 = vcombine.low %v1071_v38, %v1071_v38  ;;  %v390_v14 = vshrl.u32 %v850_v54, 16  ;;  %v394_v15 = vrot.slane %v392_v1, 1  ;;  %v863_v28 = vld [vmem:[%s1031_s14 + $0x44] sm:$0x1]  ;;  %v841_v37 = vld [vmem:[%s1031_s14 + $0x28] sm:$0xf] }
  0x20   : > { %162 = vrot.lane.b32.xlu1 %v161_v47, %s1000_s20  ;;  %v484_v16 = vshll.u32 %v864_v2, 16  ;;  %v275_v18 = vor.u32 %v274_v8, %v270_v6  ;;  %v409_v20 = vshll.u32 %v852_v9, 16  ;;  %v482_v23 = vshrl.u32 %v864_v2, 16  ;;  %v842_v38 = vld [vmem:[%s1031_s14 + $0x2c] sm:$0x1] }
  0x21   : > { %228 = vrot.lane.b32.xlu0 %v227_v52, %s1001_s23  ;;  %v347_v19 = vshll.u32 %v843_v11, 16  ;;  %v395_v22 = vor.u32 %v394_v15, %v390_v14  ;;  %v851_v29 = vcombine.low %v848_v62, %v848_v62  ;;  %v345_v30 = vshrl.u32 %v843_v11, 16  ;;  %v855_v45 = vld [vmem:[%s1031_s14 + $0x38] sm:$0xf]  ;;  %v856_v46 = vld [vmem:[%s1031_s14 + $0x3c] sm:$0x1] }
  0x22   : > { %v486_v24 = vrot.slane %v484_v16, 1  ;;  %v857_v32 = vcombine.low %v1115_v25, %v854_v26  ;;  %v407_v34 = vshrl.u32 %v852_v9, 16  ;;  %v411_v35 = vrot.slane %v409_v20, 1 }
  0x23   : > { %v349_v31 = vrot.slane %v347_v19, 1  ;;  %v866_v36 = vcombine.low %v862_v27, %v863_v28  ;;  %v845_v40 = vcombine.low %v841_v37, %v842_v38  ;;  %v865_v47 = vcombine.low %v862_v27, %v862_v27 }
  0x24   : > { %259 = vrot.lane.b32.xlu1 %v258_v59, %s1000_s20  ;;  %v487_v33 = vor.u32 %v486_v24, %v482_v23  ;;  %v439_v41 = vshll.u32 %v857_v32, 16  ;;  %v412_v43 = vor.u32 %v411_v35, %v407_v34  ;;  %v437_v48 = vshrl.u32 %v857_v32, 16 }
  0x25   : > { %321 = vrot.lane.b32.xlu0 %v320_v0, %s1001_s23  ;;  %v350_v39 = vor.u32 %v349_v31, %v345_v30  ;;  %v501_v44 = vshll.u32 %v866_v36, 16  ;;  %v364_v50 = vshll.u32 %v845_v40, 16  ;;  %v859_v51 = vcombine.low %v855_v45, %v856_v46 }
  0x26   : > { %v441_v49 = vrot.slane %v439_v41, 1  ;;  %v844_v52 = vcombine.low %v841_v37, %v841_v37  ;;  %v499_v53 = vshrl.u32 %v866_v36, 16  ;;  %v362_v57 = vshrl.u32 %v845_v40, 16 }
  0x27   : > { %v503_v54 = vrot.slane %v501_v44, 1  ;;  %v366_v58 = vrot.slane %v364_v50, 1  ;;  %v456_v59 = vshll.u32 %v859_v51, 16  ;;  %v454_v62 = vshrl.u32 %v859_v51, 16 }
  0x28   : > { %179 = vrot.lane.b32.xlu1 %v178_v7, %s1001_s23  ;;  %v442_v56 = vor.u32 %v441_v49, %v437_v48  ;;  %v858_v0 = vcombine.low %v855_v45, %v855_v45 }
  0x29   : > { %264 = vrot.lane.b32.xlu0 %v830_v13, %s999_s15  ;;  %v504_v60 = vor.u32 %v503_v54, %v499_v53  ;;  %v367_v61 = vor.u32 %v366_v58, %v362_v57  ;;  %v458_v63 = vrot.slane %v456_v59, 1 }
  0x2b   : > { %v459_v1 = vor.u32 %v458_v63, %v454_v62 }
  0x2c   : > { %276 = vrot.lane.b32.xlu1 %v275_v18, %s1001_s23 }
  0x2d   : > { %396 = vrot.lane.b32.xlu0 %v395_v22, %s1000_s20 }
  0x30   : > { %401 = vrot.lane.b32.xlu1 %v851_v29, %s999_s15 }
  0x31   : > { %488 = vrot.lane.b32.xlu0 %v487_v33, %s1000_s20 }
  0x34   : > { %351 = vrot.lane.b32.xlu1 %v350_v39, %s1000_s20 }
  0x35   : > { %413 = vrot.lane.b32.xlu0 %v412_v43, %s1001_s23 }
  0x38   : > { %493 = vrot.lane.b32.xlu1 %v865_v47, %s999_s15 }
  0x39   : > { %356 = vrot.lane.b32.xlu0 %v844_v52, %s999_s15 }
  0x3c   : > { %443 = vrot.lane.b32.xlu1 %v442_v56, %s1000_s20 }
  0x3d   : > { %505 = vrot.lane.b32.xlu0 %v504_v60, %s1001_s23 }
  0x40   : > { %368 = vrot.lane.b32.xlu1 %v367_v61, %s1001_s23 }
  0x41   : > { %448 = vrot.lane.b32.xlu0 %v858_v0, %s999_s15 }
  0x44   : > { %460 = vrot.lane.b32.xlu1 %v459_v1, %s1001_s23 }
  0x86   : > { %v217_v2 = vpop.permute.xlu0 %216  ;;  %v310_v4 = vpop.permute.xlu1 %309 }
  0x8a   : > { %v168_v5 = vpop.permute.xlu0 %167 }
  0x8e   : > { %v305_v6 = vpop.permute.xlu1 %304 }
  0x8f   : > { %v212_v7 = vpop.permute.xlu0 %211  ;;  %v325_v14 = vsel %vm181_vm0, %v1042_v10, %v305_v6 }
  0x90   : > { %v232_v8 = vsel %vm181_vm0, %v1046_v12, %v212_v7  ;;  %v327_v12 = vsel %vm185_vm2, %v325_v14, %v310_v4 }
  0x91   : > { %v234_v11 = vsel %vm185_vm2, %v232_v8, %v217_v2 }
  0x92   : > { %v163_v9 = vpop.permute.xlu1 %162 }
  0x93   : > { %v229_v13 = vpop.permute.xlu0 %228  ;;  %v184_v19 = vsel %vm181_vm0, %v1053_v17, %v163_v9 }
  0x94   : > { %v236_v15 = vsel %vm188_vm1, %v234_v11, %v229_v13  ;;  %v187_v24 = vsel %vm185_vm2, %v184_v19, %v168_v5 }
  0x95   : > { %v238_v16 = vrot.slane %v236_v15, 4 }
  0x96   : > { %v260_v18 = vpop.permute.xlu1 %259 }
  0x97   : > { %241 = vst.msk [vmem:[#allocation2] sm:$0xf0] %vm240_vm3, %v238_v16  ;;  %v322_v20 = vpop.permute.xlu0 %321  ;;  %v280_v26 = vsel %vm181_vm0, %v1060_v21, %v260_v18 }
  0x98   : > { %v329_v22 = vsel %vm188_vm1, %v327_v12, %v322_v20 }
  0x99   : > { %v331_v23 = vrot.slane %v329_v22, 4 }
  0x9a   : > { %v180_v10 = vpop.permute.xlu1 %179 }
  0x9b   : > { %333 = vst.msk [vmem:[#allocation2 + $0x8] sm:$0xf0] %vm240_vm3, %v331_v23  ;;  %v190_v27 = vsel %vm188_vm1, %v187_v24, %v180_v10  ;;  %v265_v17 = vpop.permute.xlu0 %264 }
  0x9c   : > { %193 = vst.msk [vmem:[#allocation2] sm:$0xf] %vm192_vm4, %v190_v27  ;;  %v282_v28 = vsel %vm185_vm2, %v280_v26, %v265_v17 }
  0x9e   : > { %v277_v29 = vpop.permute.xlu1 %276 }
  0x9f   : > { %v284_v30 = vsel %vm188_vm1, %v282_v28, %v277_v29  ;;  %v397_v31 = vpop.permute.xlu0 %396 }
  0xa0   : > { %286 = vst.msk [vmem:[#allocation2 + $0x8] sm:$0xf] %vm192_vm4, %v284_v30  ;;  %v417_v21 = vsel %vm181_vm0, %v1075_v42, %v397_v31 }
  0xa2   : > { %v402_v32 = vpop.permute.xlu1 %401 }
  0xa3   : > { %v489_v33 = vpop.permute.xlu0 %488  ;;  %v518_v34 = vld [vmem:[#allocation2] sm:$0xff]  ;;  %v419_v36 = vsel %vm185_vm2, %v417_v21, %v402_v32 }
  0xa4   : > { %933 = vmatprep.mubr.msk.bf16.mxu0 %vm554_vm5, %v518_v34  ;;  %v509_v44 = vsel %vm181_vm0, %v1088_v55, %v489_v33 }
  0xa6   : > { %v352_v35 = vpop.permute.xlu1 %351 }
  0xa7   : > { %v414_v37 = vpop.permute.xlu0 %413  ;;  %v519_v38 = vld [vmem:[#allocation2 + $0x8] sm:$0xff]  ;;  %v372_v48 = vsel %vm181_vm0, %v1101_v3, %v352_v35 }
  0xa8   : > { %v421_v39 = vsel %vm188_vm1, %v419_v36, %v414_v37  ;;  %934 = vmatmul.mubr.msk.bf16.vlgmr.msra.gmra.mrb[0].mxu0 %vm554_vm5, %v519_v38 }
  0xa9   : > { %v423_v40 = vrot.slane %v421_v39, 4 }
  0xaa   : > { %v494_v41 = vpop.permute.xlu1 %493 }
  0xab   : > { %425 = vst.msk [vmem:[#allocation2 + $0x10] sm:$0xf0] %vm240_vm3, %v423_v40  ;;  %v357_v43 = vpop.permute.xlu0 %356  ;;  %v511_v45 = vsel %vm185_vm2, %v509_v44, %v494_v41 }
  0xac   : > { %v374_v50 = vsel %vm185_vm2, %v372_v48, %v357_v43 }
  0xae   : > { %v444_v42 = vpop.permute.xlu1 %443 }
  0xaf   : > { %v506_v46 = vpop.permute.xlu0 %505  ;;  %v464_v52 = vsel %vm181_vm0, %v1115_v25, %v444_v42 }
  0xb0   : > { %v513_v47 = vsel %vm188_vm1, %v511_v45, %v506_v46 }
  0xb1   : > { %v515_v49 = vrot.slane %v513_v47, 4 }
  0xb2   : > { %v369_v51 = vpop.permute.xlu1 %368 }
  0xb3   : > { %517 = vst.msk [vmem:[#allocation2 + $0x18] sm:$0xf0] %vm240_vm3, %v515_v49  ;;  %v376_v55 = vsel %vm188_vm1, %v374_v50, %v369_v51  ;;  %v449_v53 = vpop.permute.xlu0 %448 }
  0xb4   : > { %378 = vst.msk [vmem:[#allocation2 + $0x10] sm:$0xf] %vm192_vm4, %v376_v55  ;;  %v466_v54 = vsel %vm185_vm2, %v464_v52, %v449_v53 }
  0xb6   : > { %v461_v56 = vpop.permute.xlu1 %460 }
  0xb7   : > { %v468_v57 = vsel %vm188_vm1, %v466_v54, %v461_v56 }
  0xb8   : > { %470 = vst.msk [vmem:[#allocation2 + $0x18] sm:$0xf] %vm192_vm4, %v468_v57 }
  0xbb   : > { %v520_v3 = vld [vmem:[#allocation2 + $0x10] sm:$0xff] }
  0xbc   : > { %937 = vmatprep.mubr.msk.bf16.mxu1 %vm554_vm5, %v520_v3 }
  0xbf   : > { %v521_v58 = vld [vmem:[#allocation2 + $0x18] sm:$0xff] }
  0xc0   : > { %938 = vmatmul.mubr.msk.bf16.vlgmr.msra.gmra.mrb[0].mxu1 %vm554_vm5, %v521_v58 }
 0x17b   : > { %v935_v25 = vpop.f32.mrb[0].mxu0 }
 0x17c   : > { %v601_v59 = vpop.f32.mrb[1].mxu0 }
 0x17d   : > { %v936_v60 = vpop.f32.mrb[2].mxu0 }
 0x17e   : > { %v604_v61 = vpop.f32.mrb[3].mxu0 }
 0x17f   : > { %v632_v62 = vadd.f32 %v604_v61, %v601_v59 }
 0x181   : > { %v633_v63 = vadd.f32 %v935_v25, %v632_v62 }
 0x183   : > { %v634_v0 = vadd.f32 %v936_v60, %v633_v63 }
 0x193   : > { %v939_v1 = vpop.f32.mrb[0].mxu1 }
 0x194   : > { %v617_v2 = vpop.f32.mrb[1].mxu1 }
 0x195   : > { %v635_v4 = vadd.f32 %v634_v0, %v617_v2  ;;  %v940_v5 = vpop.f32.mrb[2].mxu1 }
 0x196   : > { %v620_v6 = vpop.f32.mrb[3].mxu1 }
 0x197   : > { %v636_v7 = vadd.f32 %v635_v4, %v620_v6 }
 0x199   : > { %v637_v8 = vadd.f32 %v939_v1, %v636_v7 }
 0x19b   : > { %v638_v9 = vadd.f32 %v940_v5, %v637_v8 }
 0x19d   : > { %v639_v11 = vrot.slane %v638_v9, 4 }
 0x19f   : > { %v640_v13 = vadd.f32 %v639_v11, %v638_v9 }
 0x1a1   : > { %v641_v14 = vrot.slane %v640_v13, 2 }
 0x1a3   : > { %v642_v15 = vadd.f32 %v641_v14, %v640_v13 }
 0x1a5   : > { %v643_v16 = vrot.slane %v642_v15, 1 }
 0x1a7   : > { %v644_v18 = vadd.f32 %v643_v16, %v642_v15 }
 0x1a9   : > { %v645_v19 = vmul.f32 0.015625, %v644_v18 }
 0x1ab   : > { %v646_v12 = vsub.f32 %v601_v59, %v645_v19  ;;  %v647_v20 = vsub.f32 %v604_v61, %v645_v19  ;;  %v648_v22 = vsub.f32 %v935_v25, %v645_v19  ;;  %v649_v23 = vsub.f32 %v936_v60, %v645_v19 }
 0x1ac   : > { %v650_v24 = vsub.f32 %v617_v2, %v645_v19  ;;  %v651_v10 = vsub.f32 %v620_v6, %v645_v19  ;;  %v652_v26 = vsub.f32 %v939_v1, %v645_v19  ;;  %v653_v27 = vsub.f32 %v940_v5, %v645_v19 }
 0x1ad   : > { %v654_v17 = vmul.f32 %v646_v12, %v646_v12  ;;  %v655_v28 = vmul.f32 %v647_v20, %v647_v20  ;;  %v656_v29 = vmul.f32 %v648_v22, %v648_v22  ;;  %v657_v31 = vmul.f32 %v649_v23, %v649_v23 }
 0x1ae   : > { %v658_v33 = vmul.f32 %v650_v24, %v650_v24  ;;  %v659_v21 = vmul.f32 %v651_v10, %v651_v10  ;;  %v660_v36 = vmul.f32 %v652_v26, %v652_v26  ;;  %v661_v38 = vmul.f32 %v653_v27, %v653_v27 }
 0x1af   : > { %v662_v30 = vadd.f32 %v655_v28, %v654_v17 }
 0x1b1   : > { %v663_v32 = vadd.f32 %v662_v30, %v656_v29 }
 0x1b3   : > { %v664_v34 = vadd.f32 %v663_v32, %v657_v31 }
 0x1b5   : > { %v665_v35 = vadd.f32 %v664_v34, %v658_v33 }
 0x1b7   : > { %v666_v37 = vadd.f32 %v665_v35, %v659_v21 }
 0x1b9   : > { %v667_v39 = vadd.f32 %v666_v37, %v660_v36 }
 0x1bb   : > { %v668_v40 = vadd.f32 %v667_v39, %v661_v38 }
 0x1bd   : > { %v669_v41 = vrot.slane %v668_v40, 4 }
 0x1bf   : > { %v670_v43 = vadd.f32 %v669_v41, %v668_v40 }
 0x1c1   : > { %v671_v44 = vrot.slane %v670_v43, 2 }
 0x1c3   : > { %v672_v42 = vadd.f32 %v671_v44, %v670_v43 }
 0x1c5   : > { %v673_v45 = vrot.slane %v672_v42, 1 }
 0x1c7   : > { %v674_v46 = vadd.f32 %v673_v45, %v672_v42 }
 0x1c9   : > { %v675_v47 = vmul.f32 0.015625, %v674_v46 }
 0x1cb   : > { %v676_v48 = vadd.f32 1e-05, %v675_v47 }
 0x1cd   : > { %989 = vrsqrt.f32 %v676_v48 }
 0x1d7   : > { %v990_v49 = vpop.eup %989 }
 0x1d8   : > { %v678_v50 = vmul.f32 %v990_v49, %v646_v12  ;;  %v679_v51 = vmul.f32 %v990_v49, %v647_v20  ;;  %v680_v52 = vmul.f32 %v990_v49, %v648_v22  ;;  %v681_v55 = vmul.f32 %v990_v49, %v649_v23 }
 0x1d9   : > { %v682_v53 = vmul.f32 %v990_v49, %v650_v24  ;;  %v683_v54 = vmul.f32 %v990_v49, %v651_v10  ;;  %v684_v56 = vmul.f32 %v990_v49, %v652_v26  ;;  %v685_v57 = vmul.f32 %v990_v49, %v653_v27 }
 0x1da   : > { %vm686_vm6 = vcmp.ge.f32.partialorder %v678_v50, 0.0  ;;  %vm687_vm7 = vcmp.ge.f32.partialorder %v679_v51, 0.0  ;;  %vm688_vm8 = vcmp.ge.f32.partialorder %v680_v52, 0.0  ;;  %vm689_vm9 = vcmp.ge.f32.partialorder %v681_v55, 0.0 }
 0x1db   : > { %vm690_vm10 = vcmp.ge.f32.partialorder %v682_v53, 0.0  ;;  %vm691_vm11 = vcmp.ge.f32.partialorder %v683_v54, 0.0  ;;  %vm692_vm12 = vcmp.ge.f32.partialorder %v684_v56, 0.0  ;;  %vm693_vm13 = vcmp.ge.f32.partialorder %v685_v57, 0.0 }
 0x1dc   : > { %v694_v3 = vmul.f32 0.01, %v678_v50  ;;  %v695_v58 = vmul.f32 0.01, %v679_v51  ;;  %v696_v25 = vmul.f32 0.01, %v680_v52 }
 0x1dd   : > { %v697_v59 = vmul.f32 0.01, %v681_v55  ;;  %v698_v60 = vmul.f32 0.01, %v682_v53  ;;  %v699_v61 = vmul.f32 0.01, %v683_v54 }
 0x1de   : > { %v700_v62 = vmul.f32 0.01, %v684_v56  ;;  %v701_v63 = vmul.f32 0.01, %v685_v57  ;;  %v702_v0 = vsel %vm686_vm6, %v678_v50, %v694_v3  ;;  %v703_v1 = vsel %vm687_vm7, %v679_v51, %v695_v58 }
 0x1df   : > { %v704_v2 = vsel %vm688_vm8, %v680_v52, %v696_v25  ;;  %v705_v4 = vsel %vm689_vm9, %v681_v55, %v697_v59  ;;  %v706_v5 = vsel %vm690_vm10, %v682_v53, %v698_v60  ;;  %v707_v6 = vsel %vm691_vm11, %v683_v54, %v699_v61 }
 0x1e0   : > { %v708_v7 = vsel %vm692_vm12, %v684_v56, %v700_v62  ;;  %v709_v8 = vsel %vm693_vm13, %v685_v57, %v701_v63  ;;  %v897_v9 = vpack.c.bf16 %v703_v1, %v702_v0  ;;  %v902_v11 = vpack.c.bf16 %v705_v4, %v704_v2 }
 0x1e1   : > { %v907_v13 = vpack.c.bf16 %v707_v6, %v706_v5  ;;  %v912_v14 = vpack.c.bf16 %v709_v8, %v708_v7 }
 0x1e2   : > { %898 = vst [vmem:[%s143_s29] sm:$0xff] %v897_v9   ;;  %914 = vst [vmem:[%s143_s29 + $0x8] sm:$0xff] %v902_v11  }
 0x1e3   : > { %915 = vst [vmem:[%s143_s29 + $0x10] sm:$0xff] %v907_v13   ;;  %916 = vst [vmem:[%s143_s29 + $0x18] sm:$0xff] %v912_v14  }
 0x1e4 PF: > { %s12_s9 = sadd.s32 1, %s997_s9  }
 0x1e5   : > { %p9_p4 = scmp.ge.s32.totalorder %s12_s9, 4  }
 0x1e7   :  { %11 = sbr.rel (!%p9_p4) target bundleno = 1 (0x1), region = 66 }

// kernel: encoder_forward.5
= control target key start
LH: loop header
LB: loop body
LE: loop exit
PB: predicated region body
PF: predicated region fallthrough
CT: control target
= control target key end

     0   :  { %s1572_s9 = smov 0   ;;  %s1813_s0 = inlined_call_operand.vmem [shape: bf16[2,5,5,256], index: 0, kind: input, shape index: {}]   ;;  %s1814_s1 = inlined_call_operand.vmem [shape: bf16[1024,128], index: 1, kind: input, shape index: {}]   ;;  %s1815_s2 = inlined_call_operand.vmem [shape: bf16[2,16,128], index: 2, kind: output, shape index: {}]  }
   0x1 LB: > { %s1224_s10 = sadd.s32 4294967295, %s1555_s9   ;;  %p1228_p0 = scmp.ge.s32.totalorder %s1555_s9, 1  ;;  %s1555_s9 = sphi %s1572_s9, %s12_s9  }
   0x2   : > { %p112_p1 = scmp.lt.s32.totalorder %s1555_s9, 3 }
   0x4   : > { %p113_p2 = pnand %p1228_p0, %p112_p1 }
   0x5   : > { %v1451_v0 = vld [vmem:[%s1814_s1 + $0x40] sm:$0xff] (!%p113_p2)   ;;  %v1455_v4 = vld [vmem:[%s1814_s1 + $0x48] sm:$0xff] (!%p113_p2)   ;;  %v1459_v8 = vld [vmem:[%s1814_s1 + $0x50] sm:$0xff] (!%p113_p2)   ;;  %p134_p3 = scmp.lt.s32.totalorder (!%p113_p2), %s1224_s10, 1 }
   0x6   : > { %116 = sbr.rel (%p113_p2) target bundleno = 360 (0x168), region = 28  ;;  %v1452_v1 = vld [vmem:[%s1814_s1 + $0xc0] sm:$0xff] (!%p113_p2)   ;;  %1354 = vmatprep.subr.bf16.mxu0 (!%p113_p2), %v1451_v0  ;;  %v1456_v5 = vld [vmem:[%s1814_s1 + $0xc8] sm:$0xff] (!%p113_p2)   ;;  %v1460_v9 = vld [vmem:[%s1814_s1 + $0xd0] sm:$0xff] (!%p113_p2)  }
   0x7   : > { %v1453_v2 = vld [vmem:[%s1814_s1] sm:$0xff] (!%p113_p2)   ;;  %1376 = vmatprep.subr.bf16.mxu1 (!%p113_p2), %v1452_v1  ;;  %v1457_v6 = vld [vmem:[%s1814_s1 + $0x8] sm:$0xff] (!%p113_p2)   ;;  %v1461_v10 = vld [vmem:[%s1814_s1 + $0x10] sm:$0xff] (!%p113_p2)  }
   0x8   : > { %v1454_v3 = vld [vmem:[%s1814_s1 + $0x80] sm:$0xff] (!%p113_p2)   ;;  %1355 = vmatpush3.bf16.msra.mxu0 (!%p113_p2), %v1453_v2  ;;  %v1458_v7 = vld [vmem:[%s1814_s1 + $0x88] sm:$0xff] (!%p113_p2)   ;;  %v1462_v11 = vld [vmem:[%s1814_s1 + $0x90] sm:$0xff] (!%p113_p2)  }
   0x9   : > { %1377 = vmatpush3.bf16.msra.mxu1 (!%p113_p2), %v1454_v3  ;;  %1356 = vmatprep.subr.bf16.mxu0 (!%p113_p2), %v1455_v4  ;;  %v1463_v12 = vld [vmem:[%s1814_s1 + $0x58] sm:$0xff] (!%p113_p2)   ;;  %v1467_v16 = vld [vmem:[%s1814_s1 + $0x60] sm:$0xff] (!%p113_p2)   ;;  %v1471_v20 = vld [vmem:[%s1814_s1 + $0x68] sm:$0xff] (!%p113_p2)  }
   0xa   : > { %1378 = vmatprep.subr.bf16.mxu1 (!%p113_p2), %v1456_v5  ;;  %v1464_v13 = vld [vmem:[%s1814_s1 + $0xd8] sm:$0xff] (!%p113_p2)   ;;  %v1468_v17 = vld [vmem:[%s1814_s1 + $0xe0] sm:$0xff] (!%p113_p2)   ;;  %v1472_v21 = vld [vmem:[%s1814_s1 + $0xe8] sm:$0xff] (!%p113_p2)  }
   0xb   : > { %v1465_v14 = vld [vmem:[%s1814_s1 + $0x18] sm:$0xff] (!%p113_p2)   ;;  %v1469_v18 = vld [vmem:[%s1814_s1 + $0x20] sm:$0xff] (!%p113_p2)   ;;  %v1473_v22 = vld [vmem:[%s1814_s1 + $0x28] sm:$0xff] (!%p113_p2)  }
   0xc   : > { %1357 = vmatpush3.bf16.msra.mxu0 (!%p113_p2), %v1457_v6  ;;  %v1466_v15 = vld [vmem:[%s1814_s1 + $0x98] sm:$0xff] (!%p113_p2)   ;;  %v1470_v19 = vld [vmem:[%s1814_s1 + $0xa0] sm:$0xff] (!%p113_p2)   ;;  %v1474_v23 = vld [vmem:[%s1814_s1 + $0xa8] sm:$0xff] (!%p113_p2)  }
   0xd   : > { %1379 = vmatpush3.bf16.msra.mxu1 %v1458_v7  ;;  %1358 = vmatprep.subr.bf16.mxu0 %v1459_v8  ;;  %s1817_s10 = smov (!%p134_p3, %s1224_s10), 1  ;;  %v1475_v24 = vld [vmem:[%s1814_s1 + $0x70] sm:$0xff]   ;;  %v1479_v28 = vld [vmem:[%s1814_s1 + $0x78] sm:$0xff]   ;;  %v1499_v52 = vld [vmem:[%s1814_s1 + $0x140] sm:$0xff]  }
   0xe   : > { %1380 = vmatprep.subr.bf16.mxu1 %v1460_v9  ;;  %v1476_v25 = vld [vmem:[%s1814_s1 + $0xf0] sm:$0xff]   ;;  %s1442_s13 = smul.u32 40, %s1817_s10  ;;  %v1480_v29 = vld [vmem:[%s1814_s1 + $0xf8] sm:$0xff]   ;;  %v1500_v61 = vld [vmem:[%s1814_s1 + $0x1c0] sm:$0xff]   ;;  %s1346_s14 = sshll.u32 %s1817_s10, 3 }
   0xf   : > { %v1477_v26 = vld [vmem:[%s1814_s1 + $0x30] sm:$0xff]   ;;  %v1481_v30 = vld [vmem:[%s1814_s1 + $0x38] sm:$0xff]   ;;  %s143_s17 = scalar_lea.vmem %s1815_s2, %s1346_s14 }
  0x10   : > { %1359 = vmatpush3.bf16.msra.mxu0 %v1461_v10  ;;  %v1478_v27 = vld [vmem:[%s1814_s1 + $0xb0] sm:$0xff]   ;;  %s1683_s24 = scalar_lea.vmem %s1813_s0, %s1442_s13  ;;  %v1482_v31 = vld [vmem:[%s1814_s1 + $0xb8] sm:$0xff]  }
  0x11   : > { %1381 = vmatpush3.bf16.msra.mxu1 %v1462_v11  ;;  %1360 = vmatprep.subr.bf16.mxu0 %v1463_v12  ;;  %v145_v32 = vld [vmem:[%s1683_s24] sm:$0x33]  ;;  %v1242_v33 = vld [vmem:[%s1683_s24 + $0x8] sm:$0x33]  ;;  %v1254_v34 = vld [vmem:[%s1683_s24 + $0x10] sm:$0x33] }
  0x12   : > { %1382 = vmatprep.subr.bf16.mxu1 %v1464_v13  ;;  %v1235_v35 = vcombine.high %v145_v32, %v145_v32  ;;  %v1247_v36 = vcombine.high %v1242_v33, %v1242_v33  ;;  %v1259_v37 = vcombine.high %v1254_v34, %v1254_v34  ;;  %v1266_v38 = vld [vmem:[%s1683_s24 + $0x18] sm:$0x33]  ;;  %v146_v39 = vld [vmem:[%s1683_s24] sm:$0x77]  ;;  %v1243_v40 = vld [vmem:[%s1683_s24 + $0x8] sm:$0x77]  ;;  %v1234_v41 = vcombine.low %v145_v32, %v145_v32 }
  0x13   : > { %v1271_v42 = vcombine.high %v1266_v38, %v1266_v38  ;;  %v1237_v43 = vcombine.high %v146_v39, %v146_v39  ;;  %v1249_v44 = vcombine.high %v1243_v40, %v1243_v40  ;;  %v1255_v45 = vld [vmem:[%s1683_s24 + $0x10] sm:$0x77]  ;;  %v1267_v46 = vld [vmem:[%s1683_s24 + $0x18] sm:$0x77]  ;;  %v1246_v47 = vcombine.low %v1242_v33, %v1242_v33 }
  0x14   : > { %1361 = vmatpush3.bf16.msra.mxu0 %v1465_v14  ;;  %207 = vst [vmem:[#allocation2 + $0x8] sm:$0x3] %v1235_v35  ;;  %v268_v48 = vrot.slane %v1247_v36, 6  ;;  %361 = vst [vmem:[#allocation2 + $0x8] sm:$0x30] %v1259_v37  ;;  %v1261_v49 = vcombine.high %v1255_v45, %v1255_v45  ;;  %v1273_v50 = vcombine.high %v1267_v46, %v1267_v46  ;;  %v1503_v35 = vld [vmem:[%s1814_s1 + $0x148] sm:$0xff]  }
  0x15   : > { %1383 = vmatpush3.bf16.msra.mxu1 %v1466_v15  ;;  %1362 = vmatprep.subr.bf16.mxu0 %v1467_v16  ;;  %206 = vst [vmem:[#allocation2] sm:$0x3] %v1234_v41  ;;  %v1258_v51 = vcombine.low %v1254_v34, %v1254_v34  ;;  %v422_v53 = vrot.slane %v1271_v42, 2  ;;  %v170_v54 = vshrl.u32 %v1237_v43, 16  ;;  %v172_v55 = vshll.u32 %v1237_v43, 16  ;;  %v1507_v41 = vld [vmem:[%s1814_s1 + $0x150] sm:$0xff]  }
  0x16   : > { %1384 = vmatprep.subr.bf16.mxu1 %v1468_v17  ;;  %v237_v56 = vshrl.u32 %v1249_v44, 16  ;;  %284 = vst [vmem:[#allocation2 + $0x8] sm:$0xc] %v268_v48  ;;  %v239_v57 = vshll.u32 %v1249_v44, 16  ;;  %v314_v58 = vshrl.u32 %v1261_v49, 16  ;;  %v316_v59 = vshll.u32 %v1261_v49, 16 }
  0x17   : > { %v391_v60 = vshrl.u32 %v1273_v50, 16  ;;  %360 = vst [vmem:[#allocation2] sm:$0x30] %v1258_v51  ;;  %438 = vst [vmem:[#allocation2 + $0x8] sm:$0xc0] %v422_v53  ;;  %v174_v62 = vrot.slane %v172_v55, 1  ;;  %v1270_v1 = vcombine.low %v1266_v38, %v1266_v38  ;;  %v1236_v4 = vcombine.low %v146_v39, %v146_v39 }
  0x18   : > { %1363 = vmatpush3.bf16.msra.mxu0 %v1469_v18  ;;  %v393_v63 = vshll.u32 %v1273_v50, 16  ;;  %v267_v0 = vrot.slane %v1246_v47, 6  ;;  %v241_v2 = vrot.slane %v239_v57, 1  ;;  %v318_v3 = vrot.slane %v316_v59, 1  ;;  %v1505_v39 = vld [vmem:[%s1814_s1 + $0x108] sm:$0xff]   ;;  %v1509_v43 = vld [vmem:[%s1814_s1 + $0x110] sm:$0xff]  }
  0x19   : > { %1385 = vmatpush3.bf16.msra.mxu1 %v1470_v19  ;;  %1364 = vmatprep.subr.bf16.mxu0 %v1471_v20  ;;  %v1248_v5 = vcombine.low %v1243_v40, %v1243_v40  ;;  %v175_v6 = vor.u32 %v174_v62, %v170_v54  ;;  %v421_v8 = vrot.slane %v1270_v1, 2  ;;  %v1260_v9 = vcombine.low %v1255_v45, %v1255_v45  ;;  %v1511_v44 = vld [vmem:[%s1814_s1 + $0x158] sm:$0xff]   ;;  %v1502_v45 = vld [vmem:[%s1814_s1 + $0x180] sm:$0xff]   ;;  %v1506_v50 = vld [vmem:[%s1814_s1 + $0x188] sm:$0xff]  }
  0x1a   : > { %1386 = vmatprep.subr.bf16.mxu1 %v1472_v21  ;;  %v395_v7 = vrot.slane %v393_v63, 1  ;;  %283 = vst [vmem:[#allocation2] sm:$0xc] %v267_v0  ;;  %v242_v10 = vor.u32 %v241_v2, %v237_v56  ;;  %v319_v11 = vor.u32 %v318_v3, %v314_v58  ;;  %v163_v12 = vshrl.u32 %v1236_v4, 16  ;;  %v1513_v47 = vld [vmem:[%s1814_s1 + $0x118] sm:$0xff]   ;;  %v1515_v48 = vld [vmem:[%s1814_s1 + $0x160] sm:$0xff]  }
  0x1b   : > { %v165_v13 = vshll.u32 %v1236_v4, 16  ;;  %209 = vst [vmem:[#allocation2 + $0x18] sm:$0x3] %v175_v6  ;;  %437 = vst [vmem:[#allocation2] sm:$0xc0] %v421_v8  ;;  %v230_v15 = vshrl.u32 %v1248_v5, 16 }
  0x1c   : > { %1365 = vmatpush3.bf16.msra.mxu0 %v1473_v22  ;;  %v396_v14 = vor.u32 %v395_v7, %v391_v60  ;;  %v232_v16 = vshll.u32 %v1248_v5, 16  ;;  %v307_v17 = vshrl.u32 %v1260_v9, 16  ;;  %v270_v18 = vrot.slane %v242_v10, 6  ;;  %v1508_v51 = vld [vmem:[%s1814_s1 + $0x1d0] sm:$0xff]   ;;  %v1519_v53 = vld [vmem:[%s1814_s1 + $0x168] sm:$0xff]   ;;  %v1512_v55 = vld [vmem:[%s1814_s1 + $0x1d8] sm:$0xff]  }
  0x1d   : > { %1387 = vmatpush3.bf16.msra.mxu1 %v1474_v23  ;;  %1366 = vmatprep.subr.bf16.mxu0 %v1475_v24  ;;  %v347_v19 = vrot.slane %v319_v11, 4  ;;  %v167_v20 = vrot.slane %v165_v13, 1  ;;  %v309_v21 = vshll.u32 %v1260_v9, 16  ;;  %v1272_v24 = vcombine.low %v1267_v46, %v1267_v46  ;;  %v1504_v46 = vld [vmem:[%s1814_s1 + $0x1c8] sm:$0xff]   ;;  %v1510_v54 = vld [vmem:[%s1814_s1 + $0x190] sm:$0xff]   ;;  %v1514_v58 = vld [vmem:[%s1814_s1 + $0x198] sm:$0xff]  }
  0x1e   : > { %1388 = vmatprep.subr.bf16.mxu1 %v1476_v25  ;;  %v424_v22 = vrot.slane %v396_v14, 2  ;;  %v234_v23 = vrot.slane %v232_v16, 1  ;;  %v446_v25 = vld [vmem:[#allocation2 + $0x8] sm:$0xff]  ;;  %286 = vst [vmem:[#allocation2 + $0x18] sm:$0xc] %v270_v18  ;;  %v1523_v57 = vld [vmem:[%s1814_s1 + $0x170] sm:$0xff]  }
  0x1f   : > { %363 = vst [vmem:[#allocation2 + $0x18] sm:$0x30] %v347_v19  ;;  %997 = vmatprep.mubr.bf16.mxu0 %v446_v25  ;;  %v1521_v56 = vld [vmem:[%s1814_s1 + $0x128] sm:$0xff]   ;;  %v1516_v59 = vld [vmem:[%s1814_s1 + $0x1e0] sm:$0xff]   ;;  %v1525_v60 = vld [vmem:[%s1814_s1 + $0x130] sm:$0xff]  }
  0x20   : > { %1367 = vmatpush3.bf16.msra.mxu0 %v1477_v26  ;;  %v168_v26 = vor.u32 %v167_v20, %v163_v12  ;;  %440 = vst [vmem:[#allocation2 + $0x18] sm:$0xc0] %v424_v22  ;;  %v1232_v62 = vld [vmem:[%s1683_s24 + $0x8] sm:$0x33]  ;;  %v1244_v63 = vld [vmem:[%s1683_s24 + $0x10] sm:$0x33] }
  0x21   : > { %1389 = vmatpush3.bf16.msra.mxu1 %v1478_v27  ;;  %1368 = vmatprep.subr.bf16.mxu0 %v1479_v28  ;;  %v311_v27 = vrot.slane %v309_v21, 1  ;;  %v235_v28 = vor.u32 %v234_v23, %v230_v15  ;;  %v1239_v0 = vcombine.high %v1232_v62, %v1232_v62  ;;  %v1251_v1 = vcombine.high %v1244_v63, %v1244_v63  ;;  %v1256_v2 = vld [vmem:[%s1683_s24 + $0x18] sm:$0x33]  ;;  %v1268_v3 = vld [vmem:[%s1683_s24 + $0x20] sm:$0x33]  ;;  %v1520_v23 = vld [vmem:[%s1814_s1 + $0x1e8] sm:$0xff]  }
  0x22   : > { %1390 = vmatprep.subr.bf16.mxu1 %v1480_v29  ;;  %v384_v29 = vshrl.u32 %v1272_v24, 16  ;;  %208 = vst [vmem:[#allocation2 + $0x10] sm:$0x3] %v168_v26  ;;  %v445_v36 = vld [vmem:[#allocation2] sm:$0xff]  ;;  %v1233_v4 = vld [vmem:[%s1683_s24 + $0x8] sm:$0x77]  ;;  %v1238_v5 = vcombine.low %v1232_v62, %v1232_v62  ;;  %v1263_v6 = vcombine.high %v1256_v2, %v1256_v2  ;;  %v1275_v7 = vcombine.high %v1268_v3, %v1268_v3 }
  0x23   : > { %v312_v32 = vor.u32 %v311_v27, %v307_v17  ;;  %v269_v33 = vrot.slane %v235_v28, 6  ;;  %v1241_v8 = vcombine.high %v1233_v4, %v1233_v4  ;;  %v1245_v9 = vld [vmem:[%s1683_s24 + $0x10] sm:$0x77]  ;;  %v1257_v10 = vld [vmem:[%s1683_s24 + $0x18] sm:$0x77]  ;;  %v1250_v12 = vcombine.low %v1244_v63, %v1244_v63  ;;  %v1518_v17 = vld [vmem:[%s1814_s1 + $0x1a0] sm:$0xff]  }
  0x24   : > { %1369 = vmatpush3.bf16.msra.mxu0 %v1481_v30  ;;  %v386_v30 = vshll.u32 %v1272_v24, 16  ;;  %v1776_v11 = vld [vmem:[%s1683_s24 + $0x20] sm:$0x77]  ;;  %211 = vst [vmem:[#allocation2 + $0x28] sm:$0x3] %v1239_v0  ;;  %v272_v13 = vrot.slane %v1251_v1, 6  ;;  %v1253_v14 = vcombine.high %v1245_v9, %v1245_v9  ;;  %v1265_v15 = vcombine.high %v1257_v10, %v1257_v10 }
  0x25   : > { %1391 = vmatpush3.bf16.msra.mxu1 %v1482_v31  ;;  %1398 = vmatprep.subr.bf16.mxu0 %v1499_v52  ;;  %v1501_v31 = vld [vmem:[%s1814_s1 + $0x100] sm:$0xff]   ;;  %v346_v37 = vrot.slane %v312_v32, 4  ;;  %285 = vst [vmem:[#allocation2 + $0x10] sm:$0xc] %v269_v33  ;;  %v1277_v16 = vcombine.high %v1776_v11, %v1776_v11  ;;  %210 = vst [vmem:[#allocation2 + $0x20] sm:$0x3] %v1238_v5 }
  0x26   : > { %1420 = vmatprep.subr.bf16.mxu1 %v1500_v61  ;;  %v388_v34 = vrot.slane %v386_v30, 1  ;;  %v1517_v52 = vld [vmem:[%s1814_s1 + $0x120] sm:$0xff]   ;;  %v1527_v61 = vld [vmem:[%s1814_s1 + $0x178] sm:$0xff]   ;;  %365 = vst [vmem:[#allocation2 + $0x28] sm:$0x30] %v1263_v6  ;;  %v426_v19 = vrot.slane %v1275_v7, 2 }
  0x27   : > { %998 = vmatmul.mubr.bf16.vlgmr.msra.gmra.mrb[0].mxu0 %v445_v36  ;;  %362 = vst [vmem:[#allocation2 + $0x10] sm:$0x30] %v346_v37  ;;  %v448_v42 = vld [vmem:[#allocation2 + $0x18] sm:$0xff]  ;;  %v198_v20 = vshrl.u32 %v1241_v8, 16  ;;  %v200_v21 = vshll.u32 %v1241_v8, 16  ;;  %v271_v22 = vrot.slane %v1250_v12, 6 }
  0x28   : > { %v389_v38 = vor.u32 %v388_v34, %v384_v29  ;;  %1399 = vmatpush3.bf16.msra.mxu0 %v1501_v31  ;;  %1038 = vmatprep.mubr.bf16.mxu1 %v448_v42  ;;  %v1529_v18 = vld [vmem:[%s1814_s1 + $0x138] sm:$0xff]   ;;  %288 = vst [vmem:[#allocation2 + $0x28] sm:$0xc] %v272_v13  ;;  %v261_v24 = vshrl.u32 %v1253_v14, 16  ;;  %v263_v25 = vshll.u32 %v1253_v14, 16  ;;  %v338_v26 = vshrl.u32 %v1265_v15, 16 }
  0x29   : > { %1400 = vmatprep.subr.bf16.mxu0 %v1503_v35  ;;  %v340_v27 = vshll.u32 %v1265_v15, 16  ;;  %442 = vst [vmem:[#allocation2 + $0x28] sm:$0xc0] %v426_v19  ;;  %v202_v28 = vrot.slane %v200_v21, 1  ;;  %v415_v29 = vshrl.u32 %v1277_v16, 16  ;;  %v417_v30 = vshll.u32 %v1277_v16, 16 }
  0x2a   : > { %v423_v40 = vrot.slane %v389_v38, 2  ;;  %287 = vst [vmem:[#allocation2 + $0x20] sm:$0xc] %v271_v22  ;;  %v1262_v31 = vcombine.low %v1256_v2, %v1256_v2  ;;  %v265_v32 = vrot.slane %v263_v25, 1  ;;  %v1274_v34 = vcombine.low %v1268_v3, %v1268_v3  ;;  %v1522_v36 = vld [vmem:[%s1814_s1 + $0x1a8] sm:$0xff]   ;;  %v1530_v3 = vld [vmem:[%s1814_s1 + $0x1b8] sm:$0xff]  }
  0x2b   : > { %v342_v33 = vrot.slane %v340_v27, 1  ;;  %v1240_v35 = vcombine.low %v1233_v4, %v1233_v4  ;;  %v203_v37 = vor.u32 %v202_v28, %v198_v20  ;;  %v419_v38 = vrot.slane %v417_v30, 1 }
  0x2c   : > { %439 = vst [vmem:[#allocation2 + $0x10] sm:$0xc0] %v423_v40  ;;  %1401 = vmatpush3.bf16.msra.mxu0 %v1505_v39  ;;  %364 = vst [vmem:[#allocation2 + $0x20] sm:$0x30] %v1262_v31  ;;  %v1252_v39 = vcombine.low %v1245_v9, %v1245_v9  ;;  %v1264_v40 = vcombine.low %v1257_v10, %v1257_v10  ;;  %v266_v42 = vor.u32 %v265_v32, %v261_v24 }
  0x2d   : > { %1402 = vmatprep.subr.bf16.mxu0 %v1507_v41  ;;  %v1524_v41 = vld [vmem:[%s1814_s1 + $0x1f0] sm:$0xff]   ;;  %213 = vst [vmem:[#allocation2 + $0x38] sm:$0x3] %v203_v37 }
  0x30   : > { %1403 = vmatpush3.bf16.msra.mxu0 %v1509_v43  ;;  %v343_v43 = vor.u32 %v342_v33, %v338_v26 }
  0x31   : > { %1404 = vmatprep.subr.bf16.mxu0 %v1511_v44  ;;  %v425_v44 = vrot.slane %v1274_v34, 2 }
  0x33   : > { %v447_v49 = vld [vmem:[#allocation2 + $0x10] sm:$0xff]  ;;  %441 = vst [vmem:[#allocation2 + $0x20] sm:$0xc0] %v425_v44 }
  0x34   : > { %1039 = vmatmul.mubr.bf16.vlgmr.msra.gmra.mrb[0].mxu1 %v447_v49  ;;  %1405 = vmatpush3.bf16.msra.mxu0 %v1513_v47  ;;  %v193_v47 = vshll.u32 %v1240_v35, 16  ;;  %v256_v49 = vshll.u32 %v1252_v39, 16 }
  0x35   : > { %1421 = vmatpush3.bf16.msra.mxu1 %v1502_v45  ;;  %1406 = vmatprep.subr.bf16.mxu0 %v1515_v48  ;;  %v191_v45 = vshrl.u32 %v1240_v35, 16  ;;  %v254_v48 = vshrl.u32 %v1252_v39, 16 }
  0x36   : > { %1422 = vmatprep.subr.bf16.mxu1 %v1504_v46  ;;  %v420_v46 = vor.u32 %v419_v38, %v415_v29 }
  0x38   : > { %1407 = vmatpush3.bf16.msra.mxu0 %v1517_v52  ;;  %v331_v52 = vshrl.u32 %v1264_v40, 16 }
  0x39   : > { %1423 = vmatpush3.bf16.msra.mxu1 %v1506_v50  ;;  %1408 = vmatprep.subr.bf16.mxu0 %v1519_v53  ;;  %v274_v50 = vrot.slane %v266_v42, 6  ;;  %v333_v53 = vshll.u32 %v1264_v40, 16 }
  0x3a   : > { %1424 = vmatprep.subr.bf16.mxu1 %v1508_v51  ;;  %v351_v51 = vrot.slane %v343_v43, 4  ;;  %v449_v7 = vld [vmem:[#allocation2 + $0x20] sm:$0xff] }
  0x3b   : > { %290 = vst [vmem:[#allocation2 + $0x38] sm:$0xc] %v274_v50 }
  0x3c   : > { %1409 = vmatpush3.bf16.msra.mxu0 %v1521_v56  ;;  %v195_v56 = vrot.slane %v193_v47, 1  ;;  %367 = vst [vmem:[#allocation2 + $0x38] sm:$0x30] %v351_v51 }
  0x3d   : > { %1425 = vmatpush3.bf16.msra.mxu1 %v1510_v54  ;;  %1410 = vmatprep.subr.bf16.mxu0 %v1523_v57  ;;  %v1526_v54 = vld [vmem:[%s1814_s1 + $0x1b0] sm:$0xff]   ;;  %v258_v57 = vrot.slane %v256_v49, 1 }
  0x3e   : > { %1426 = vmatprep.subr.bf16.mxu1 %v1512_v55  ;;  %v428_v55 = vrot.slane %v420_v46, 2  ;;  %v196_v62 = vor.u32 %v195_v56, %v191_v45 }
  0x3f   : > { %v259_v63 = vor.u32 %v258_v57, %v254_v48 }
  0x40   : > { %1411 = vmatpush3.bf16.msra.mxu0 %v1525_v60  ;;  %v450_v60 = vld [vmem:[#allocation2 + $0x28] sm:$0xff]  ;;  %444 = vst [vmem:[#allocation2 + $0x38] sm:$0xc0] %v428_v55  ;;  %212 = vst [vmem:[#allocation2 + $0x30] sm:$0x3] %v196_v62 }
  0x41   : > { %1427 = vmatpush3.bf16.msra.mxu1 %v1514_v58  ;;  %1412 = vmatprep.subr.bf16.mxu0 %v1527_v61  ;;  %v1276_v58 = vcombine.low %v1776_v11, %v1776_v11  ;;  %v335_v61 = vrot.slane %v333_v53, 1  ;;  %v273_v4 = vrot.slane %v259_v63, 6 }
  0x42   : > { %1428 = vmatprep.subr.bf16.mxu1 %v1516_v59  ;;  %v1528_v59 = vld [vmem:[%s1814_s1 + $0x1f8] sm:$0xff]   ;;  %1079 = vmatprep.mubr.bf16.mxu0 %v450_v60 }
  0x43   : > { %v408_v0 = vshrl.u32 %v1276_v58, 16  ;;  %v410_v1 = vshll.u32 %v1276_v58, 16  ;;  %v336_v2 = vor.u32 %v335_v61, %v331_v52  ;;  %289 = vst [vmem:[#allocation2 + $0x30] sm:$0xc] %v273_v4 }
  0x44   : > { %1413 = vmatpush3.bf16.msra.mxu0 %v1529_v18 }
  0x45   : > { %1429 = vmatpush3.bf16.msra.mxu1 %v1518_v17  ;;  %v412_v5 = vrot.slane %v410_v1, 1  ;;  %v350_v6 = vrot.slane %v336_v2, 4 }
  0x46   : > { %1430 = vmatprep.subr.bf16.mxu1 %v1520_v23 }
  0x47   : > { %v413_v8 = vor.u32 %v412_v5, %v408_v0  ;;  %1080 = vmatmul.mubr.bf16.vlgmr.msra.gmra.mrb[4].mxu0 %v449_v7  ;;  %366 = vst [vmem:[#allocation2 + $0x30] sm:$0x30] %v350_v6  ;;  %v452_v10 = vld [vmem:[#allocation2 + $0x38] sm:$0xff] }
  0x48   : > { %1120 = vmatprep.mubr.bf16.mxu1 %v452_v10 }
  0x49   : > { %1431 = vmatpush3.bf16.msra.mxu1 %v1522_v36  ;;  %v427_v9 = vrot.slane %v413_v8, 2 }
  0x4a   : > { %1432 = vmatprep.subr.bf16.mxu1 %v1524_v41 }
  0x4b   : > { %443 = vst [vmem:[#allocation2 + $0x30] sm:$0xc0] %v427_v9 }
  0x4d   : > { %1433 = vmatpush3.bf16.msra.mxu1 %v1526_v54 }
  0x4e   : > { %1434 = vmatprep.subr.bf16.mxu1 %v1528_v59 }
  0x51   : > { %1435 = vmatpush3.bf16.msra.mxu1 %v1530_v3 }
  0x52   : > { %v451_v11 = vld [vmem:[#allocation2 + $0x30] sm:$0xff] }
  0x54   : > { %1121 = vmatmul.mubr.bf16.vlgmr.msra.gmra.mrb[4].mxu1 %v451_v11 }
  0xfa   : > { %v1370_v12 = vpop.f32.mrb[0].mxu0 }
  0xfb   : > { %v1371_v13 = vpop.f32.mrb[1].mxu0 }
  0xfc   : > { %v1372_v14 = vadd.f32 %v1371_v13, %v1370_v12  ;;  %v1373_v15 = vpop.f32.mrb[2].mxu0 }
  0xfd   : > { %v1374_v16 = vpop.f32.mrb[3].mxu0 }
  0xfe   : > { %v1375_v17 = vadd.f32 %v1374_v16, %v1373_v15 }
 0x107   : > { %v1392_v18 = vpop.f32.mrb[0].mxu1 }
 0x108   : > { %v1393_v19 = vpop.f32.mrb[1].mxu1 }
 0x109   : > { %v1394_v20 = vadd.f32 %v1393_v19, %v1392_v18  ;;  %v1395_v21 = vpop.f32.mrb[2].mxu1 }
 0x10a   : > { %v1396_v22 = vpop.f32.mrb[3].mxu1 }
 0x10b   : > { %v1041_v23 = vadd.f32 %v1394_v20, %v1372_v14  ;;  %v1397_v24 = vadd.f32 %v1396_v22, %v1395_v21 }
 0x10d   : > { %v1044_v25 = vadd.f32 %v1397_v24, %v1375_v17 }
 0x11a   : > { %v1414_v26 = vpop.f32.mrb[4].mxu0 }
 0x11b   : > { %v1415_v27 = vpop.f32.mrb[5].mxu0 }
 0x11c   : > { %v1416_v28 = vadd.f32 %v1415_v27, %v1414_v26  ;;  %v1417_v29 = vpop.f32.mrb[6].mxu0 }
 0x11d   : > { %v1418_v30 = vpop.f32.mrb[7].mxu0 }
 0x11e   : > { %v1082_v31 = vadd.f32 %v1416_v28, %v1041_v23  ;;  %v1419_v32 = vadd.f32 %v1418_v30, %v1417_v29 }
 0x120   : > { %v1085_v33 = vadd.f32 %v1419_v32, %v1044_v25 }
 0x127   : > { %v1436_v34 = vpop.f32.mrb[4].mxu1 }
 0x128   : > { %v1437_v35 = vpop.f32.mrb[5].mxu1 }
 0x129   : > { %v1438_v36 = vadd.f32 %v1437_v35, %v1436_v34  ;;  %v1439_v37 = vpop.f32.mrb[6].mxu1 }
 0x12a   : > { %v1440_v38 = vpop.f32.mrb[7].mxu1 }
 0x12b   : > { %v1123_v39 = vadd.f32 %v1438_v36, %v1082_v31  ;;  %v1441_v40 = vadd.f32 %v1440_v38, %v1439_v37 }
 0x12d   : > { %v1126_v41 = vadd.f32 %v1441_v40, %v1085_v33 }
 0x12f   : > { %v1129_v42 = vadd.f32 %v1126_v41, %v1123_v39 }
 0x131   : > { %v1130_v43 = vrot.slane %v1129_v42, 4 }
 0x133   : > { %v1131_v44 = vadd.f32 %v1130_v43, %v1129_v42 }
 0x135   : > { %v1132_v45 = vrot.slane %v1131_v44, 2 }
 0x137   : > { %v1133_v46 = vadd.f32 %v1132_v45, %v1131_v44 }
 0x139   : > { %v1134_v47 = vrot.slane %v1133_v46, 1 }
 0x13b   : > { %v1135_v48 = vadd.f32 %v1134_v47, %v1133_v46 }
 0x13d   : > { %v1136_v49 = vmul.f32 0.0625, %v1135_v48 }
 0x13f   : > { %v1137_v50 = vsub.f32 %v1123_v39, %v1136_v49  ;;  %v1138_v51 = vsub.f32 %v1126_v41, %v1136_v49 }
 0x141   : > { %v1139_v52 = vmul.f32 %v1137_v50, %v1137_v50  ;;  %v1140_v53 = vmul.f32 %v1138_v51, %v1138_v51 }
 0x143   : > { %v1141_v54 = vadd.f32 %v1140_v53, %v1139_v52 }
 0x145   : > { %v1142_v55 = vrot.slane %v1141_v54, 4 }
 0x147   : > { %v1143_v56 = vadd.f32 %v1142_v55, %v1141_v54 }
 0x149   : > { %v1144_v57 = vrot.slane %v1143_v56, 2 }
 0x14b   : > { %v1145_v58 = vadd.f32 %v1144_v57, %v1143_v56 }
 0x14d   : > { %v1146_v59 = vrot.slane %v1145_v58, 1 }
 0x14f   : > { %v1147_v60 = vadd.f32 %v1146_v59, %v1145_v58 }
 0x151   : > { %v1148_v61 = vmul.f32 0.0625, %v1147_v60 }
 0x153   : > { %v1149_v62 = vadd.f32 1e-05, %v1148_v61 }
 0x155   : > { %1547 = vrsqrt.f32 %v1149_v62 }
 0x15f   : > { %v1548_v63 = vpop.eup %1547 }
 0x160   : > { %v1151_v0 = vmul.f32 %v1548_v63, %v1137_v50  ;;  %v1152_v1 = vmul.f32 %v1548_v63, %v1138_v51 }
 0x162   : > { %vm1153_vm0 = vcmp.ge.f32.partialorder %v1151_v0, 0.0  ;;  %vm1154_vm1 = vcmp.ge.f32.partialorder %v1152_v1, 0.0  ;;  %v1155_v2 = vmul.f32 0.01, %v1151_v0  ;;  %v1156_v3 = vmul.f32 0.01, %v1152_v1 }
 0x164   : > { %v1157_v4 = vsel %vm1153_vm0, %v1151_v0, %v1155_v2  ;;  %v1158_v5 = vsel %vm1154_vm1, %v1152_v1, %v1156_v3 }
 0x165   : > { %v1352_v6 = vpack.c.bf16 %v1158_v5, %v1157_v4 }
 0x167   : > { %1353 = vst [vmem:[%s143_s17] sm:$0xff] %v1352_v6  }
 0x168 PF: > { %s12_s9 = sadd.s32 1, %s1555_s9  }
 0x169   : > { %p9_p4 = scmp.ge.s32.totalorder %s12_s9, 4  }
 0x16b   :  { %11 = sbr.rel (!%p9_p4) target bundleno = 1 (0x1), region = 62 }

// kernel: encoder_forward.7
= control target key start
LH: loop header
LB: loop body
LE: loop exit
PB: predicated region body
PF: predicated region fallthrough
CT: control target
= control target key end

     0   :  { %v1351_v36 = vmov 1966171168   ;;  %v145_v38 = vlaneseq  ;;  %s1767_s1 = inlined_call_operand.vmem [shape: bf16[1024,256], index: 1, kind: input, shape index: {}]   ;;  %s1768_s0 = inlined_call_operand.vmem [shape: bf16[2,1024], index: 0, kind: input, shape index: {}]   ;;  %s1769_s2 = inlined_call_operand.vmem [shape: f32[2,256], index: 2, kind: output, shape index: {}]  }
   0x1   :  { %v1158_v0 = vld [vmem:[%s1767_s1 + $0x4] ss:$8 sps:$4 sm:$0xff]   ;;  %v1162_v2 = vld [vmem:[%s1767_s1] ss:$8 sps:$4 sm:$0xff]   ;;  %v1164_v4 = vld [vmem:[%s1767_s1 + $0x14] ss:$8 sps:$4 sm:$0xff]   ;;  %v143_v37 = vunpack.c.l.s4 %v1351_v36 }
   0x2   :  { %v1160_v1 = vld [vmem:[%s1767_s1 + $0x204] ss:$8 sps:$4 sm:$0xff]   ;;  %838 = vmatprep.subr.bf16.mxu1 %v1158_v0  ;;  %v1163_v3 = vld [vmem:[%s1767_s1 + $0x200] ss:$8 sps:$4 sm:$0xff]   ;;  %v1166_v5 = vld [vmem:[%s1767_s1 + $0x214] ss:$8 sps:$4 sm:$0xff]  }
   0x3   :  { %920 = vmatprep.subr.bf16.mxu0 %v1160_v1  ;;  %839 = vmatpush1.bf16.msra.mxu1 %v1162_v2  ;;  %v1168_v6 = vld [vmem:[%s1767_s1 + $0x10] ss:$8 sps:$4 sm:$0xff]   ;;  %v1170_v8 = vld [vmem:[%s1767_s1 + $0x24] ss:$8 sps:$4 sm:$0xff]   ;;  %v1174_v10 = vld [vmem:[%s1767_s1 + $0x20] ss:$8 sps:$4 sm:$0xff]   ;;  %v144_v42 = vunpack.c.0.s8 %v143_v37 }
   0x4   :  { %921 = vmatpush1.bf16.msra.mxu0 %v1163_v3  ;;  %840 = vmatprep.subr.bf16.mxu1 %v1164_v4  ;;  %v1169_v7 = vld [vmem:[%s1767_s1 + $0x210] ss:$8 sps:$4 sm:$0xff]   ;;  %v1172_v9 = vld [vmem:[%s1767_s1 + $0x224] ss:$8 sps:$4 sm:$0xff]   ;;  %v1175_v11 = vld [vmem:[%s1767_s1 + $0x220] ss:$8 sps:$4 sm:$0xff]  }
   0x5   :  { %922 = vmatprep.subr.bf16.mxu0 %v1166_v5  ;;  %v1176_v12 = vld [vmem:[%s1767_s1 + $0x34] ss:$8 sps:$4 sm:$0xff]   ;;  %v1180_v14 = vld [vmem:[%s1767_s1 + $0x30] ss:$8 sps:$4 sm:$0xff]   ;;  %v1182_v16 = vld [vmem:[%s1767_s1 + $0x44] ss:$8 sps:$4 sm:$0xff]  }
   0x6   :  { %v1178_v13 = vld [vmem:[%s1767_s1 + $0x234] ss:$8 sps:$4 sm:$0xff]   ;;  %v1181_v15 = vld [vmem:[%s1767_s1 + $0x230] ss:$8 sps:$4 sm:$0xff]   ;;  %v1184_v17 = vld [vmem:[%s1767_s1 + $0x244] ss:$8 sps:$4 sm:$0xff]  }
   0x7   :  { %841 = vmatpush1.bf16.msra.mxu1 %v1168_v6  ;;  %v1186_v18 = vld [vmem:[%s1767_s1 + $0x40] ss:$8 sps:$4 sm:$0xff]   ;;  %v1188_v20 = vld [vmem:[%s1767_s1 + $0x54] ss:$8 sps:$4 sm:$0xff]   ;;  %v1192_v22 = vld [vmem:[%s1767_s1 + $0x50] ss:$8 sps:$4 sm:$0xff]  }
   0x8   :  { %923 = vmatpush1.bf16.msra.mxu0 %v1169_v7  ;;  %842 = vmatprep.subr.bf16.mxu1 %v1170_v8  ;;  %v1187_v19 = vld [vmem:[%s1767_s1 + $0x240] ss:$8 sps:$4 sm:$0xff]   ;;  %v1190_v21 = vld [vmem:[%s1767_s1 + $0x254] ss:$8 sps:$4 sm:$0xff]   ;;  %v1193_v23 = vld [vmem:[%s1767_s1 + $0x250] ss:$8 sps:$4 sm:$0xff]  }
   0x9   :  { %924 = vmatprep.subr.bf16.mxu0 %v1172_v9  ;;  %v1194_v24 = vld [vmem:[%s1767_s1 + $0x64] ss:$8 sps:$4 sm:$0xff]   ;;  %v1198_v26 = vld [vmem:[%s1767_s1 + $0x60] ss:$8 sps:$4 sm:$0xff]   ;;  %v1200_v28 = vld [vmem:[%s1767_s1 + $0x74] ss:$8 sps:$4 sm:$0xff]  }
   0xa   :  { %v1196_v25 = vld [vmem:[%s1767_s1 + $0x264] ss:$8 sps:$4 sm:$0xff]   ;;  %v1199_v27 = vld [vmem:[%s1767_s1 + $0x260] ss:$8 sps:$4 sm:$0xff]   ;;  %v1202_v29 = vld [vmem:[%s1767_s1 + $0x274] ss:$8 sps:$4 sm:$0xff]  }
   0xb   :  { %843 = vmatpush1.bf16.msra.mxu1 %v1174_v10  ;;  %v1204_v30 = vld [vmem:[%s1767_s1 + $0x70] ss:$8 sps:$4 sm:$0xff]   ;;  %v1206_v32 = vld [vmem:[%s1767_s1 + $0x84] ss:$8 sps:$4 sm:$0xff]   ;;  %v1210_v34 = vld [vmem:[%s1767_s1 + $0x80] ss:$8 sps:$4 sm:$0xff]  }
   0xc   :  { %925 = vmatpush1.bf16.msra.mxu0 %v1175_v11  ;;  %844 = vmatprep.subr.bf16.mxu1 %v1176_v12  ;;  %v1205_v31 = vld [vmem:[%s1767_s1 + $0x270] ss:$8 sps:$4 sm:$0xff]   ;;  %v1208_v33 = vld [vmem:[%s1767_s1 + $0x284] ss:$8 sps:$4 sm:$0xff]   ;;  %v1211_v35 = vld [vmem:[%s1767_s1 + $0x280] ss:$8 sps:$4 sm:$0xff]  }
   0xd   :  { %926 = vmatprep.subr.bf16.mxu0 %v1178_v13  ;;  %v1212_v39 = vld [vmem:[%s1767_s1 + $0x94] ss:$8 sps:$4 sm:$0xff]   ;;  %v1216_v41 = vld [vmem:[%s1767_s1 + $0x90] ss:$8 sps:$4 sm:$0xff]   ;;  %v146_v43 = vshrl.u32 %v145_v38, 7  ;;  %v11_v52 = vld [vmem:[%s1768_s0] sm:$0xff] }
   0xe   :  { %v1214_v40 = vld [vmem:[%s1767_s1 + $0x294] ss:$8 sps:$4 sm:$0xff]   ;;  %v1217_v44 = vld [vmem:[%s1767_s1 + $0x290] ss:$8 sps:$4 sm:$0xff]   ;;  %v1218_v45 = vld [vmem:[%s1767_s1 + $0xa4] ss:$8 sps:$4 sm:$0xff]   ;;  %v141_v55 = vcombine.high %v11_v52, %v11_v52 }
   0xf   :  { %845 = vmatpush1.bf16.msra.mxu1 %v1180_v14  ;;  %v1220_v46 = vld [vmem:[%s1767_s1 + $0x2a4] ss:$8 sps:$4 sm:$0xff]   ;;  %v1222_v47 = vld [vmem:[%s1767_s1 + $0xa0] ss:$8 sps:$4 sm:$0xff]   ;;  %v147_v49 = vsub.s32 %v144_v42, %v146_v43  ;;  %v1224_v50 = vld [vmem:[%s1767_s1 + $0xb4] ss:$8 sps:$4 sm:$0xff]  }
  0x10   :  { %927 = vmatpush1.bf16.msra.mxu0 %v1181_v15  ;;  %846 = vmatprep.subr.bf16.mxu1 %v1182_v16  ;;  %v1223_v48 = vld [vmem:[%s1767_s1 + $0x2a0] ss:$8 sps:$4 sm:$0xff]   ;;  %v1226_v51 = vld [vmem:[%s1767_s1 + $0x2b4] ss:$8 sps:$4 sm:$0xff]   ;;  %v1228_v53 = vld [vmem:[%s1767_s1 + $0xb0] ss:$8 sps:$4 sm:$0xff]  }
  0x11   :  { %928 = vmatprep.subr.bf16.mxu0 %v1184_v17  ;;  %v148_v54 = vrot.slane %v11_v52, %v147_v49  ;;  %v1229_v56 = vld [vmem:[%s1767_s1 + $0x2b0] ss:$8 sps:$4 sm:$0xff]   ;;  %v1230_v57 = vld [vmem:[%s1767_s1 + $0xc4] ss:$8 sps:$4 sm:$0xff]   ;;  %v155_v60 = vrot.slane %v141_v55, %v147_v49  ;;  %v1234_v61 = vld [vmem:[%s1767_s1 + $0xc0] ss:$8 sps:$4 sm:$0xff]  }
  0x12   :  { %v1232_v58 = vld [vmem:[%s1767_s1 + $0x2c4] ss:$8 sps:$4 sm:$0xff]   ;;  %v1235_v0 = vld [vmem:[%s1767_s1 + $0x2c0] ss:$8 sps:$4 sm:$0xff]   ;;  %v1236_v1 = vld [vmem:[%s1767_s1 + $0xd4] ss:$8 sps:$4 sm:$0xff]  }
  0x13   :  { %847 = vmatpush1.bf16.msra.mxu1 %v1186_v18  ;;  %v156_v59 = vcombine.high %v148_v54, %v148_v54  ;;  %v157_v63 = vcombine.high %v155_v60, %v155_v60  ;;  %v1238_v2 = vld [vmem:[%s1767_s1 + $0x2d4] ss:$8 sps:$4 sm:$0xff]   ;;  %v1240_v4 = vld [vmem:[%s1767_s1 + $0xd0] ss:$8 sps:$4 sm:$0xff]   ;;  %v1242_v6 = vld [vmem:[%s1767_s1 + $0xe4] ss:$8 sps:$4 sm:$0xff]   ;;  %v1571_v17 = vrot.slane %v148_v54, %v147_v49  ;;  %v1573_v18 = vrot.slane %v155_v60, %v147_v49 }
  0x14   :  { %929 = vmatpush1.bf16.msra.mxu0 %v1187_v19  ;;  %848 = vmatprep.subr.bf16.mxu1 %v1188_v20  ;;  %v1241_v5 = vld [vmem:[%s1767_s1 + $0x2d0] ss:$8 sps:$4 sm:$0xff]   ;;  %v1244_v7 = vld [vmem:[%s1767_s1 + $0x2e4] ss:$8 sps:$4 sm:$0xff]   ;;  %v1246_v8 = vld [vmem:[%s1767_s1 + $0xe0] ss:$8 sps:$4 sm:$0xff]  }
  0x15   :  { %930 = vmatprep.subr.bf16.mxu0 %v1190_v21  ;;  %v178_v62 = vrot.slane %v156_v59, %v147_v49  ;;  %v185_v3 = vrot.slane %v157_v63, %v147_v49  ;;  %v1247_v9 = vld [vmem:[%s1767_s1 + $0x2e0] ss:$8 sps:$4 sm:$0xff]   ;;  %v1248_v10 = vld [vmem:[%s1767_s1 + $0xf4] ss:$8 sps:$4 sm:$0xff]   ;;  %v1252_v12 = vld [vmem:[%s1767_s1 + $0xf0] ss:$8 sps:$4 sm:$0xff]  }
  0x16   :  { %v1250_v11 = vld [vmem:[%s1767_s1 + $0x2f4] ss:$8 sps:$4 sm:$0xff]   ;;  %v1253_v13 = vld [vmem:[%s1767_s1 + $0x2f0] ss:$8 sps:$4 sm:$0xff]   ;;  %v1256_v14 = vld [vmem:[%s1767_s1 + $0x104] ss:$8 sps:$4 sm:$0xff]  }
  0x17   :  { %849 = vmatpush1.bf16.msra.mxu1 %v1192_v22  ;;  %870 = vmatprep.mubr.bf16.mxu1 %v178_v62  ;;  %v1260_v15 = vld [vmem:[%s1767_s1 + $0x304] ss:$8 sps:$4 sm:$0xff]   ;;  %v1254_v16 = vld [vmem:[%s1767_s1 + $0x100] ss:$8 sps:$4 sm:$0xff]   ;;  %v1263_v20 = vld [vmem:[%s1767_s1 + $0x114] ss:$8 sps:$4 sm:$0xff]   ;;  %v188_v22 = vcombine.high %v178_v62, %v178_v62 }
  0x18   :  { %931 = vmatpush1.bf16.msra.mxu0 %v1193_v23  ;;  %850 = vmatprep.subr.bf16.mxu1 %v1194_v24  ;;  %v1258_v19 = vld [vmem:[%s1767_s1 + $0x300] ss:$8 sps:$4 sm:$0xff]   ;;  %v1266_v21 = vld [vmem:[%s1767_s1 + $0x314] ss:$8 sps:$4 sm:$0xff]   ;;  %v189_v23 = vcombine.high %v185_v3, %v185_v3  ;;  %v1261_v24 = vld [vmem:[%s1767_s1 + $0x110] ss:$8 sps:$4 sm:$0xff]  }
  0x19   :  { %932 = vmatprep.subr.bf16.mxu0 %v1196_v25  ;;  %952 = vmatprep.mubr.bf16.mxu0 %v185_v3  ;;  %v1264_v25 = vld [vmem:[%s1767_s1 + $0x310] ss:$8 sps:$4 sm:$0xff]   ;;  %v1279_v36 = vld [vmem:[%s1767_s1 + $0x140] ss:$8 sps:$4 sm:$0xff]   ;;  %v1287_v38 = vld [vmem:[%s1767_s1 + $0x154] ss:$8 sps:$4 sm:$0xff]  }
  0x1a   :  { %v1282_v37 = vld [vmem:[%s1767_s1 + $0x340] ss:$8 sps:$4 sm:$0xff]   ;;  %v1293_v42 = vld [vmem:[%s1767_s1 + $0x164] ss:$8 sps:$4 sm:$0xff]   ;;  %v1300_v49 = vld [vmem:[%s1767_s1 + $0x370] ss:$8 sps:$4 sm:$0xff]  }
  0x1b   :  { %851 = vmatpush1.bf16.msra.mxu1 %v1198_v26  ;;  %v1269_v26 = vld [vmem:[%s1767_s1 + $0x124] ss:$8 sps:$4 sm:$0xff]   ;;  %v1303_v52 = vld [vmem:[%s1767_s1 + $0x180] ss:$8 sps:$4 sm:$0xff]   ;;  %v1311_v54 = vld [vmem:[%s1767_s1 + $0x194] ss:$8 sps:$4 sm:$0xff]  }
  0x1c   :  { %933 = vmatpush1.bf16.msra.mxu0 %v1199_v27  ;;  %852 = vmatprep.subr.bf16.mxu1 %v1200_v28  ;;  %v1272_v27 = vld [vmem:[%s1767_s1 + $0x324] ss:$8 sps:$4 sm:$0xff]   ;;  %v1267_v28 = vld [vmem:[%s1767_s1 + $0x120] ss:$8 sps:$4 sm:$0xff]   ;;  %v1314_v55 = vld [vmem:[%s1767_s1 + $0x394] ss:$8 sps:$4 sm:$0xff]  }
  0x1d   :  { %934 = vmatprep.subr.bf16.mxu0 %v1202_v29  ;;  %v1270_v29 = vld [vmem:[%s1767_s1 + $0x320] ss:$8 sps:$4 sm:$0xff]   ;;  %v1296_v43 = vld [vmem:[%s1767_s1 + $0x364] ss:$8 sps:$4 sm:$0xff]   ;;  %v1323_v62 = vld [vmem:[%s1767_s1 + $0x1b4] ss:$8 sps:$4 sm:$0xff]  }
  0x1e   :  { %v1320_v59 = vld [vmem:[%s1767_s1 + $0x3a4] ss:$8 sps:$4 sm:$0xff]   ;;  %v1315_v60 = vld [vmem:[%s1767_s1 + $0x1a0] ss:$8 sps:$4 sm:$0xff]   ;;  %v1326_v63 = vld [vmem:[%s1767_s1 + $0x3b4] ss:$8 sps:$4 sm:$0xff]  }
  0x1f   :  { %853 = vmatpush1.bf16.msra.mxu1 %v1204_v30  ;;  %v1275_v30 = vld [vmem:[%s1767_s1 + $0x134] ss:$8 sps:$4 sm:$0xff]   ;;  %v1332_v3 = vld [vmem:[%s1767_s1 + $0x3c4] ss:$8 sps:$4 sm:$0xff]  }
  0x20   :  { %935 = vmatpush1.bf16.msra.mxu0 %v1205_v31  ;;  %854 = vmatprep.subr.bf16.mxu1 %v1206_v32  ;;  %v1278_v31 = vld [vmem:[%s1767_s1 + $0x334] ss:$8 sps:$4 sm:$0xff]   ;;  %v1273_v32 = vld [vmem:[%s1767_s1 + $0x130] ss:$8 sps:$4 sm:$0xff]  }
  0x21   :  { %936 = vmatprep.subr.bf16.mxu0 %v1208_v33  ;;  %v1276_v33 = vld [vmem:[%s1767_s1 + $0x330] ss:$8 sps:$4 sm:$0xff]  }
  0x23   :  { %855 = vmatpush1.bf16.msra.mxu1 %v1210_v34  ;;  %v1281_v34 = vld [vmem:[%s1767_s1 + $0x144] ss:$8 sps:$4 sm:$0xff]  }
  0x24   :  { %937 = vmatpush1.bf16.msra.mxu0 %v1211_v35  ;;  %856 = vmatprep.subr.bf16.mxu1 %v1212_v39  ;;  %v1284_v35 = vld [vmem:[%s1767_s1 + $0x344] ss:$8 sps:$4 sm:$0xff]   ;;  %v1290_v39 = vld [vmem:[%s1767_s1 + $0x354] ss:$8 sps:$4 sm:$0xff]  }
  0x25   :  { %938 = vmatprep.subr.bf16.mxu0 %v1214_v40  ;;  %v1285_v40 = vld [vmem:[%s1767_s1 + $0x150] ss:$8 sps:$4 sm:$0xff]  }
  0x27   :  { %857 = vmatpush1.bf16.msra.mxu1 %v1216_v41  ;;  %v1288_v41 = vld [vmem:[%s1767_s1 + $0x350] ss:$8 sps:$4 sm:$0xff]  }
  0x28   :  { %939 = vmatpush1.bf16.msra.mxu0 %v1217_v44  ;;  %858 = vmatprep.subr.bf16.mxu1 %v1218_v45  ;;  %v1291_v44 = vld [vmem:[%s1767_s1 + $0x160] ss:$8 sps:$4 sm:$0xff]  }
  0x29   :  { %940 = vmatprep.subr.bf16.mxu0 %v1220_v46  ;;  %v1294_v45 = vld [vmem:[%s1767_s1 + $0x360] ss:$8 sps:$4 sm:$0xff]   ;;  %v1299_v46 = vld [vmem:[%s1767_s1 + $0x174] ss:$8 sps:$4 sm:$0xff]  }
  0x2b   :  { %859 = vmatpush1.bf16.msra.mxu1 %v1222_v47  ;;  %v1302_v47 = vld [vmem:[%s1767_s1 + $0x374] ss:$8 sps:$4 sm:$0xff]  }
  0x2c   :  { %941 = vmatpush1.bf16.msra.mxu0 %v1223_v48  ;;  %860 = vmatprep.subr.bf16.mxu1 %v1224_v50  ;;  %v1297_v48 = vld [vmem:[%s1767_s1 + $0x170] ss:$8 sps:$4 sm:$0xff]   ;;  %v1305_v50 = vld [vmem:[%s1767_s1 + $0x184] ss:$8 sps:$4 sm:$0xff]  }
  0x2d   :  { %942 = vmatprep.subr.bf16.mxu0 %v1226_v51  ;;  %v1308_v51 = vld [vmem:[%s1767_s1 + $0x384] ss:$8 sps:$4 sm:$0xff]  }
  0x2f   :  { %861 = vmatpush1.bf16.msra.mxu1 %v1228_v53  ;;  %v1306_v53 = vld [vmem:[%s1767_s1 + $0x380] ss:$8 sps:$4 sm:$0xff]  }
  0x30   :  { %943 = vmatpush1.bf16.msra.mxu0 %v1229_v56  ;;  %862 = vmatprep.subr.bf16.mxu1 %v1230_v57  ;;  %v1309_v56 = vld [vmem:[%s1767_s1 + $0x190] ss:$8 sps:$4 sm:$0xff]  }
  0x31   :  { %944 = vmatprep.subr.bf16.mxu0 %v1232_v58  ;;  %v1312_v57 = vld [vmem:[%s1767_s1 + $0x390] ss:$8 sps:$4 sm:$0xff]   ;;  %v1317_v58 = vld [vmem:[%s1767_s1 + $0x1a4] ss:$8 sps:$4 sm:$0xff]  }
  0x33   :  { %863 = vmatpush1.bf16.msra.mxu1 %v1234_v61  ;;  %v1318_v61 = vld [vmem:[%s1767_s1 + $0x3a0] ss:$8 sps:$4 sm:$0xff]  }
  0x34   :  { %945 = vmatpush1.bf16.msra.mxu0 %v1235_v0  ;;  %864 = vmatprep.subr.bf16.mxu1 %v1236_v1  ;;  %v1321_v0 = vld [vmem:[%s1767_s1 + $0x1b0] ss:$8 sps:$4 sm:$0xff]  }
  0x35   :  { %946 = vmatprep.subr.bf16.mxu0 %v1238_v2  ;;  %v1324_v1 = vld [vmem:[%s1767_s1 + $0x3b0] ss:$8 sps:$4 sm:$0xff]   ;;  %v1329_v2 = vld [vmem:[%s1767_s1 + $0x1c4] ss:$8 sps:$4 sm:$0xff]  }
  0x37   :  { %865 = vmatpush1.bf16.msra.mxu1 %v1240_v4  ;;  %v1327_v4 = vld [vmem:[%s1767_s1 + $0x1c0] ss:$8 sps:$4 sm:$0xff]  }
  0x38   :  { %947 = vmatpush1.bf16.msra.mxu0 %v1241_v5  ;;  %866 = vmatprep.subr.bf16.mxu1 %v1242_v6  ;;  %v1330_v5 = vld [vmem:[%s1767_s1 + $0x3c0] ss:$8 sps:$4 sm:$0xff]   ;;  %v1335_v6 = vld [vmem:[%s1767_s1 + $0x1d4] ss:$8 sps:$4 sm:$0xff]  }
  0x39   :  { %948 = vmatprep.subr.bf16.mxu0 %v1244_v7  ;;  %v1338_v7 = vld [vmem:[%s1767_s1 + $0x3d4] ss:$8 sps:$4 sm:$0xff]  }
  0x3b   :  { %867 = vmatpush1.bf16.msra.mxu1 %v1246_v8  ;;  %v1333_v8 = vld [vmem:[%s1767_s1 + $0x1d0] ss:$8 sps:$4 sm:$0xff]  }
  0x3c   :  { %949 = vmatpush1.bf16.msra.mxu0 %v1247_v9  ;;  %868 = vmatprep.subr.bf16.mxu1 %v1248_v10  ;;  %v1336_v9 = vld [vmem:[%s1767_s1 + $0x3d0] ss:$8 sps:$4 sm:$0xff]   ;;  %v1341_v10 = vld [vmem:[%s1767_s1 + $0x1e4] ss:$8 sps:$4 sm:$0xff]  }
  0x3d   :  { %950 = vmatprep.subr.bf16.mxu0 %v1250_v11  ;;  %v1344_v11 = vld [vmem:[%s1767_s1 + $0x3e4] ss:$8 sps:$4 sm:$0xff]  }
  0x3f   :  { %869 = vmatpush1.bf16.msra.mxu1 %v1252_v12  ;;  %v1339_v12 = vld [vmem:[%s1767_s1 + $0x1e0] ss:$8 sps:$4 sm:$0xff]  }
  0x40   :  { %951 = vmatpush1.bf16.msra.mxu0 %v1253_v13  ;;  %879 = vmatprep.subr.bf16.mxu1 %v1256_v14  ;;  %v1342_v13 = vld [vmem:[%s1767_s1 + $0x3e0] ss:$8 sps:$4 sm:$0xff]   ;;  %v1347_v14 = vld [vmem:[%s1767_s1 + $0x1f4] ss:$8 sps:$4 sm:$0xff]  }
  0x41   :  { %961 = vmatprep.subr.bf16.mxu0 %v1260_v15  ;;  %v1350_v15 = vld [vmem:[%s1767_s1 + $0x3f4] ss:$8 sps:$4 sm:$0xff]  }
  0x42   :  { %871 = vmatmul.mubr.bf16.vlgmr.msra.gmra.mrb[0].mxu1 %v1571_v17 }
  0x43   :  { %953 = vmatmul.mubr.bf16.vlgmr.msra.gmra.mrb[0].mxu0 %v1573_v18  ;;  %880 = vmatpush1.bf16.msra.mxu1 %v1254_v16  ;;  %v1345_v16 = vld [vmem:[%s1767_s1 + $0x1f0] ss:$8 sps:$4 sm:$0xff]  }
  0x44   :  { %962 = vmatpush1.bf16.msra.mxu0 %v1258_v19  ;;  %881 = vmatprep.subr.bf16.mxu1 %v1263_v20  ;;  %v1348_v19 = vld [vmem:[%s1767_s1 + $0x3f0] ss:$8 sps:$4 sm:$0xff]   ;;  %v186_v20 = vcombine.high %v1571_v17, %v1571_v17 }
  0x45   :  { %963 = vmatprep.subr.bf16.mxu0 %v1266_v21  ;;  %911 = vmatprep.mubr.bf16.mxu1 %v188_v22  ;;  %v187_v21 = vcombine.high %v1573_v18, %v1573_v18 }
  0x46   :  { %993 = vmatprep.mubr.bf16.mxu0 %v189_v23 }
  0x47   :  { %882 = vmatpush1.bf16.msra.mxu1 %v1261_v24 }
  0x48   :  { %964 = vmatpush1.bf16.msra.mxu0 %v1264_v25  ;;  %883 = vmatprep.subr.bf16.mxu1 %v1269_v26 }
  0x49   :  { %965 = vmatprep.subr.bf16.mxu0 %v1272_v27 }
  0x4b   :  { %884 = vmatpush1.bf16.msra.mxu1 %v1267_v28 }
  0x4c   :  { %966 = vmatpush1.bf16.msra.mxu0 %v1270_v29  ;;  %885 = vmatprep.subr.bf16.mxu1 %v1275_v30 }
  0x4d   :  { %967 = vmatprep.subr.bf16.mxu0 %v1278_v31 }
  0x4f   :  { %886 = vmatpush1.bf16.msra.mxu1 %v1273_v32 }
  0x50   :  { %968 = vmatpush1.bf16.msra.mxu0 %v1276_v33  ;;  %887 = vmatprep.subr.bf16.mxu1 %v1281_v34 }
  0x51   :  { %969 = vmatprep.subr.bf16.mxu0 %v1284_v35 }
  0x53   :  { %888 = vmatpush1.bf16.msra.mxu1 %v1279_v36 }
  0x54   :  { %970 = vmatpush1.bf16.msra.mxu0 %v1282_v37  ;;  %889 = vmatprep.subr.bf16.mxu1 %v1287_v38 }
  0x55   :  { %971 = vmatprep.subr.bf16.mxu0 %v1290_v39 }
  0x57   :  { %890 = vmatpush1.bf16.msra.mxu1 %v1285_v40 }
  0x58   :  { %972 = vmatpush1.bf16.msra.mxu0 %v1288_v41  ;;  %891 = vmatprep.subr.bf16.mxu1 %v1293_v42 }
  0x59   :  { %973 = vmatprep.subr.bf16.mxu0 %v1296_v43 }
  0x5b   :  { %892 = vmatpush1.bf16.msra.mxu1 %v1291_v44 }
  0x5c   :  { %974 = vmatpush1.bf16.msra.mxu0 %v1294_v45  ;;  %893 = vmatprep.subr.bf16.mxu1 %v1299_v46 }
  0x5d   :  { %975 = vmatprep.subr.bf16.mxu0 %v1302_v47 }
  0x5f   :  { %894 = vmatpush1.bf16.msra.mxu1 %v1297_v48 }
  0x60   :  { %976 = vmatpush1.bf16.msra.mxu0 %v1300_v49  ;;  %895 = vmatprep.subr.bf16.mxu1 %v1305_v50 }
  0x61   :  { %977 = vmatprep.subr.bf16.mxu0 %v1308_v51 }
  0x63   :  { %896 = vmatpush1.bf16.msra.mxu1 %v1303_v52 }
  0x64   :  { %978 = vmatpush1.bf16.msra.mxu0 %v1306_v53  ;;  %897 = vmatprep.subr.bf16.mxu1 %v1311_v54 }
  0x65   :  { %979 = vmatprep.subr.bf16.mxu0 %v1314_v55 }
  0x67   :  { %898 = vmatpush1.bf16.msra.mxu1 %v1309_v56 }
  0x68   :  { %980 = vmatpush1.bf16.msra.mxu0 %v1312_v57  ;;  %899 = vmatprep.subr.bf16.mxu1 %v1317_v58 }
  0x69   :  { %981 = vmatprep.subr.bf16.mxu0 %v1320_v59 }
  0x6b   :  { %900 = vmatpush1.bf16.msra.mxu1 %v1315_v60 }
  0x6c   :  { %982 = vmatpush1.bf16.msra.mxu0 %v1318_v61  ;;  %901 = vmatprep.subr.bf16.mxu1 %v1323_v62 }
  0x6d   :  { %983 = vmatprep.subr.bf16.mxu0 %v1326_v63 }
  0x6f   :  { %902 = vmatpush1.bf16.msra.mxu1 %v1321_v0 }
  0x70   :  { %984 = vmatpush1.bf16.msra.mxu0 %v1324_v1  ;;  %903 = vmatprep.subr.bf16.mxu1 %v1329_v2 }
  0x71   :  { %985 = vmatprep.subr.bf16.mxu0 %v1332_v3 }
  0x73   :  { %904 = vmatpush1.bf16.msra.mxu1 %v1327_v4 }
  0x74   :  { %986 = vmatpush1.bf16.msra.mxu0 %v1330_v5  ;;  %905 = vmatprep.subr.bf16.mxu1 %v1335_v6 }
  0x75   :  { %987 = vmatprep.subr.bf16.mxu0 %v1338_v7 }
  0x77   :  { %906 = vmatpush1.bf16.msra.mxu1 %v1333_v8 }
  0x78   :  { %988 = vmatpush1.bf16.msra.mxu0 %v1336_v9  ;;  %907 = vmatprep.subr.bf16.mxu1 %v1341_v10 }
  0x79   :  { %989 = vmatprep.subr.bf16.mxu0 %v1344_v11 }
  0x7b   :  { %908 = vmatpush1.bf16.msra.mxu1 %v1339_v12 }
  0x7c   :  { %990 = vmatpush1.bf16.msra.mxu0 %v1342_v13  ;;  %909 = vmatprep.subr.bf16.mxu1 %v1347_v14 }
  0x7d   :  { %991 = vmatprep.subr.bf16.mxu0 %v1350_v15 }
  0x7f   :  { %910 = vmatpush1.bf16.msra.mxu1 %v1345_v16 }
  0x80   :  { %992 = vmatpush1.bf16.msra.mxu0 %v1348_v19 }
  0x82   :  { %912 = vmatmul.mubr.bf16.vlgmr.msra.gmra.mrb[0].mxu1 %v186_v20 }
  0x83   :  { %994 = vmatmul.mubr.bf16.vlgmr.msra.gmra.mrb[0].mxu0 %v187_v21 }
 0x155   :  { %v913_v22 = vpop.f32.mrb[0].mxu1 }
 0x156   :  { %v995_v23 = vpop.f32.mrb[0].mxu0  ;;  %v915_v25 = vpop.f32.mrb[1].mxu1 }
 0x157   :  { %v1147_v24 = vadd.f32 %v995_v23, %v913_v22  ;;  %v997_v26 = vpop.f32.mrb[1].mxu0  ;;  %v917_v28 = vpop.f32.mrb[2].mxu1 }
 0x158   :  { %v1148_v27 = vadd.f32 %v997_v26, %v915_v25  ;;  %v999_v29 = vpop.f32.mrb[2].mxu0  ;;  %v918_v30 = vpop.f32.mrb[3].mxu1 }
 0x159   :  { %v1000_v31 = vpop.f32.mrb[3].mxu0 }
 0x15a   :  { %v1004_v32 = vcombine.low %v1147_v24, %v1148_v27 }
 0x15c   :  { %1146 = vst.sshfl [vmem:[%s1769_s2] sm:$0x33 pattern:$0x76325410] %v1004_v32 }

// kernel: encoder_forward.6
= control target key start
LH: loop header
LB: loop body
LE: loop exit
PB: predicated region body
PF: predicated region fallthrough
CT: control target
= control target key end

     0   :  { %s3374_s9 = smov 0   ;;  %s4258_s0 = inlined_call_operand.vmem [shape: bf16[2,3,3,512], index: 0, kind: input, shape index: {}]   ;;  %s4259_s1 = inlined_call_operand.vmem [shape: bf16[2048,256], index: 1, kind: input, shape index: {}]   ;;  %s4260_s2 = inlined_call_operand.vmem [shape: bf16[2,4,256], index: 2, kind: output, shape index: {}]  }
   0x1 LB: > { %s2640_s10 = sadd.s32 4294967295, %s3356_s9   ;;  %p2644_p0 = scmp.ge.s32.totalorder %s3356_s9, 1  ;;  %s3356_s9 = sphi %s3374_s9, %s12_s9  }
   0x2   : > { %p112_p1 = scmp.lt.s32.totalorder %s3356_s9, 3 }
   0x4   : > { %p113_p2 = pnand %p2644_p0, %p112_p1 }
   0x5   : > { %v2951_v0 = vld [vmem:[%s4259_s1 + $0x4] ss:$8 sps:$4 sm:$0xff] (!%p113_p2)   ;;  %v2955_v2 = vld [vmem:[%s4259_s1] ss:$8 sps:$4 sm:$0xff] (!%p113_p2)   ;;  %v2957_v4 = vld [vmem:[%s4259_s1 + $0x14] ss:$8 sps:$4 sm:$0xff] (!%p113_p2)   ;;  %v154_v36 = vlaneseq (!%p113_p2) }
   0x6   : > { %116 = sbr.rel (%p113_p2) target bundleno = 534 (0x216), region = 28  ;;  %v2953_v1 = vld [vmem:[%s4259_s1 + $0x404] ss:$8 sps:$4 sm:$0xff] (!%p113_p2)   ;;  %2194 = vmatprep.subr.bf16.mxu1 (!%p113_p2), %v2951_v0  ;;  %v2956_v3 = vld [vmem:[%s4259_s1 + $0x400] ss:$8 sps:$4 sm:$0xff] (!%p113_p2)   ;;  %p134_p3 = scmp.lt.s32.totalorder (!%p113_p2), %s2640_s10, 1 }
   0x7   : > { %2358 = vmatprep.subr.bf16.mxu0 (!%p113_p2), %v2953_v1  ;;  %2195 = vmatpush1.bf16.msra.mxu1 (!%p113_p2), %v2955_v2  ;;  %v2959_v5 = vld [vmem:[%s4259_s1 + $0x414] ss:$8 sps:$4 sm:$0xff] (!%p113_p2)   ;;  %v2961_v6 = vld [vmem:[%s4259_s1 + $0x10] ss:$8 sps:$4 sm:$0xff] (!%p113_p2)   ;;  %v2963_v8 = vld [vmem:[%s4259_s1 + $0x24] ss:$8 sps:$4 sm:$0xff] (!%p113_p2)  }
   0x8   : > { %2359 = vmatpush1.bf16.msra.mxu0 (!%p113_p2), %v2956_v3  ;;  %2196 = vmatprep.subr.bf16.mxu1 (!%p113_p2), %v2957_v4  ;;  %v2962_v7 = vld [vmem:[%s4259_s1 + $0x410] ss:$8 sps:$4 sm:$0xff] (!%p113_p2)   ;;  %v2965_v9 = vld [vmem:[%s4259_s1 + $0x424] ss:$8 sps:$4 sm:$0xff] (!%p113_p2)   ;;  %v2967_v10 = vld [vmem:[%s4259_s1 + $0x20] ss:$8 sps:$4 sm:$0xff] (!%p113_p2)  }
   0x9   : > { %2360 = vmatprep.subr.bf16.mxu0 (!%p113_p2), %v2959_v5  ;;  %v2968_v11 = vld [vmem:[%s4259_s1 + $0x420] ss:$8 sps:$4 sm:$0xff] (!%p113_p2)   ;;  %v2969_v12 = vld [vmem:[%s4259_s1 + $0x34] ss:$8 sps:$4 sm:$0xff] (!%p113_p2)   ;;  %v2973_v14 = vld [vmem:[%s4259_s1 + $0x30] ss:$8 sps:$4 sm:$0xff] (!%p113_p2)  }
   0xa   : > { %v2971_v13 = vld [vmem:[%s4259_s1 + $0x434] ss:$8 sps:$4 sm:$0xff] (!%p113_p2)   ;;  %v2974_v15 = vld [vmem:[%s4259_s1 + $0x430] ss:$8 sps:$4 sm:$0xff] (!%p113_p2)   ;;  %v2975_v16 = vld [vmem:[%s4259_s1 + $0x44] ss:$8 sps:$4 sm:$0xff] (!%p113_p2)  }
   0xb   : > { %2197 = vmatpush1.bf16.msra.mxu1 (!%p113_p2), %v2961_v6  ;;  %v2977_v17 = vld [vmem:[%s4259_s1 + $0x444] ss:$8 sps:$4 sm:$0xff] (!%p113_p2)   ;;  %v2979_v18 = vld [vmem:[%s4259_s1 + $0x40] ss:$8 sps:$4 sm:$0xff] (!%p113_p2)   ;;  %v2981_v20 = vld [vmem:[%s4259_s1 + $0x54] ss:$8 sps:$4 sm:$0xff] (!%p113_p2)  }
   0xc   : > { %2361 = vmatpush1.bf16.msra.mxu0 (!%p113_p2), %v2962_v7  ;;  %2198 = vmatprep.subr.bf16.mxu1 (!%p113_p2), %v2963_v8  ;;  %v2980_v19 = vld [vmem:[%s4259_s1 + $0x440] ss:$8 sps:$4 sm:$0xff] (!%p113_p2)   ;;  %v2983_v21 = vld [vmem:[%s4259_s1 + $0x454] ss:$8 sps:$4 sm:$0xff] (!%p113_p2)   ;;  %v2985_v22 = vld [vmem:[%s4259_s1 + $0x50] ss:$8 sps:$4 sm:$0xff] (!%p113_p2)  }
   0xd   : > { %2362 = vmatprep.subr.bf16.mxu0 %v2965_v9  ;;  %v2986_v23 = vld [vmem:[%s4259_s1 + $0x450] ss:$8 sps:$4 sm:$0xff]   ;;  %v2987_v24 = vld [vmem:[%s4259_s1 + $0x64] ss:$8 sps:$4 sm:$0xff]   ;;  %v2991_v26 = vld [vmem:[%s4259_s1 + $0x60] ss:$8 sps:$4 sm:$0xff]  }
   0xe   : > { %v2989_v25 = vld [vmem:[%s4259_s1 + $0x464] ss:$8 sps:$4 sm:$0xff]   ;;  %v2992_v27 = vld [vmem:[%s4259_s1 + $0x460] ss:$8 sps:$4 sm:$0xff]   ;;  %v2993_v28 = vld [vmem:[%s4259_s1 + $0x74] ss:$8 sps:$4 sm:$0xff]  }
   0xf   : > { %2199 = vmatpush1.bf16.msra.mxu1 %v2967_v10  ;;  %v2995_v29 = vld [vmem:[%s4259_s1 + $0x474] ss:$8 sps:$4 sm:$0xff]   ;;  %v2997_v30 = vld [vmem:[%s4259_s1 + $0x70] ss:$8 sps:$4 sm:$0xff]   ;;  %v2999_v32 = vld [vmem:[%s4259_s1 + $0x84] ss:$8 sps:$4 sm:$0xff]  }
  0x10   : > { %2363 = vmatpush1.bf16.msra.mxu0 %v2968_v11  ;;  %2200 = vmatprep.subr.bf16.mxu1 %v2969_v12  ;;  %v2998_v31 = vld [vmem:[%s4259_s1 + $0x470] ss:$8 sps:$4 sm:$0xff]   ;;  %v3001_v33 = vld [vmem:[%s4259_s1 + $0x484] ss:$8 sps:$4 sm:$0xff]   ;;  %v3003_v34 = vld [vmem:[%s4259_s1 + $0x80] ss:$8 sps:$4 sm:$0xff]  }
  0x11   : > { %2364 = vmatprep.subr.bf16.mxu0 %v2971_v13  ;;  %v3004_v35 = vld [vmem:[%s4259_s1 + $0x480] ss:$8 sps:$4 sm:$0xff]   ;;  %v3005_v37 = vld [vmem:[%s4259_s1 + $0x94] ss:$8 sps:$4 sm:$0xff]   ;;  %s4262_s10 = smov (!%p134_p3, %s2640_s10), 1  ;;  %v155_v42 = vshrl.u32 %v154_v36, 7 }
  0x12   : > { %v3358_v38 = vmov 1983009808   ;;  %v3007_v40 = vld [vmem:[%s4259_s1 + $0x494] ss:$8 sps:$4 sm:$0xff]   ;;  %v3009_v41 = vld [vmem:[%s4259_s1 + $0x90] ss:$8 sps:$4 sm:$0xff]  }
  0x13   : > { %2201 = vmatpush1.bf16.msra.mxu1 %v2973_v14  ;;  %v152_v39 = vunpack.c.l.s4 %v3358_v38  ;;  %v3010_v43 = vld [vmem:[%s4259_s1 + $0x490] ss:$8 sps:$4 sm:$0xff]   ;;  %v3011_v44 = vld [vmem:[%s4259_s1 + $0xa4] ss:$8 sps:$4 sm:$0xff]   ;;  %s2941_s15 = smul.u32 24, %s4262_s10  ;;  %vm2522_vm0 = vcmask 1043456  }
  0x14   : > { %2365 = vmatpush1.bf16.msra.mxu0 %v2974_v15  ;;  %2202 = vmatprep.subr.bf16.mxu1 %v2975_v16  ;;  %v3013_v46 = vld [vmem:[%s4259_s1 + $0x4a4] ss:$8 sps:$4 sm:$0xff]   ;;  %v3015_v47 = vld [vmem:[%s4259_s1 + $0xa0] ss:$8 sps:$4 sm:$0xff]   ;;  %v3017_v49 = vld [vmem:[%s4259_s1 + $0xb4] ss:$8 sps:$4 sm:$0xff]  }
  0x15   : > { %2366 = vmatprep.subr.bf16.mxu0 %v2977_v17  ;;  %v153_v45 = vunpack.c.0.s8 %v152_v39  ;;  %v3016_v48 = vld [vmem:[%s4259_s1 + $0x4a0] ss:$8 sps:$4 sm:$0xff]   ;;  %s3527_s26 = scalar_lea.vmem %s4258_s0, %s2941_s15  ;;  %v3019_v51 = vld [vmem:[%s4259_s1 + $0x4b4] ss:$8 sps:$4 sm:$0xff]   ;;  %v3021_v52 = vld [vmem:[%s4259_s1 + $0xb0] ss:$8 sps:$4 sm:$0xff]  }
  0x16   : > { %v3022_v53 = vld [vmem:[%s4259_s1 + $0x4b0] ss:$8 sps:$4 sm:$0xff]   ;;  %v144_v54 = vld [vmem:[%s3527_s26] sm:$0x55]  ;;  %v2650_v57 = vld [vmem:[%s3527_s26 + $0x8] sm:$0x55] }
  0x17   : > { %2203 = vmatpush1.bf16.msra.mxu1 %v2979_v18  ;;  %v3529_v50 = vsub.s32 %v153_v45, %v155_v42  ;;  %v150_v55 = vcombine.high %v144_v54, %v144_v54  ;;  %v3023_v58 = vld [vmem:[%s4259_s1 + $0xc4] ss:$8 sps:$4 sm:$0xff]   ;;  %v359_v60 = vcombine.high %v2650_v57, %v2650_v57  ;;  %v2652_v2 = vld [vmem:[%s3527_s26 + $0x10] sm:$0x55]  ;;  %v3027_v7 = vld [vmem:[%s4259_s1 + $0xc0] ss:$8 sps:$4 sm:$0xff]  }
  0x18   : > { %2367 = vmatpush1.bf16.msra.mxu0 %v2980_v19  ;;  %2204 = vmatprep.subr.bf16.mxu1 %v2981_v20  ;;  %v3025_v59 = vld [vmem:[%s4259_s1 + $0x4c4] ss:$8 sps:$4 sm:$0xff]   ;;  %v423_v6 = vcombine.high %v2652_v2, %v2652_v2  ;;  %v3028_v8 = vld [vmem:[%s4259_s1 + $0x4c0] ss:$8 sps:$4 sm:$0xff]   ;;  %v3029_v13 = vld [vmem:[%s4259_s1 + $0xd4] ss:$8 sps:$4 sm:$0xff]  }
  0x19   : > { %2368 = vmatprep.subr.bf16.mxu0 %v2983_v21  ;;  %v157_v56 = vrot.slane %v144_v54, %v3529_v50  ;;  %v366_v61 = vrot.slane %v2650_v57, %v3529_v50  ;;  %v2648_v62 = vld [vmem:[%s3527_s26 + $0x8] sm:$0x55]  ;;  %v164_v63 = vrot.slane %v150_v55, %v3529_v50  ;;  %v373_v3 = vrot.slane %v359_v60, %v3529_v50  ;;  %v3031_v17 = vld [vmem:[%s4259_s1 + $0x4d4] ss:$8 sps:$4 sm:$0xff]  }
  0x1a   : > { %v214_v1 = vcombine.high %v2648_v62, %v2648_v62  ;;  %v221_v5 = vrot.slane %v2648_v62, %v3529_v50  ;;  %v430_v12 = vrot.slane %v2652_v2, %v3529_v50  ;;  %v3058_v54 = vld [vmem:[%s4259_s1 + $0x504] ss:$8 sps:$4 sm:$0xff]   ;;  %v3061_v62 = vld [vmem:[%s4259_s1 + $0x114] ss:$8 sps:$4 sm:$0xff]  }
  0x1b   : > { %2205 = vmatpush1.bf16.msra.mxu1 %v2985_v22  ;;  %v165_v0 = vcombine.high %v157_v56, %v157_v56  ;;  %v374_v4 = vcombine.high %v366_v61, %v366_v61  ;;  %v166_v9 = vcombine.high %v164_v63, %v164_v63  ;;  %v375_v14 = vcombine.high %v373_v3, %v373_v3 }
  0x1c   : > { %2369 = vmatpush1.bf16.msra.mxu0 %v2986_v23  ;;  %2206 = vmatprep.subr.bf16.mxu1 %v2987_v24  ;;  %v228_v11 = vrot.slane %v214_v1, %v3529_v50  ;;  %v229_v16 = vcombine.high %v221_v5, %v221_v5  ;;  %v437_v24 = vrot.slane %v423_v6, %v3529_v50  ;;  %v3064_v6 = vld [vmem:[%s4259_s1 + $0x514] ss:$8 sps:$4 sm:$0xff]  }
  0x1d   : > { %2370 = vmatprep.subr.bf16.mxu0 %v2989_v25  ;;  %v277_v10 = vcombine.low %v157_v56, %v165_v0  ;;  %v486_v15 = vcombine.low %v366_v61, %v374_v4  ;;  %v278_v18 = vcombine.low %v164_v63, %v166_v9  ;;  %v487_v21 = vcombine.low %v373_v3, %v375_v14  ;;  %v3033_v25 = vld [vmem:[%s4259_s1 + $0xd0] ss:$8 sps:$4 sm:$0xff]   ;;  %v3056_v3 = vld [vmem:[%s4259_s1 + $0x500] ss:$8 sps:$4 sm:$0xff]  }
  0x1e   : > { %v230_v20 = vcombine.high %v228_v11, %v228_v11  ;;  %v311_v23 = vcombine.low %v221_v5, %v229_v16  ;;  %v3059_v4 = vld [vmem:[%s4259_s1 + $0x110] ss:$8 sps:$4 sm:$0xff]   ;;  %v3079_v16 = vld [vmem:[%s4259_s1 + $0x144] ss:$8 sps:$4 sm:$0xff]  }
  0x1f   : > { %2207 = vmatpush1.bf16.msra.mxu1 %v2991_v26  ;;  %v285_v19 = vrot.slane %v277_v10, %v3529_v50  ;;  %v494_v22 = vrot.slane %v486_v15, %v3529_v50  ;;  %v3034_v26 = vld [vmem:[%s4259_s1 + $0x4d0] ss:$8 sps:$4 sm:$0xff]   ;;  %v3065_v10 = vld [vmem:[%s4259_s1 + $0x120] ss:$8 sps:$4 sm:$0xff]   ;;  %v3076_v15 = vld [vmem:[%s4259_s1 + $0x534] ss:$8 sps:$4 sm:$0xff]  }
  0x20   : > { %2371 = vmatpush1.bf16.msra.mxu0 %v2992_v27  ;;  %2208 = vmatprep.subr.bf16.mxu1 %v2993_v28  ;;  %v292_v27 = vrot.slane %v278_v18, %v3529_v50  ;;  %v312_v28 = vcombine.low %v228_v11, %v230_v20  ;;  %v3062_v9 = vld [vmem:[%s4259_s1 + $0x510] ss:$8 sps:$4 sm:$0xff]   ;;  %v3070_v11 = vld [vmem:[%s4259_s1 + $0x524] ss:$8 sps:$4 sm:$0xff]   ;;  %v3077_v18 = vld [vmem:[%s4259_s1 + $0x140] ss:$8 sps:$4 sm:$0xff]  }
  0x21   : > { %2372 = vmatprep.subr.bf16.mxu0 %v2995_v29  ;;  %v438_v29 = vcombine.high %v430_v12, %v430_v12  ;;  %v3071_v14 = vld [vmem:[%s4259_s1 + $0x130] ss:$8 sps:$4 sm:$0xff]   ;;  %v3085_v20 = vld [vmem:[%s4259_s1 + $0x154] ss:$8 sps:$4 sm:$0xff]  }
  0x22   : > { %v326_v36 = vrot.slane %v312_v28, %v3529_v50  ;;  %v3097_v28 = vld [vmem:[%s4259_s1 + $0x174] ss:$8 sps:$4 sm:$0xff]  }
  0x23   : > { %2209 = vmatpush1.bf16.msra.mxu1 %v2997_v30  ;;  %v3035_v30 = vld [vmem:[%s4259_s1 + $0xe4] ss:$8 sps:$4 sm:$0xff]  }
  0x24   : > { %2373 = vmatpush1.bf16.msra.mxu0 %v2998_v31  ;;  %2210 = vmatprep.subr.bf16.mxu1 %v2999_v32  ;;  %v501_v31 = vrot.slane %v487_v21, %v3529_v50  ;;  %v319_v32 = vrot.slane %v311_v23, %v3529_v50  ;;  %v3080_v21 = vld [vmem:[%s4259_s1 + $0x540] ss:$8 sps:$4 sm:$0xff]   ;;  %v3088_v23 = vld [vmem:[%s4259_s1 + $0x554] ss:$8 sps:$4 sm:$0xff]  }
  0x25   : > { %2374 = vmatprep.subr.bf16.mxu0 %v3001_v33  ;;  %v439_v33 = vcombine.high %v437_v24, %v437_v24 }
  0x26   : > { %v502_v38 = vcombine.low %v494_v22, %v501_v31  ;;  %v327_v42 = vcombine.low %v319_v32, %v326_v36  ;;  %v3083_v22 = vld [vmem:[%s4259_s1 + $0x150] ss:$8 sps:$4 sm:$0xff]   ;;  %v3100_v31 = vld [vmem:[%s4259_s1 + $0x574] ss:$8 sps:$4 sm:$0xff]   ;;  %v3103_v32 = vld [vmem:[%s4259_s1 + $0x184] ss:$8 sps:$4 sm:$0xff]  }
  0x27   : > { %2211 = vmatpush1.bf16.msra.mxu1 %v3003_v34  ;;  %v3037_v34 = vld [vmem:[%s4259_s1 + $0x4e4] ss:$8 sps:$4 sm:$0xff]   ;;  %v521_v39 = vcombine.low %v437_v24, %v439_v33  ;;  %v3098_v33 = vld [vmem:[%s4259_s1 + $0x570] ss:$8 sps:$4 sm:$0xff]   ;;  %v3109_v36 = vld [vmem:[%s4259_s1 + $0x194] ss:$8 sps:$4 sm:$0xff]  }
  0x28   : > { %2375 = vmatpush1.bf16.msra.mxu0 %v3004_v35  ;;  %2212 = vmatprep.subr.bf16.mxu1 %v3005_v37  ;;  %v293_v35 = vcombine.low %v285_v19, %v292_v27  ;;  %v520_v37 = vcombine.low %v430_v12, %v438_v29  ;;  %v554_v45 = vrot.slane %v502_v38, 7  ;;  %351 = vst [vmem:[#allocation2 + $0x10] sm:$0x55] %v327_v42  ;;  %v3073_v12 = vld [vmem:[%s4259_s1 + $0x134] ss:$8 sps:$4 sm:$0xff]  }
  0x29   : > { %2376 = vmatprep.subr.bf16.mxu0 %v3007_v40  ;;  %v3039_v40 = vld [vmem:[%s4259_s1 + $0xe0] ss:$8 sps:$4 sm:$0xff]   ;;  %v3082_v19 = vld [vmem:[%s4259_s1 + $0x544] ss:$8 sps:$4 sm:$0xff]   ;;  %v3107_v38 = vld [vmem:[%s4259_s1 + $0x190] ss:$8 sps:$4 sm:$0xff]  }
  0x2a   : > { %349 = vst [vmem:[#allocation2] sm:$0x55] %v293_v35  ;;  %562 = vst [vmem:[#allocation2] sm:$0xaa] %v554_v45  ;;  %v3091_v24 = vld [vmem:[%s4259_s1 + $0x164] ss:$8 sps:$4 sm:$0xff]  }
  0x2b   : > { %2213 = vmatpush1.bf16.msra.mxu1 %v3009_v41  ;;  %v3040_v41 = vld [vmem:[%s4259_s1 + $0x4e0] ss:$8 sps:$4 sm:$0xff]   ;;  %v3094_v27 = vld [vmem:[%s4259_s1 + $0x564] ss:$8 sps:$4 sm:$0xff]  }
  0x2c   : > { %2377 = vmatpush1.bf16.msra.mxu0 %v3010_v43  ;;  %2214 = vmatprep.subr.bf16.mxu1 %v3011_v44  ;;  %v528_v43 = vrot.slane %v520_v37, %v3529_v50  ;;  %v3041_v44 = vld [vmem:[%s4259_s1 + $0xf4] ss:$8 sps:$4 sm:$0xff]   ;;  %v3092_v29 = vld [vmem:[%s4259_s1 + $0x560] ss:$8 sps:$4 sm:$0xff]   ;;  %v3106_v35 = vld [vmem:[%s4259_s1 + $0x584] ss:$8 sps:$4 sm:$0xff]  }
  0x2d   : > { %2378 = vmatprep.subr.bf16.mxu0 %v3013_v46  ;;  %v535_v46 = vrot.slane %v521_v39, %v3529_v50  ;;  %v3104_v37 = vld [vmem:[%s4259_s1 + $0x580] ss:$8 sps:$4 sm:$0xff]   ;;  %v3112_v39 = vld [vmem:[%s4259_s1 + $0x594] ss:$8 sps:$4 sm:$0xff]  }
  0x2e   : > { %v3113_v42 = vld [vmem:[%s4259_s1 + $0x1a0] ss:$8 sps:$4 sm:$0xff]  }
  0x2f   : > { %2215 = vmatpush1.bf16.msra.mxu1 %v3015_v47  ;;  %v3043_v47 = vld [vmem:[%s4259_s1 + $0x4f4] ss:$8 sps:$4 sm:$0xff]   ;;  %v3116_v45 = vld [vmem:[%s4259_s1 + $0x5a0] ss:$8 sps:$4 sm:$0xff]  }
  0x30   : > { %2379 = vmatpush1.bf16.msra.mxu0 %v3016_v48  ;;  %2216 = vmatprep.subr.bf16.mxu1 %v3017_v49  ;;  %v536_v48 = vcombine.low %v528_v43, %v535_v46  ;;  %v3045_v49 = vld [vmem:[%s4259_s1 + $0xf0] ss:$8 sps:$4 sm:$0xff]   ;;  %v3118_v43 = vld [vmem:[%s4259_s1 + $0x5a4] ss:$8 sps:$4 sm:$0xff]  }
  0x31   : > { %2380 = vmatprep.subr.bf16.mxu0 %v3019_v51  ;;  %v3046_v51 = vld [vmem:[%s4259_s1 + $0x4f0] ss:$8 sps:$4 sm:$0xff]   ;;  %v566_v55 = vld [vmem:[#allocation2] sm:$0xff] }
  0x32   : > { %v830_v56 = vcombine.high %v566_v55, %v566_v55  ;;  %v837_v57 = vrot.slane %v566_v55, %v3529_v50  ;;  %v3119_v46 = vld [vmem:[%s4259_s1 + $0x1b0] ss:$8 sps:$4 sm:$0xff]  }
  0x33   : > { %2217 = vmatpush1.bf16.msra.mxu1 %v3021_v52  ;;  %v3052_v52 = vld [vmem:[%s4259_s1 + $0x104] ss:$8 sps:$4 sm:$0xff]   ;;  %v3131_v55 = vld [vmem:[%s4259_s1 + $0x1d0] ss:$8 sps:$4 sm:$0xff]  }
  0x34   : > { %2381 = vmatpush1.bf16.msra.mxu0 %v3022_v53  ;;  %2218 = vmatprep.subr.bf16.mxu1 %v3023_v58  ;;  %v556_v53 = vrot.slane %v536_v48, 7  ;;  %v845_v58 = vcombine.high %v837_v57, %v837_v57  ;;  %v3619_v60 = vrot.slane %v830_v56, %v3529_v50  ;;  %v3127_v48 = vld [vmem:[%s4259_s1 + $0x1c4] ss:$8 sps:$4 sm:$0xff]   ;;  %v3136_v56 = vld [vmem:[%s4259_s1 + $0x5d4] ss:$8 sps:$4 sm:$0xff]  }
  0x35   : > { %2382 = vmatprep.subr.bf16.mxu0 %v3025_v59  ;;  %v3050_v59 = vld [vmem:[%s4259_s1 + $0x100] ss:$8 sps:$4 sm:$0xff]  }
  0x36   : > { %564 = vst [vmem:[#allocation2 + $0x10] sm:$0xaa] %v556_v53  ;;  %2226 = vmatprep.mubr.bf16.mxu1 %v845_v58  ;;  %v846_v1 = vcombine.high %v3619_v60, %v3619_v60  ;;  %v3133_v53 = vld [vmem:[%s4259_s1 + $0x1d4] ss:$8 sps:$4 sm:$0xff]   ;;  %v3134_v58 = vld [vmem:[%s4259_s1 + $0x5d0] ss:$8 sps:$4 sm:$0xff]  }
  0x37   : > { %2219 = vmatpush1.bf16.msra.mxu1 %v3027_v7  ;;  %v3067_v7 = vld [vmem:[%s4259_s1 + $0x124] ss:$8 sps:$4 sm:$0xff]  }
  0x38   : > { %2383 = vmatpush1.bf16.msra.mxu0 %v3028_v8  ;;  %2220 = vmatprep.subr.bf16.mxu1 %v3029_v13  ;;  %v3068_v13 = vld [vmem:[%s4259_s1 + $0x520] ss:$8 sps:$4 sm:$0xff]  }
  0x39   : > { %2384 = vmatprep.subr.bf16.mxu0 %v3031_v17  ;;  %v3074_v17 = vld [vmem:[%s4259_s1 + $0x530] ss:$8 sps:$4 sm:$0xff]  }
  0x3b   : > { %2221 = vmatpush1.bf16.msra.mxu1 %v3033_v25  ;;  %v3086_v25 = vld [vmem:[%s4259_s1 + $0x550] ss:$8 sps:$4 sm:$0xff]  }
  0x3c   : > { %2385 = vmatpush1.bf16.msra.mxu0 %v3034_v26  ;;  %2222 = vmatprep.subr.bf16.mxu1 %v3035_v30  ;;  %v3089_v26 = vld [vmem:[%s4259_s1 + $0x160] ss:$8 sps:$4 sm:$0xff]   ;;  %v3095_v30 = vld [vmem:[%s4259_s1 + $0x170] ss:$8 sps:$4 sm:$0xff]  }
  0x3d   : > { %2386 = vmatprep.subr.bf16.mxu0 %v3037_v34  ;;  %v568_v61 = vld [vmem:[#allocation2 + $0x10] sm:$0xff]  ;;  %v3101_v34 = vld [vmem:[%s4259_s1 + $0x180] ss:$8 sps:$4 sm:$0xff]  }
  0x3e   : > { %v864_v63 = vcombine.high %v568_v61, %v568_v61  ;;  %v871_v0 = vrot.slane %v568_v61, %v3529_v50  ;;  %v3142_v61 = vld [vmem:[%s4259_s1 + $0x5e4] ss:$8 sps:$4 sm:$0xff]  }
  0x3f   : > { %2223 = vmatpush1.bf16.msra.mxu1 %v3039_v40  ;;  %v3115_v40 = vld [vmem:[%s4259_s1 + $0x1a4] ss:$8 sps:$4 sm:$0xff]  }
  0x40   : > { %2387 = vmatpush1.bf16.msra.mxu0 %v3040_v41  ;;  %2224 = vmatprep.subr.bf16.mxu1 %v3041_v44  ;;  %v879_v2 = vcombine.high %v871_v0, %v871_v0  ;;  %v3634_v5 = vrot.slane %v864_v63, %v3529_v50  ;;  %v3110_v41 = vld [vmem:[%s4259_s1 + $0x590] ss:$8 sps:$4 sm:$0xff]   ;;  %v3121_v44 = vld [vmem:[%s4259_s1 + $0x1b4] ss:$8 sps:$4 sm:$0xff]   ;;  %v3140_v63 = vld [vmem:[%s4259_s1 + $0x5e0] ss:$8 sps:$4 sm:$0xff]  }
  0x41   : > { %2388 = vmatprep.subr.bf16.mxu0 %v3043_v47  ;;  %v3124_v47 = vld [vmem:[%s4259_s1 + $0x5b4] ss:$8 sps:$4 sm:$0xff]  }
  0x42   : > { %2390 = vmatprep.mubr.bf16.mxu0 %v879_v2  ;;  %v880_v8 = vcombine.high %v3634_v5, %v3634_v5  ;;  %v3151_v2 = vld [vmem:[%s4259_s1 + $0x204] ss:$8 sps:$4 sm:$0xff]  }
  0x43   : > { %2225 = vmatpush1.bf16.msra.mxu1 %v3045_v49  ;;  %v3122_v49 = vld [vmem:[%s4259_s1 + $0x5b0] ss:$8 sps:$4 sm:$0xff]  }
  0x44   : > { %2389 = vmatpush1.bf16.msra.mxu0 %v3046_v51  ;;  %2235 = vmatprep.subr.bf16.mxu1 %v3052_v52  ;;  %v3125_v51 = vld [vmem:[%s4259_s1 + $0x1c0] ss:$8 sps:$4 sm:$0xff]   ;;  %v3130_v52 = vld [vmem:[%s4259_s1 + $0x5c4] ss:$8 sps:$4 sm:$0xff]  }
  0x45   : > { %2399 = vmatprep.subr.bf16.mxu0 %v3058_v54  ;;  %v3128_v54 = vld [vmem:[%s4259_s1 + $0x5c0] ss:$8 sps:$4 sm:$0xff]  }
  0x46   : > { %2227 = vmatmul.mubr.bf16.vlgmr.msra.gmra.mrb[0].mxu1 %v837_v57  ;;  %v3139_v57 = vld [vmem:[%s4259_s1 + $0x1e4] ss:$8 sps:$4 sm:$0xff]  }
  0x47   : > { %2236 = vmatpush1.bf16.msra.mxu1 %v3050_v59  ;;  %2267 = vmatprep.mubr.bf16.mxu1 %v846_v1  ;;  %v3137_v59 = vld [vmem:[%s4259_s1 + $0x1e0] ss:$8 sps:$4 sm:$0xff]   ;;  %v3148_v1 = vld [vmem:[%s4259_s1 + $0x5f4] ss:$8 sps:$4 sm:$0xff]  }
  0x48   : > { %2237 = vmatprep.subr.bf16.mxu1 %v3061_v62  ;;  %2391 = vmatmul.mubr.bf16.vlgmr.msra.gmra.mrb[0].mxu0 %v871_v0  ;;  %v3145_v62 = vld [vmem:[%s4259_s1 + $0x1f4] ss:$8 sps:$4 sm:$0xff]   ;;  %v3143_v0 = vld [vmem:[%s4259_s1 + $0x1f0] ss:$8 sps:$4 sm:$0xff]  }
  0x49   : > { %2400 = vmatpush1.bf16.msra.mxu0 %v3056_v3  ;;  %2431 = vmatprep.mubr.bf16.mxu0 %v880_v8  ;;  %v145_v3 = vld [vmem:[%s3527_s26] sm:$0xff] }
  0x4a   : > { %2401 = vmatprep.subr.bf16.mxu0 %v3064_v6  ;;  %v3146_v6 = vld [vmem:[%s4259_s1 + $0x5f0] ss:$8 sps:$4 sm:$0xff]   ;;  %v175_v8 = vrot.slane %v145_v3, %v3529_v50 }
  0x4b   : > { %2238 = vmatpush1.bf16.msra.mxu1 %v3059_v4  ;;  %v2651_v4 = vld [vmem:[%s3527_s26 + $0x8] sm:$0xff] }
  0x4c   : > { %2239 = vmatprep.subr.bf16.mxu1 %v3067_v7  ;;  %v168_v7 = vcombine.high %v145_v3, %v145_v3 }
  0x4d   : > { %2402 = vmatpush1.bf16.msra.mxu0 %v3062_v9  ;;  %v377_v9 = vcombine.high %v2651_v4, %v2651_v4 }
  0x4e   : > { %2403 = vmatprep.subr.bf16.mxu0 %v3070_v11  ;;  %v3149_v11 = vld [vmem:[%s4259_s1 + $0x200] ss:$8 sps:$4 sm:$0xff]  }
  0x4f   : > { %2240 = vmatpush1.bf16.msra.mxu1 %v3065_v10  ;;  %v384_v10 = vrot.slane %v2651_v4, %v3529_v50  ;;  %v3172_v4 = vld [vmem:[%s4259_s1 + $0x634] ss:$8 sps:$4 sm:$0xff]  }
  0x50   : > { %2241 = vmatprep.subr.bf16.mxu1 %v3073_v12  ;;  %v3154_v12 = vld [vmem:[%s4259_s1 + $0x604] ss:$8 sps:$4 sm:$0xff]  }
  0x51   : > { %2404 = vmatpush1.bf16.msra.mxu0 %v3068_v13  ;;  %v3157_v13 = vld [vmem:[%s4259_s1 + $0x214] ss:$8 sps:$4 sm:$0xff]  }
  0x52   : > { %2405 = vmatprep.subr.bf16.mxu0 %v3076_v15  ;;  %v183_v15 = vcombine.high %v175_v8, %v175_v8 }
  0x53   : > { %2242 = vmatpush1.bf16.msra.mxu1 %v3071_v14  ;;  %v182_v14 = vrot.slane %v168_v7, %v3529_v50 }
  0x54   : > { %2243 = vmatprep.subr.bf16.mxu1 %v3079_v16  ;;  %v186_v16 = vshrl.u32 %v175_v8, 16 }
  0x55   : > { %2406 = vmatpush1.bf16.msra.mxu0 %v3074_v17  ;;  %v188_v17 = vshll.u32 %v175_v8, 16 }
  0x56   : > { %2407 = vmatprep.subr.bf16.mxu0 %v3082_v19  ;;  %v391_v19 = vrot.slane %v377_v9, %v3529_v50  ;;  %v3175_v9 = vld [vmem:[%s4259_s1 + $0x244] ss:$8 sps:$4 sm:$0xff]  }
  0x57   : > { %2244 = vmatpush1.bf16.msra.mxu1 %v3077_v18  ;;  %v3152_v18 = vld [vmem:[%s4259_s1 + $0x600] ss:$8 sps:$4 sm:$0xff]  }
  0x58   : > { %2245 = vmatprep.subr.bf16.mxu1 %v3085_v20  ;;  %v392_v20 = vcombine.high %v384_v10, %v384_v10 }
  0x59   : > { %2408 = vmatpush1.bf16.msra.mxu0 %v3080_v21  ;;  %v395_v21 = vshrl.u32 %v384_v10, 16 }
  0x5a   : > { %2409 = vmatprep.subr.bf16.mxu0 %v3088_v23  ;;  %v3155_v23 = vld [vmem:[%s4259_s1 + $0x210] ss:$8 sps:$4 sm:$0xff]  }
  0x5b   : > { %2246 = vmatpush1.bf16.msra.mxu1 %v3083_v22  ;;  %v397_v22 = vshll.u32 %v384_v10, 16 }
  0x5c   : > { %2247 = vmatprep.subr.bf16.mxu1 %v3091_v24  ;;  %v184_v24 = vcombine.high %v182_v14, %v182_v14 }
  0x5d   : > { %2410 = vmatpush1.bf16.msra.mxu0 %v3086_v25  ;;  %v190_v25 = vrot.slane %v188_v17, 1 }
  0x5e   : > { %2411 = vmatprep.subr.bf16.mxu0 %v3094_v27  ;;  %v195_v27 = vshll.u32 %v183_v15, 16 }
  0x5f   : > { %2248 = vmatpush1.bf16.msra.mxu1 %v3089_v26  ;;  %v193_v26 = vshrl.u32 %v183_v15, 16 }
  0x60   : > { %2249 = vmatprep.subr.bf16.mxu1 %v3097_v28  ;;  %v3160_v28 = vld [vmem:[%s4259_s1 + $0x614] ss:$8 sps:$4 sm:$0xff]  }
  0x61   : > { %2412 = vmatpush1.bf16.msra.mxu0 %v3092_v29  ;;  %v200_v29 = vshrl.u32 %v182_v14, 16 }
  0x62   : > { %2413 = vmatprep.subr.bf16.mxu0 %v3100_v31  ;;  %v393_v31 = vcombine.high %v391_v19, %v391_v19 }
  0x63   : > { %2250 = vmatpush1.bf16.msra.mxu1 %v3095_v30  ;;  %v202_v30 = vshll.u32 %v182_v14, 16  ;;  %v3170_v14 = vld [vmem:[%s4259_s1 + $0x630] ss:$8 sps:$4 sm:$0xff]  }
  0x64   : > { %2251 = vmatprep.subr.bf16.mxu1 %v3103_v32  ;;  %v399_v32 = vrot.slane %v397_v22, 1 }
  0x65   : > { %2414 = vmatpush1.bf16.msra.mxu0 %v3098_v33  ;;  %v191_v33 = vor.u32 %v190_v25, %v186_v16 }
  0x66   : > { %2415 = vmatprep.subr.bf16.mxu0 %v3106_v35  ;;  %v207_v35 = vshrl.u32 %v184_v24, 16 }
  0x67   : > { %2252 = vmatpush1.bf16.msra.mxu1 %v3101_v34  ;;  %v197_v34 = vrot.slane %v195_v27, 1 }
  0x68   : > { %2253 = vmatprep.subr.bf16.mxu1 %v3109_v36  ;;  %v209_v36 = vshll.u32 %v184_v24, 16 }
  0x69   : > { %2416 = vmatpush1.bf16.msra.mxu0 %v3104_v37  ;;  %v3158_v37 = vld [vmem:[%s4259_s1 + $0x610] ss:$8 sps:$4 sm:$0xff]  }
  0x6a   : > { %2417 = vmatprep.subr.bf16.mxu0 %v3112_v39  ;;  %v400_v39 = vor.u32 %v399_v32, %v395_v21 }
  0x6b   : > { %2254 = vmatpush1.bf16.msra.mxu1 %v3107_v38  ;;  %v204_v38 = vrot.slane %v202_v30, 1 }
  0x6c   : > { %2255 = vmatprep.subr.bf16.mxu1 %v3115_v40  ;;  %v402_v40 = vshrl.u32 %v392_v20, 16 }
  0x6d   : > { %2418 = vmatpush1.bf16.msra.mxu0 %v3110_v41  ;;  %v404_v41 = vshll.u32 %v392_v20, 16 }
  0x6e   : > { %2419 = vmatprep.subr.bf16.mxu0 %v3118_v43  ;;  %v3161_v43 = vld [vmem:[%s4259_s1 + $0x220] ss:$8 sps:$4 sm:$0xff]  }
  0x6f   : > { %2256 = vmatpush1.bf16.msra.mxu1 %v3113_v42  ;;  %v2653_v42 = vld [vmem:[%s3527_s26 + $0x10] sm:$0xff]  ;;  %s2914_s26 = sshll.u32 %s4262_s10, 2 }
  0x70   : > { %2257 = vmatprep.subr.bf16.mxu1 %v3121_v44  ;;  %v198_v44 = vor.u32 %v197_v34, %v193_v26  ;;  %s143_s16 = scalar_lea.vmem %s4260_s2, %s2914_s26 }
  0x71   : > { %2420 = vmatpush1.bf16.msra.mxu0 %v3116_v45  ;;  %v211_v45 = vrot.slane %v209_v36, 1  ;;  %v3179_v36 = vld [vmem:[%s4259_s1 + $0x250] ss:$8 sps:$4 sm:$0xff]  }
  0x72   : > { %2421 = vmatprep.subr.bf16.mxu0 %v3124_v47  ;;  %v411_v47 = vshll.u32 %v391_v19, 16 }
  0x73   : > { %2258 = vmatpush1.bf16.msra.mxu1 %v3119_v46  ;;  %v409_v46 = vshrl.u32 %v391_v19, 16 }
  0x74   : > { %2259 = vmatprep.subr.bf16.mxu1 %v3127_v48  ;;  %v3166_v48 = vld [vmem:[%s4259_s1 + $0x624] ss:$8 sps:$4 sm:$0xff]  }
  0x75   : > { %2422 = vmatpush1.bf16.msra.mxu0 %v3122_v49  ;;  %v205_v49 = vor.u32 %v204_v38, %v200_v29  ;;  %v3181_v29 = vld [vmem:[%s4259_s1 + $0x254] ss:$8 sps:$4 sm:$0xff]  }
  0x76   : > { %2423 = vmatprep.subr.bf16.mxu0 %v3130_v52  ;;  %v416_v52 = vshrl.u32 %v393_v31, 16 }
  0x77   : > { %2260 = vmatpush1.bf16.msra.mxu1 %v3125_v51  ;;  %v406_v51 = vrot.slane %v404_v41, 1  ;;  %v3187_v41 = vld [vmem:[%s4259_s1 + $0x264] ss:$8 sps:$4 sm:$0xff]  }
  0x78   : > { %2261 = vmatprep.subr.bf16.mxu1 %v3133_v53  ;;  %v418_v53 = vshll.u32 %v393_v31, 16 }
  0x79   : > { %2424 = vmatpush1.bf16.msra.mxu0 %v3128_v54  ;;  %v212_v54 = vor.u32 %v211_v45, %v207_v35  ;;  %v3176_v35 = vld [vmem:[%s4259_s1 + $0x640] ss:$8 sps:$4 sm:$0xff]  }
  0x7a   : > { %2425 = vmatprep.subr.bf16.mxu0 %v3136_v56  ;;  %v413_v56 = vrot.slane %v411_v47, 1  ;;  %v3185_v45 = vld [vmem:[%s4259_s1 + $0x260] ss:$8 sps:$4 sm:$0xff]   ;;  %v3190_v47 = vld [vmem:[%s4259_s1 + $0x664] ss:$8 sps:$4 sm:$0xff]  }
  0x7b   : > { %2262 = vmatpush1.bf16.msra.mxu1 %v3131_v55  ;;  %v294_v55 = vcombine.low %v191_v33, %v198_v44  ;;  %v3182_v44 = vld [vmem:[%s4259_s1 + $0x650] ss:$8 sps:$4 sm:$0xff]  }
  0x7c   : > { %2263 = vmatprep.subr.bf16.mxu1 %v3139_v57  ;;  %v441_v57 = vcombine.high %v2653_v42, %v2653_v42 }
  0x7d   : > { %2426 = vmatpush1.bf16.msra.mxu0 %v3134_v58  ;;  %v407_v58 = vor.u32 %v406_v51, %v402_v40  ;;  %v3184_v40 = vld [vmem:[%s4259_s1 + $0x654] ss:$8 sps:$4 sm:$0xff]   ;;  %v3188_v51 = vld [vmem:[%s4259_s1 + $0x660] ss:$8 sps:$4 sm:$0xff]  }
  0x7e   : > { %2427 = vmatprep.subr.bf16.mxu0 %v3142_v61  ;;  %v448_v61 = vrot.slane %v2653_v42, %v3529_v50  ;;  %v455_v3 = vrot.slane %v441_v57, %v3529_v50  ;;  %v3194_v57 = vld [vmem:[%s4259_s1 + $0x670] ss:$8 sps:$4 sm:$0xff]  }
  0x7f   : > { %2264 = vmatpush1.bf16.msra.mxu1 %v3137_v59  ;;  %v420_v59 = vrot.slane %v418_v53, 1  ;;  %v503_v7 = vcombine.low %v400_v39, %v407_v58  ;;  %v3196_v53 = vld [vmem:[%s4259_s1 + $0x674] ss:$8 sps:$4 sm:$0xff]   ;;  %v3197_v58 = vld [vmem:[%s4259_s1 + $0x280] ss:$8 sps:$4 sm:$0xff]  }
  0x80   : > { %2265 = vmatprep.subr.bf16.mxu1 %v3145_v62  ;;  %v3164_v62 = vld [vmem:[%s4259_s1 + $0x620] ss:$8 sps:$4 sm:$0xff]   ;;  %v456_v8 = vcombine.high %v448_v61, %v448_v61  ;;  %v473_v21 = vshrl.u32 %v455_v3, 16  ;;  %v475_v22 = vshll.u32 %v455_v3, 16 }
  0x81   : > { %2428 = vmatpush1.bf16.msra.mxu0 %v3140_v63  ;;  %v3167_v63 = vld [vmem:[%s4259_s1 + $0x230] ss:$8 sps:$4 sm:$0xff]   ;;  %v511_v16 = vrot.slane %v503_v7, %v3529_v50  ;;  %v3209_v7 = vld [vmem:[%s4259_s1 + $0x2a0] ss:$8 sps:$4 sm:$0xff]  }
  0x82   : > { %2429 = vmatprep.subr.bf16.mxu0 %v3148_v1  ;;  %v302_v1 = vrot.slane %v294_v55, %v3529_v50  ;;  %v466_v17 = vshrl.u32 %v456_v8, 16  ;;  %v477_v31 = vrot.slane %v475_v22, 1  ;;  %v3235_v22 = vld [vmem:[%s4259_s1 + $0x2e4] ss:$8 sps:$4 sm:$0xff]  }
  0x83   : > { %2266 = vmatpush1.bf16.msra.mxu1 %v3143_v0  ;;  %v295_v0 = vcombine.low %v205_v49, %v212_v54  ;;  %v3199_v54 = vld [vmem:[%s4259_s1 + $0x284] ss:$8 sps:$4 sm:$0xff]  }
  0x84   : > { %2276 = vmatprep.subr.bf16.mxu1 %v3151_v2  ;;  %v414_v2 = vor.u32 %v413_v56, %v409_v46  ;;  %v478_v34 = vor.u32 %v477_v31, %v473_v21  ;;  %v3232_v21 = vld [vmem:[%s4259_s1 + $0x6d4] ss:$8 sps:$4 sm:$0xff]   ;;  %v3249_v31 = vld [vmem:[%s4259_s1 + $0x304] ss:$8 sps:$4 sm:$0xff]  }
  0x85   : > { %2430 = vmatpush1.bf16.msra.mxu0 %v3146_v6  ;;  %v421_v6 = vor.u32 %v420_v59, %v416_v52  ;;  %v309_v10 = vrot.slane %v295_v0, %v3529_v50  ;;  %v3191_v52 = vld [vmem:[%s4259_s1 + $0x270] ss:$8 sps:$4 sm:$0xff]   ;;  %v3202_v59 = vld [vmem:[%s4259_s1 + $0x684] ss:$8 sps:$4 sm:$0xff]  }
  0x86   : > { %2268 = vmatmul.mubr.bf16.vlgmr.msra.gmra.mrb[0].mxu1 %v3619_v60  ;;  %2440 = vmatprep.subr.bf16.mxu0 %v3154_v12  ;;  %v3163_v60 = vld [vmem:[%s4259_s1 + $0x224] ss:$8 sps:$4 sm:$0xff]   ;;  %v459_v12 = vshrl.u32 %v448_v61, 16  ;;  %v3203_v0 = vld [vmem:[%s4259_s1 + $0x290] ss:$8 sps:$4 sm:$0xff]  }
  0x87   : > { %2277 = vmatpush1.bf16.msra.mxu1 %v3149_v11  ;;  %v457_v11 = vcombine.high %v455_v3, %v455_v3  ;;  %v504_v15 = vcombine.low %v414_v2, %v421_v6  ;;  %v310_v19 = vcombine.low %v302_v1, %v309_v10  ;;  %v3208_v1 = vld [vmem:[%s4259_s1 + $0x694] ss:$8 sps:$4 sm:$0xff]   ;;  %v3211_v2 = vld [vmem:[%s4259_s1 + $0x2a4] ss:$8 sps:$4 sm:$0xff]   ;;  %v3206_v6 = vld [vmem:[%s4259_s1 + $0x690] ss:$8 sps:$4 sm:$0xff]  }
  0x88   : > { %2278 = vmatprep.subr.bf16.mxu1 %v3157_v13  ;;  %2432 = vmatmul.mubr.bf16.vlgmr.msra.gmra.mrb[0].mxu0 %v3634_v5  ;;  %v3169_v5 = vld [vmem:[%s4259_s1 + $0x234] ss:$8 sps:$4 sm:$0xff]   ;;  %v461_v13 = vshll.u32 %v448_v61, 16 }
  0x89   : > { %2441 = vmatpush1.bf16.msra.mxu0 %v3152_v18  ;;  %v468_v18 = vshll.u32 %v456_v8, 16  ;;  %v518_v24 = vrot.slane %v504_v15, %v3529_v50  ;;  %v480_v26 = vshrl.u32 %v457_v11, 16  ;;  %v482_v27 = vshll.u32 %v457_v11, 16  ;;  %350 = vst [vmem:[#allocation2 + $0x8] sm:$0x55] %v310_v19 }
  0x8a   : > { %2442 = vmatprep.subr.bf16.mxu0 %v3160_v28  ;;  %v463_v20 = vrot.slane %v461_v13, 1  ;;  %v3178_v28 = vld [vmem:[%s4259_s1 + $0x644] ss:$8 sps:$4 sm:$0xff]   ;;  %v3217_v10 = vld [vmem:[%s4259_s1 + $0x2b4] ss:$8 sps:$4 sm:$0xff]  }
  0x8b   : > { %2279 = vmatpush1.bf16.msra.mxu1 %v3155_v23  ;;  %v3173_v23 = vld [vmem:[%s4259_s1 + $0x240] ss:$8 sps:$4 sm:$0xff]   ;;  %v470_v25 = vrot.slane %v468_v18, 1  ;;  %v519_v32 = vcombine.low %v511_v16, %v518_v24  ;;  %v484_v33 = vrot.slane %v482_v27, 1  ;;  %v3214_v8 = vld [vmem:[%s4259_s1 + $0x6a4] ss:$8 sps:$4 sm:$0xff]  }
  0x8c   : > { %2280 = vmatprep.subr.bf16.mxu1 %v3163_v60  ;;  %v464_v30 = vor.u32 %v463_v20, %v459_v12  ;;  %v3212_v11 = vld [vmem:[%s4259_s1 + $0x6a0] ss:$8 sps:$4 sm:$0xff]   ;;  %v3215_v12 = vld [vmem:[%s4259_s1 + $0x2b0] ss:$8 sps:$4 sm:$0xff]   ;;  %v3220_v13 = vld [vmem:[%s4259_s1 + $0x6b4] ss:$8 sps:$4 sm:$0xff]  }
  0x8d   : > { %2443 = vmatpush1.bf16.msra.mxu0 %v3158_v37  ;;  %v471_v60 = vor.u32 %v470_v25, %v466_v17  ;;  %v555_v37 = vrot.slane %v519_v32, 7  ;;  %352 = vst [vmem:[#allocation2 + $0x18] sm:$0x55] %v519_v32  ;;  %v485_v38 = vor.u32 %v484_v33, %v480_v26  ;;  %v3218_v15 = vld [vmem:[%s4259_s1 + $0x6b0] ss:$8 sps:$4 sm:$0xff]  }
  0x8e   : > { %2444 = vmatprep.subr.bf16.mxu0 %v3166_v48  ;;  %v3193_v48 = vld [vmem:[%s4259_s1 + $0x274] ss:$8 sps:$4 sm:$0xff]   ;;  %v3221_v16 = vld [vmem:[%s4259_s1 + $0x2c0] ss:$8 sps:$4 sm:$0xff]   ;;  %v3226_v17 = vld [vmem:[%s4259_s1 + $0x6c4] ss:$8 sps:$4 sm:$0xff]  }
  0x8f   : > { %2281 = vmatpush1.bf16.msra.mxu1 %v3161_v43  ;;  %v537_v39 = vcombine.low %v464_v30, %v471_v60  ;;  %563 = vst [vmem:[#allocation2 + $0x8] sm:$0xaa] %v555_v37  ;;  %v538_v42 = vcombine.low %v478_v34, %v485_v38  ;;  %v3229_v18 = vld [vmem:[%s4259_s1 + $0x2d4] ss:$8 sps:$4 sm:$0xff]   ;;  %v3224_v19 = vld [vmem:[%s4259_s1 + $0x6c0] ss:$8 sps:$4 sm:$0xff]  }
  0x90   : > { %2282 = vmatprep.subr.bf16.mxu1 %v3169_v5  ;;  %v3227_v20 = vld [vmem:[%s4259_s1 + $0x2d0] ss:$8 sps:$4 sm:$0xff]   ;;  %v3233_v24 = vld [vmem:[%s4259_s1 + $0x2e0] ss:$8 sps:$4 sm:$0xff]   ;;  %v3238_v25 = vld [vmem:[%s4259_s1 + $0x6e4] ss:$8 sps:$4 sm:$0xff]  }
  0x91   : > { %2445 = vmatpush1.bf16.msra.mxu0 %v3164_v62  ;;  %v545_v43 = vrot.slane %v537_v39, %v3529_v50  ;;  %v552_v46 = vrot.slane %v538_v42, %v3529_v50  ;;  %v3205_v62 = vld [vmem:[%s4259_s1 + $0x294] ss:$8 sps:$4 sm:$0xff]   ;;  %v3242_v33 = vld [vmem:[%s4259_s1 + $0x6f0] ss:$8 sps:$4 sm:$0xff]   ;;  %v3247_v34 = vld [vmem:[%s4259_s1 + $0x300] ss:$8 sps:$4 sm:$0xff]  }
  0x92   : > { %2446 = vmatprep.subr.bf16.mxu0 %v3172_v4  ;;  %v3241_v26 = vld [vmem:[%s4259_s1 + $0x2f4] ss:$8 sps:$4 sm:$0xff]   ;;  %v3251_v39 = vld [vmem:[%s4259_s1 + $0x700] ss:$8 sps:$4 sm:$0xff]  }
  0x93   : > { %2283 = vmatpush1.bf16.msra.mxu1 %v3167_v63  ;;  %v553_v49 = vcombine.low %v545_v43, %v552_v46  ;;  %v3200_v63 = vld [vmem:[%s4259_s1 + $0x680] ss:$8 sps:$4 sm:$0xff]   ;;  %v3244_v30 = vld [vmem:[%s4259_s1 + $0x6f4] ss:$8 sps:$4 sm:$0xff]   ;;  %v3257_v43 = vld [vmem:[%s4259_s1 + $0x710] ss:$8 sps:$4 sm:$0xff]  }
  0x94   : > { %2284 = vmatprep.subr.bf16.mxu1 %v3175_v9  ;;  %v3268_v46 = vld [vmem:[%s4259_s1 + $0x334] ss:$8 sps:$4 sm:$0xff]  }
  0x95   : > { %2447 = vmatpush1.bf16.msra.mxu0 %v3170_v14  ;;  %v557_v5 = vrot.slane %v553_v49, 7  ;;  %v3223_v14 = vld [vmem:[%s4259_s1 + $0x2c4] ss:$8 sps:$4 sm:$0xff]   ;;  %v3271_v49 = vld [vmem:[%s4259_s1 + $0x734] ss:$8 sps:$4 sm:$0xff]  }
  0x96   : > { %2448 = vmatprep.subr.bf16.mxu0 %v3178_v28  ;;  %v3925_v55 = vld [vmem:[#allocation2 + $0x8] sm:$0xff] }
  0x97   : > { %2285 = vmatpush1.bf16.msra.mxu1 %v3173_v23  ;;  %v3929_v56 = vrot.slane %v3925_v55, %v3529_v50  ;;  %565 = vst [vmem:[#allocation2 + $0x18] sm:$0xaa] %v557_v5  ;;  %v3230_v23 = vld [vmem:[%s4259_s1 + $0x6d0] ss:$8 sps:$4 sm:$0xff]   ;;  %v847_v27 = vcombine.high %v3925_v55, %v3925_v55  ;;  %v3236_v28 = vld [vmem:[%s4259_s1 + $0x6e0] ss:$8 sps:$4 sm:$0xff]  }
  0x98   : > { %2286 = vmatprep.subr.bf16.mxu1 %v3181_v29  ;;  %v3239_v29 = vld [vmem:[%s4259_s1 + $0x2f0] ss:$8 sps:$4 sm:$0xff]   ;;  %v3277_v5 = vld [vmem:[%s4259_s1 + $0x744] ss:$8 sps:$4 sm:$0xff]   ;;  %v3275_v55 = vld [vmem:[%s4259_s1 + $0x740] ss:$8 sps:$4 sm:$0xff]  }
  0x99   : > { %2449 = vmatpush1.bf16.msra.mxu0 %v3176_v35  ;;  %v862_v61 = vcombine.high %v3929_v56, %v3929_v56  ;;  %v4040_v32 = vrot.slane %v847_v27, %v3529_v50  ;;  %v3253_v35 = vld [vmem:[%s4259_s1 + $0x704] ss:$8 sps:$4 sm:$0xff]   ;;  %v3331_v27 = vld [vmem:[%s4259_s1 + $0x7d4] ss:$8 sps:$4 sm:$0xff]  }
  0x9a   : > { %2450 = vmatprep.subr.bf16.mxu0 %v3184_v40  ;;  %v3254_v40 = vld [vmem:[%s4259_s1 + $0x310] ss:$8 sps:$4 sm:$0xff]  }
  0x9b   : > { %2287 = vmatpush1.bf16.msra.mxu1 %v3179_v36  ;;  %2308 = vmatprep.mubr.bf16.mxu1 %v862_v61  ;;  %v3256_v36 = vld [vmem:[%s4259_s1 + $0x314] ss:$8 sps:$4 sm:$0xff]   ;;  %v863_v37 = vcombine.high %v4040_v32, %v4040_v32  ;;  %v3284_v61 = vld [vmem:[%s4259_s1 + $0x360] ss:$8 sps:$4 sm:$0xff]  }
  0x9c   : > { %2288 = vmatprep.subr.bf16.mxu1 %v3187_v41  ;;  %v3259_v41 = vld [vmem:[%s4259_s1 + $0x714] ss:$8 sps:$4 sm:$0xff]  }
  0x9d   : > { %2451 = vmatpush1.bf16.msra.mxu0 %v3182_v44  ;;  %v3260_v44 = vld [vmem:[%s4259_s1 + $0x320] ss:$8 sps:$4 sm:$0xff]  }
  0x9e   : > { %2452 = vmatprep.subr.bf16.mxu0 %v3190_v47  ;;  %v3957_v3 = vld [vmem:[#allocation2 + $0x18] sm:$0xff]  ;;  %v3263_v47 = vld [vmem:[%s4259_s1 + $0x720] ss:$8 sps:$4 sm:$0xff]  }
  0x9f   : > { %2289 = vmatpush1.bf16.msra.mxu1 %v3185_v45  ;;  %v3961_v4 = vrot.slane %v3957_v3, %v3529_v50  ;;  %v881_v60 = vcombine.high %v3957_v3, %v3957_v3  ;;  %v3265_v45 = vld [vmem:[%s4259_s1 + $0x724] ss:$8 sps:$4 sm:$0xff]  }
  0xa0   : > { %2290 = vmatprep.subr.bf16.mxu1 %v3193_v48  ;;  %v3266_v48 = vld [vmem:[%s4259_s1 + $0x330] ss:$8 sps:$4 sm:$0xff]   ;;  %v3298_v3 = vld [vmem:[%s4259_s1 + $0x384] ss:$8 sps:$4 sm:$0xff]  }
  0xa1   : > { %2453 = vmatpush1.bf16.msra.mxu0 %v3188_v51  ;;  %v896_v9 = vcombine.high %v3961_v4, %v3961_v4  ;;  %v4059_v38 = vrot.slane %v881_v60, %v3529_v50  ;;  %v3262_v50 = vld [vmem:[%s4259_s1 + $0x324] ss:$8 sps:$4 sm:$0xff]   ;;  %v3340_v60 = vld [vmem:[%s4259_s1 + $0x3f4] ss:$8 sps:$4 sm:$0xff]  }
  0xa2   : > { %2454 = vmatprep.subr.bf16.mxu0 %v3196_v53  ;;  %v3274_v51 = vld [vmem:[%s4259_s1 + $0x344] ss:$8 sps:$4 sm:$0xff]   ;;  %v3272_v53 = vld [vmem:[%s4259_s1 + $0x340] ss:$8 sps:$4 sm:$0xff]  }
  0xa3   : > { %2291 = vmatpush1.bf16.msra.mxu1 %v3191_v52  ;;  %2472 = vmatprep.mubr.bf16.mxu0 %v896_v9  ;;  %v897_v42 = vcombine.high %v4059_v38, %v4059_v38  ;;  %v3269_v52 = vld [vmem:[%s4259_s1 + $0x730] ss:$8 sps:$4 sm:$0xff]   ;;  %v3299_v9 = vld [vmem:[%s4259_s1 + $0x780] ss:$8 sps:$4 sm:$0xff]  }
  0xa4   : > { %2292 = vmatprep.subr.bf16.mxu1 %v3199_v54  ;;  %v3280_v54 = vld [vmem:[%s4259_s1 + $0x354] ss:$8 sps:$4 sm:$0xff]  }
  0xa5   : > { %2455 = vmatpush1.bf16.msra.mxu0 %v3194_v57  ;;  %v3283_v57 = vld [vmem:[%s4259_s1 + $0x754] ss:$8 sps:$4 sm:$0xff]  }
  0xa6   : > { %2456 = vmatprep.subr.bf16.mxu0 %v3202_v59  ;;  %v3281_v59 = vld [vmem:[%s4259_s1 + $0x750] ss:$8 sps:$4 sm:$0xff]  }
  0xa7   : > { %2293 = vmatpush1.bf16.msra.mxu1 %v3197_v58  ;;  %v3286_v58 = vld [vmem:[%s4259_s1 + $0x364] ss:$8 sps:$4 sm:$0xff]  }
  0xa8   : > { %2294 = vmatprep.subr.bf16.mxu1 %v3205_v62  ;;  %v3289_v62 = vld [vmem:[%s4259_s1 + $0x764] ss:$8 sps:$4 sm:$0xff]  }
  0xa9   : > { %2457 = vmatpush1.bf16.msra.mxu0 %v3200_v63  ;;  %v3292_v63 = vld [vmem:[%s4259_s1 + $0x374] ss:$8 sps:$4 sm:$0xff]  }
  0xaa   : > { %2458 = vmatprep.subr.bf16.mxu0 %v3208_v1  ;;  %v3290_v1 = vld [vmem:[%s4259_s1 + $0x370] ss:$8 sps:$4 sm:$0xff]  }
  0xab   : > { %2295 = vmatpush1.bf16.msra.mxu1 %v3203_v0  ;;  %v3287_v0 = vld [vmem:[%s4259_s1 + $0x760] ss:$8 sps:$4 sm:$0xff]  }
  0xac   : > { %2296 = vmatprep.subr.bf16.mxu1 %v3211_v2  ;;  %v3295_v2 = vld [vmem:[%s4259_s1 + $0x774] ss:$8 sps:$4 sm:$0xff]  }
  0xad   : > { %2459 = vmatpush1.bf16.msra.mxu0 %v3206_v6  ;;  %v3296_v6 = vld [vmem:[%s4259_s1 + $0x380] ss:$8 sps:$4 sm:$0xff]  }
  0xae   : > { %2460 = vmatprep.subr.bf16.mxu0 %v3214_v8  ;;  %v3304_v8 = vld [vmem:[%s4259_s1 + $0x394] ss:$8 sps:$4 sm:$0xff]  }
  0xaf   : > { %2297 = vmatpush1.bf16.msra.mxu1 %v3209_v7  ;;  %v3301_v7 = vld [vmem:[%s4259_s1 + $0x784] ss:$8 sps:$4 sm:$0xff]  }
  0xb0   : > { %2298 = vmatprep.subr.bf16.mxu1 %v3217_v10  ;;  %v3302_v10 = vld [vmem:[%s4259_s1 + $0x390] ss:$8 sps:$4 sm:$0xff]  }
  0xb1   : > { %2461 = vmatpush1.bf16.msra.mxu0 %v3212_v11  ;;  %v3307_v11 = vld [vmem:[%s4259_s1 + $0x794] ss:$8 sps:$4 sm:$0xff]  }
  0xb2   : > { %2462 = vmatprep.subr.bf16.mxu0 %v3220_v13  ;;  %v3305_v13 = vld [vmem:[%s4259_s1 + $0x790] ss:$8 sps:$4 sm:$0xff]  }
  0xb3   : > { %2299 = vmatpush1.bf16.msra.mxu1 %v3215_v12  ;;  %v3310_v12 = vld [vmem:[%s4259_s1 + $0x3a4] ss:$8 sps:$4 sm:$0xff]  }
  0xb4   : > { %2300 = vmatprep.subr.bf16.mxu1 %v3223_v14  ;;  %v3308_v14 = vld [vmem:[%s4259_s1 + $0x3a0] ss:$8 sps:$4 sm:$0xff]  }
  0xb5   : > { %2463 = vmatpush1.bf16.msra.mxu0 %v3218_v15  ;;  %v3313_v15 = vld [vmem:[%s4259_s1 + $0x7a4] ss:$8 sps:$4 sm:$0xff]  }
  0xb6   : > { %2464 = vmatprep.subr.bf16.mxu0 %v3226_v17  ;;  %v3311_v17 = vld [vmem:[%s4259_s1 + $0x7a0] ss:$8 sps:$4 sm:$0xff]  }
  0xb7   : > { %2301 = vmatpush1.bf16.msra.mxu1 %v3221_v16  ;;  %v3316_v16 = vld [vmem:[%s4259_s1 + $0x3b4] ss:$8 sps:$4 sm:$0xff]  }
  0xb8   : > { %2302 = vmatprep.subr.bf16.mxu1 %v3229_v18  ;;  %v3314_v18 = vld [vmem:[%s4259_s1 + $0x3b0] ss:$8 sps:$4 sm:$0xff]  }
  0xb9   : > { %2465 = vmatpush1.bf16.msra.mxu0 %v3224_v19  ;;  %v3319_v19 = vld [vmem:[%s4259_s1 + $0x7b4] ss:$8 sps:$4 sm:$0xff]  }
  0xba   : > { %2466 = vmatprep.subr.bf16.mxu0 %v3232_v21  ;;  %v3317_v21 = vld [vmem:[%s4259_s1 + $0x7b0] ss:$8 sps:$4 sm:$0xff]  }
  0xbb   : > { %2303 = vmatpush1.bf16.msra.mxu1 %v3227_v20  ;;  %v3322_v20 = vld [vmem:[%s4259_s1 + $0x3c4] ss:$8 sps:$4 sm:$0xff]  }
  0xbc   : > { %2304 = vmatprep.subr.bf16.mxu1 %v3235_v22  ;;  %v3320_v22 = vld [vmem:[%s4259_s1 + $0x3c0] ss:$8 sps:$4 sm:$0xff]  }
  0xbd   : > { %2467 = vmatpush1.bf16.msra.mxu0 %v3230_v23  ;;  %v3325_v23 = vld [vmem:[%s4259_s1 + $0x7c4] ss:$8 sps:$4 sm:$0xff]  }
  0xbe   : > { %2468 = vmatprep.subr.bf16.mxu0 %v3238_v25  ;;  %v3323_v25 = vld [vmem:[%s4259_s1 + $0x7c0] ss:$8 sps:$4 sm:$0xff]  }
  0xbf   : > { %2305 = vmatpush1.bf16.msra.mxu1 %v3233_v24  ;;  %v3328_v24 = vld [vmem:[%s4259_s1 + $0x3d4] ss:$8 sps:$4 sm:$0xff]  }
  0xc0   : > { %2306 = vmatprep.subr.bf16.mxu1 %v3241_v26  ;;  %v3326_v26 = vld [vmem:[%s4259_s1 + $0x3d0] ss:$8 sps:$4 sm:$0xff]  }
  0xc1   : > { %2469 = vmatpush1.bf16.msra.mxu0 %v3236_v28  ;;  %v3334_v28 = vld [vmem:[%s4259_s1 + $0x3e4] ss:$8 sps:$4 sm:$0xff]  }
  0xc2   : > { %2470 = vmatprep.subr.bf16.mxu0 %v3244_v30  ;;  %v3332_v30 = vld [vmem:[%s4259_s1 + $0x3e0] ss:$8 sps:$4 sm:$0xff]  }
  0xc3   : > { %2307 = vmatpush1.bf16.msra.mxu1 %v3239_v29  ;;  %v3329_v29 = vld [vmem:[%s4259_s1 + $0x7d0] ss:$8 sps:$4 sm:$0xff]  }
  0xc4   : > { %2317 = vmatprep.subr.bf16.mxu1 %v3249_v31  ;;  %v3337_v31 = vld [vmem:[%s4259_s1 + $0x7e4] ss:$8 sps:$4 sm:$0xff]  }
  0xc5   : > { %2471 = vmatpush1.bf16.msra.mxu0 %v3242_v33  ;;  %v3335_v33 = vld [vmem:[%s4259_s1 + $0x7e0] ss:$8 sps:$4 sm:$0xff]  }
  0xc6   : > { %2309 = vmatmul.mubr.bf16.vlgmr.msra.gmra.mrb[0].mxu1 %v3929_v56  ;;  %2481 = vmatprep.subr.bf16.mxu0 %v3253_v35  ;;  %v3278_v56 = vld [vmem:[%s4259_s1 + $0x350] ss:$8 sps:$4 sm:$0xff]   ;;  %v3343_v35 = vld [vmem:[%s4259_s1 + $0x7f4] ss:$8 sps:$4 sm:$0xff]  }
  0xc7   : > { %2318 = vmatpush1.bf16.msra.mxu1 %v3247_v34  ;;  %2349 = vmatprep.mubr.bf16.mxu1 %v863_v37  ;;  %v3338_v34 = vld [vmem:[%s4259_s1 + $0x3f0] ss:$8 sps:$4 sm:$0xff]  }
  0xc8   : > { %2319 = vmatprep.subr.bf16.mxu1 %v3256_v36  ;;  %2473 = vmatmul.mubr.bf16.vlgmr.msra.gmra.mrb[0].mxu0 %v3961_v4  ;;  %v3293_v4 = vld [vmem:[%s4259_s1 + $0x770] ss:$8 sps:$4 sm:$0xff]  }
  0xc9   : > { %2482 = vmatpush1.bf16.msra.mxu0 %v3251_v39  ;;  %2513 = vmatprep.mubr.bf16.mxu0 %v897_v42  ;;  %v3341_v36 = vld [vmem:[%s4259_s1 + $0x7f0] ss:$8 sps:$4 sm:$0xff]  }
  0xca   : > { %2483 = vmatprep.subr.bf16.mxu0 %v3259_v41 }
  0xcb   : > { %2320 = vmatpush1.bf16.msra.mxu1 %v3254_v40 }
  0xcc   : > { %2321 = vmatprep.subr.bf16.mxu1 %v3262_v50 }
  0xcd   : > { %2484 = vmatpush1.bf16.msra.mxu0 %v3257_v43 }
  0xce   : > { %2485 = vmatprep.subr.bf16.mxu0 %v3265_v45 }
  0xcf   : > { %2322 = vmatpush1.bf16.msra.mxu1 %v3260_v44 }
  0xd0   : > { %2323 = vmatprep.subr.bf16.mxu1 %v3268_v46 }
  0xd1   : > { %2486 = vmatpush1.bf16.msra.mxu0 %v3263_v47 }
  0xd2   : > { %2487 = vmatprep.subr.bf16.mxu0 %v3271_v49 }
  0xd3   : > { %2324 = vmatpush1.bf16.msra.mxu1 %v3266_v48 }
  0xd4   : > { %2325 = vmatprep.subr.bf16.mxu1 %v3274_v51 }
  0xd5   : > { %2488 = vmatpush1.bf16.msra.mxu0 %v3269_v52 }
  0xd6   : > { %2489 = vmatprep.subr.bf16.mxu0 %v3277_v5 }
  0xd7   : > { %2326 = vmatpush1.bf16.msra.mxu1 %v3272_v53 }
  0xd8   : > { %2327 = vmatprep.subr.bf16.mxu1 %v3280_v54 }
  0xd9   : > { %2490 = vmatpush1.bf16.msra.mxu0 %v3275_v55 }
  0xda   : > { %2491 = vmatprep.subr.bf16.mxu0 %v3283_v57 }
  0xdb   : > { %2328 = vmatpush1.bf16.msra.mxu1 %v3278_v56 }
  0xdc   : > { %2329 = vmatprep.subr.bf16.mxu1 %v3286_v58 }
  0xdd   : > { %2492 = vmatpush1.bf16.msra.mxu0 %v3281_v59 }
  0xde   : > { %2493 = vmatprep.subr.bf16.mxu0 %v3289_v62 }
  0xdf   : > { %2330 = vmatpush1.bf16.msra.mxu1 %v3284_v61 }
  0xe0   : > { %2331 = vmatprep.subr.bf16.mxu1 %v3292_v63 }
  0xe1   : > { %2494 = vmatpush1.bf16.msra.mxu0 %v3287_v0 }
  0xe2   : > { %2495 = vmatprep.subr.bf16.mxu0 %v3295_v2 }
  0xe3   : > { %2332 = vmatpush1.bf16.msra.mxu1 %v3290_v1 }
  0xe4   : > { %2333 = vmatprep.subr.bf16.mxu1 %v3298_v3 }
  0xe5   : > { %2496 = vmatpush1.bf16.msra.mxu0 %v3293_v4 }
  0xe6   : > { %2497 = vmatprep.subr.bf16.mxu0 %v3301_v7 }
  0xe7   : > { %2334 = vmatpush1.bf16.msra.mxu1 %v3296_v6 }
  0xe8   : > { %2335 = vmatprep.subr.bf16.mxu1 %v3304_v8 }
  0xe9   : > { %2498 = vmatpush1.bf16.msra.mxu0 %v3299_v9 }
  0xea   : > { %2499 = vmatprep.subr.bf16.mxu0 %v3307_v11 }
  0xeb   : > { %2336 = vmatpush1.bf16.msra.mxu1 %v3302_v10 }
  0xec   : > { %2337 = vmatprep.subr.bf16.mxu1 %v3310_v12 }
  0xed   : > { %2500 = vmatpush1.bf16.msra.mxu0 %v3305_v13 }
  0xee   : > { %2501 = vmatprep.subr.bf16.mxu0 %v3313_v15 }
  0xef   : > { %2338 = vmatpush1.bf16.msra.mxu1 %v3308_v14 }
  0xf0   : > { %2339 = vmatprep.subr.bf16.mxu1 %v3316_v16 }
  0xf1   : > { %2502 = vmatpush1.bf16.msra.mxu0 %v3311_v17 }
  0xf2   : > { %2503 = vmatprep.subr.bf16.mxu0 %v3319_v19 }
  0xf3   : > { %2340 = vmatpush1.bf16.msra.mxu1 %v3314_v18 }
  0xf4   : > { %2341 = vmatprep.subr.bf16.mxu1 %v3322_v20 }
  0xf5   : > { %2504 = vmatpush1.bf16.msra.mxu0 %v3317_v21 }
  0xf6   : > { %2505 = vmatprep.subr.bf16.mxu0 %v3325_v23 }
  0xf7   : > { %2342 = vmatpush1.bf16.msra.mxu1 %v3320_v22 }
  0xf8   : > { %2343 = vmatprep.subr.bf16.mxu1 %v3328_v24 }
  0xf9   : > { %2506 = vmatpush1.bf16.msra.mxu0 %v3323_v25 }
  0xfa   : > { %2507 = vmatprep.subr.bf16.mxu0 %v3331_v27 }
  0xfb   : > { %2344 = vmatpush1.bf16.msra.mxu1 %v3326_v26 }
  0xfc   : > { %2345 = vmatprep.subr.bf16.mxu1 %v3334_v28 }
  0xfd   : > { %2508 = vmatpush1.bf16.msra.mxu0 %v3329_v29 }
  0xfe   : > { %2509 = vmatprep.subr.bf16.mxu0 %v3337_v31 }
  0xff   : > { %2346 = vmatpush1.bf16.msra.mxu1 %v3332_v30 }
 0x100   : > { %2347 = vmatprep.subr.bf16.mxu1 %v3340_v60 }
 0x101   : > { %2510 = vmatpush1.bf16.msra.mxu0 %v3335_v33 }
 0x102   : > { %2511 = vmatprep.subr.bf16.mxu0 %v3343_v35 }
 0x103   : > { %2348 = vmatpush1.bf16.msra.mxu1 %v3338_v34 }
 0x105   : > { %2512 = vmatpush1.bf16.msra.mxu0 %v3341_v36 }
 0x106   : > { %2350 = vmatmul.mubr.bf16.vlgmr.msra.gmra.mrb[0].mxu1 %v4040_v32 }
 0x108   : > { %2514 = vmatmul.mubr.bf16.vlgmr.msra.gmra.mrb[0].mxu0 %v4059_v38 }
 0x1d9   : > { %v2351_v37 = vpop.f32.mrb[0].mxu1 }
 0x1da   : > { %v2353_v39 = vpop.f32.mrb[1].mxu1 }
 0x1db   : > { %v2355_v40 = vpop.f32.mrb[2].mxu1  ;;  %v2515_v50 = vpop.f32.mrb[0].mxu0 }
 0x1dc   : > { %v2356_v41 = vpop.f32.mrb[3].mxu1  ;;  %v2915_v42 = vadd.f32 %v2515_v50, %v2351_v37  ;;  %v2517_v43 = vpop.f32.mrb[1].mxu0 }
 0x1dd   : > { %v2916_v44 = vadd.f32 %v2517_v43, %v2353_v39  ;;  %v2519_v45 = vpop.f32.mrb[2].mxu0 }
 0x1de   : > { %v2523_v46 = vsel %vm2522_vm0, %v2915_v42, 0.0  ;;  %v2520_v47 = vpop.f32.mrb[3].mxu0 }
 0x1df   : > { %v2524_v48 = vrot.slane %v2523_v46, 4  ;;  %v2530_v49 = vsel %vm2522_vm0, %v2916_v44, 0.0 }
 0x1e0   : > { %v2531_v32 = vrot.slane %v2530_v49, 4 }
 0x1e1   : > { %v2525_v51 = vadd.f32 %v2524_v48, %v2523_v46 }
 0x1e2   : > { %v2532_v52 = vadd.f32 %v2531_v32, %v2530_v49 }
 0x1e3   : > { %v2526_v38 = vrot.slane %v2525_v51, 2 }
 0x1e4   : > { %v2533_v53 = vrot.slane %v2532_v52, 2 }
 0x1e5   : > { %v2527_v5 = vadd.f32 %v2526_v38, %v2525_v51 }
 0x1e6   : > { %v2534_v54 = vadd.f32 %v2533_v53, %v2532_v52 }
 0x1e7   : > { %v2528_v55 = vrot.slane %v2527_v5, 1 }
 0x1e8   : > { %v2535_v56 = vrot.slane %v2534_v54, 1 }
 0x1e9   : > { %v2529_v57 = vadd.f32 %v2528_v55, %v2527_v5 }
 0x1ea   : > { %v2536_v58 = vadd.f32 %v2535_v56, %v2534_v54 }
 0x1eb   : > { %v2537_v59 = vmul.f32 0.25, %v2529_v57 }
 0x1ec   : > { %v2538_v61 = vmul.f32 0.25, %v2536_v58 }
 0x1ed   : > { %v2539_v62 = vsub.f32 %v2915_v42, %v2537_v59 }
 0x1ee   : > { %v2540_v63 = vsub.f32 %v2916_v44, %v2538_v61 }
 0x1ef   : > { %v2541_v0 = vmul.f32 %v2539_v62, %v2539_v62 }
 0x1f0   : > { %v2542_v1 = vmul.f32 %v2540_v63, %v2540_v63 }
 0x1f1   : > { %v2543_v2 = vsel %vm2522_vm0, %v2541_v0, 0.0 }
 0x1f2   : > { %v2544_v3 = vrot.slane %v2543_v2, 4  ;;  %v2550_v4 = vsel %vm2522_vm0, %v2542_v1, 0.0 }
 0x1f3   : > { %v2551_v6 = vrot.slane %v2550_v4, 4 }
 0x1f4   : > { %v2545_v7 = vadd.f32 %v2544_v3, %v2543_v2 }
 0x1f5   : > { %v2552_v8 = vadd.f32 %v2551_v6, %v2550_v4 }
 0x1f6   : > { %v2546_v9 = vrot.slane %v2545_v7, 2 }
 0x1f7   : > { %v2553_v10 = vrot.slane %v2552_v8, 2 }
 0x1f8   : > { %v2547_v11 = vadd.f32 %v2546_v9, %v2545_v7 }
 0x1f9   : > { %v2554_v12 = vadd.f32 %v2553_v10, %v2552_v8 }
 0x1fa   : > { %v2548_v13 = vrot.slane %v2547_v11, 1 }
 0x1fb   : > { %v2555_v14 = vrot.slane %v2554_v12, 1 }
 0x1fc   : > { %v2549_v15 = vadd.f32 %v2548_v13, %v2547_v11 }
 0x1fd   : > { %v2556_v16 = vadd.f32 %v2555_v14, %v2554_v12 }
 0x1fe   : > { %v2557_v17 = vmul.f32 0.25, %v2549_v15 }
 0x1ff   : > { %v2558_v18 = vmul.f32 0.25, %v2556_v16 }
 0x200   : > { %v2559_v19 = vadd.f32 1e-05, %v2557_v17 }
 0x201   : > { %v2560_v20 = vadd.f32 1e-05, %v2558_v18 }
 0x202   : > { %3346 = vrsqrt.f32 %v2559_v19 }
 0x203   : > { %3348 = vrsqrt.f32 %v2560_v20 }
 0x20c   : > { %v3347_v21 = vpop.eup %3346 }
 0x20d   : > { %v3349_v22 = vpop.eup %3348  ;;  %v2563_v23 = vmul.f32 %v3347_v21, %v2539_v62 }
 0x20e   : > { %v2564_v24 = vmul.f32 %v3349_v22, %v2540_v63 }
 0x20f   : > { %vm2565_vm1 = vcmp.ge.f32.partialorder %v2563_v23, 0.0  ;;  %v2567_v25 = vmul.f32 0.01, %v2563_v23 }
 0x210   : > { %vm2566_vm2 = vcmp.ge.f32.partialorder %v2564_v24, 0.0  ;;  %v2568_v26 = vmul.f32 0.01, %v2564_v24 }
 0x211   : > { %v2569_v27 = vsel %vm2565_vm1, %v2563_v23, %v2567_v25 }
 0x212   : > { %v2570_v28 = vsel %vm2566_vm2, %v2564_v24, %v2568_v26 }
 0x213   : > { %v2910_v29 = vpack.c.bf16 %v2570_v28, %v2569_v27 }
 0x215   : > { %2911 = vst.sshfl [vmem:[%s143_s16] sm:$0x33 pattern:$0x76325410] %v2910_v29 }
 0x216 PF: > { %s12_s9 = sadd.s32 1, %s3356_s9  }
 0x217   : > { %p9_p4 = scmp.ge.s32.totalorder %s12_s9, 4  }
 0x219   :  { %11 = sbr.rel (!%p9_p4) target bundleno = 1 (0x1), region = 60 }

</bundles_post_ra>
